<compile_context>
chip_gen: v5e
topology: v5e:2x2
jax: 0.10.0
libtpu: 0.0.40
codegen_flags: <defaults>
</compile_context>

<pallas_src>
import jax
import jax.numpy as jnp
from jax.experimental import pallas as pl
from jax.experimental.pallas import tpu as pltpu

_VMEM = pltpu.MemorySpace.VMEM
_VMEM_LIMIT_BYTES = 32 * 1024 * 1024


# ----------------------------- Pallas kernels ------------------------------

def _view_fusion_kernel(x_ref, w1_ref, b1_ref, w2_ref, b2_ref, o_ref):
    """ViewTransformation: per-view Linear->ReLU->Linear->ReLU.

    All six views are handled by one kernel invocation (no per-view grid steps
    and no lane-sparse per-view DMAs); the static view loop unrolls into plain
    2-D MXU matmuls with bf16 operands and f32 accumulation.
    """
    n_views = x_ref.shape[0]
    for v in range(n_views):
        x = x_ref[v]                                           # (B*C, fv) bf16
        h = jnp.dot(x, w1_ref[v], preferred_element_type=jnp.float32)
        h = jnp.maximum(h + b1_ref[v], 0.0).astype(jnp.bfloat16)
        y = jnp.dot(h, w2_ref[v], preferred_element_type=jnp.float32)
        y = jnp.maximum(y + b2_ref[v], 0.0)
        o_ref[v] = y.astype(o_ref.dtype)


def view_fusion_pallas(x, w1, b1, w2, b2):
    # x: (n_views, B*C, fv_dim) bf16; per-view weights stacked on axis 0.
    n_views, bc, _ = x.shape
    bv = w1.shape[-1]
    vmem_full = pl.BlockSpec(memory_space=_VMEM)   # whole array, VMEM resident
    return pl.pallas_call(
        _view_fusion_kernel,
        out_shape=jax.ShapeDtypeStruct((n_views, bc, bv), jnp.float32),
        in_specs=[vmem_full] * 5,
        out_specs=vmem_full,
        compiler_params=pltpu.CompilerParams(
            vmem_limit_bytes=_VMEM_LIMIT_BYTES),
    )(x, w1, b1, w2, b2)


def _bev_resize_kernel(x_ref, kt_ref, o_ref):
    # rows = (batch*channel) BEV slices; kt = composed bilinear operator
    # (bv_dim, final_H*final_W).  One lane-dense MXU matmul per row tile.
    o = jnp.dot(x_ref[...], kt_ref[...], preferred_element_type=jnp.float32)
    o_ref[...] = o.astype(o_ref.dtype)


def bev_resize_pallas(fused_rows, resize_kt):
    """Composed (IPM-grid resize + 2x align_corners upsample) in one kernel.

    Both bilinear stages are linear, so the per-axis interpolation matrices
    are composed (Wh2 @ Wh1, Ww2 @ Ww1) and combined into one separable
    operator; all B*C channel slices are resized with a single lane-dense
    matmul per row tile instead of 2 kernels x B*C single-slice grid steps.
    """
    # NOTE(perf): at production BEV resolutions the composed operator would be
    # factored back into separable per-axis matmuls tiled over channels to
    # bound the operator size; at these sizes it is only (bv_dim, H*W).
    bc, bv = fused_rows.shape
    p = resize_kt.shape[1]
    tm = min(bc, 512)                    # row tile keeps blocks generation-safe
    return pl.pallas_call(
        _bev_resize_kernel,
        out_shape=jax.ShapeDtypeStruct((bc, p), jnp.bfloat16),
        grid=(pl.cdiv(bc, tm),),
        in_specs=[
            pl.BlockSpec((tm, bv), lambda i: (i, 0), memory_space=_VMEM),
            pl.BlockSpec((bv, p), lambda i: (0, 0), memory_space=_VMEM),
        ],
        out_specs=pl.BlockSpec((tm, p), lambda i: (i, 0), memory_space=_VMEM),
        compiler_params=pltpu.CompilerParams(
            dimension_semantics=("parallel",),
            vmem_limit_bytes=_VMEM_LIMIT_BYTES),
    )(fused_rows, resize_kt)


def _heads_kernel(x_ref, w_ref, b_ref, o_ref):
    # Fused 1x1-conv heads: out[n, p] = sum_c W_t[n, c] * x[c, p] + b[n].
    o = jnp.dot(w_ref[...], x_ref[0], preferred_element_type=jnp.float32)
    o_ref[0] = (o + b_ref[...]).astype(o_ref.dtype)


def heads_pallas(topdown_bcp, w_t, b):
    """Semantic | instance-embedding | direction heads in ONE pallas_call.

    The three 1x1 projections are concatenated (zero-padded to 64 output
    channels) so the topdown activation is read from HBM once, stores are full
    lane width (lanes = H*W), and the result comes out directly in NCHW.
    """
    bsz, c, p = topdown_bcp.shape
    cout = w_t.shape[0]
    tp = min(p, 2048)                    # lane tile: multiple of 128 or full
    return pl.pallas_call(
        _heads_kernel,
        out_shape=jax.ShapeDtypeStruct((bsz, cout, p), jnp.float32),
        grid=(bsz, pl.cdiv(p, tp)),
        in_specs=[
            pl.BlockSpec((1, c, tp), lambda bi, pi: (bi, 0, pi),
                         memory_space=_VMEM),
            pl.BlockSpec((cout, c), lambda bi, pi: (0, 0), memory_space=_VMEM),
            pl.BlockSpec((cout, 1), lambda bi, pi: (0, 0), memory_space=_VMEM),
        ],
        out_specs=pl.BlockSpec((1, cout, tp), lambda bi, pi: (bi, 0, pi),
                               memory_space=_VMEM),
        compiler_params=pltpu.CompilerParams(
            dimension_semantics=("parallel", "parallel"),
            vmem_limit_bytes=_VMEM_LIMIT_BYTES),
    )(topdown_bcp, w_t, b)


# ----------------------------- model plumbing ------------------------------

def gen_dx_bx(xbound, ybound, zbound):
    bounds = (xbound, ybound, zbound)
    dx = [b[2] for b in bounds]
    bx = [b[0] + b[2] / 2.0 for b in bounds]
    nx = [int(round((b[1] - b[0]) / b[2])) for b in bounds]
    return dx, bx, nx


def _bilinear_matrix(in_size, out_size):
    # align_corners=True interpolation matrix, shape (out_size, in_size).
    if out_size == 1:
        # PyTorch align_corners=True with a single output sample reads index 0.
        return jax.nn.one_hot(jnp.zeros((1,), jnp.int32), in_size,
                              dtype=jnp.float32)
    src = (jnp.arange(out_size, dtype=jnp.float32) * (in_size - 1)
           / (out_size - 1))
    i0 = jnp.clip(jnp.floor(src).astype(jnp.int32), 0, max(in_size - 2, 0))
    frac = src - i0.astype(jnp.float32)
    w0 = jax.nn.one_hot(i0, in_size, dtype=jnp.float32) * (1.0 - frac)[:, None]
    w1 = jax.nn.one_hot(jnp.minimum(i0 + 1, in_size - 1), in_size,
                        dtype=jnp.float32) * frac[:, None]
    return w0 + w1


def init_params(key, data_conf, cam_c=64, n_views=6,
                embedded_dim=16, direction_dim=36):
    _, _, nx = gen_dx_bx(data_conf['xbound'], data_conf['ybound'],
                         data_conf['zbound'])
    final_H, final_W = nx[1], nx[0]
    ih, iw = data_conf['image_size']
    fv_size = (ih // 16, iw // 16)
    bv_size = (final_H // 5, final_W // 5)
    fv_dim = fv_size[0] * fv_size[1]
    bv_dim = bv_size[0] * bv_size[1]
    num_ch = data_conf['num_channels']

    ks = jax.random.split(key, 8)

    def w(k, shape, fan_in):
        return (jax.random.normal(k, shape, jnp.float32) /
                jnp.sqrt(jnp.float32(fan_in)))

    # Fused BevEncode-stand-in heads: concat(seg | emb | dir) on the output
    # channel axis and zero-pad to a lane-friendly width (57 -> 64).
    n_head_out = num_ch + embedded_dim + (direction_dim + 1)
    cout_pad = ((n_head_out + 63) // 64) * 64
    w_seg = w(ks[3], (cam_c, num_ch), cam_c)
    w_emb = w(ks[4], (cam_c, embedded_dim), cam_c)
    w_dir = w(ks[5], (cam_c, direction_dim + 1), cam_c)
    w_cat = jnp.concatenate([w_seg, w_emb, w_dir], axis=1)
    w_cat = jnp.pad(w_cat, ((0, 0), (0, cout_pad - n_head_out)))
    head_w_t = w_cat.T.astype(jnp.bfloat16)                  # (cout_pad, camC)
    head_b = jnp.zeros((cout_pad, 1), jnp.float32)

    # Composed bilinear operator: (bv -> final/2) IPM-grid resize chained with
    # nn.Upsample(scale_factor=2, align_corners=True); composed per axis
    # (exactly reproduces the two-pass behaviour), then combined separably.
    wh_tot = (_bilinear_matrix(final_H // 2, final_H)
              @ _bilinear_matrix(bv_size[0], final_H // 2))   # (final_H, bvH)
    ww_tot = (_bilinear_matrix(final_W // 2, final_W)
              @ _bilinear_matrix(bv_size[1], final_W // 2))   # (final_W, bvW)
    resize_kt = jnp.kron(wh_tot, ww_tot).T.astype(jnp.bfloat16)
    # resize_kt: (bv_dim, final_H * final_W)

    params = {
        # TODO(synk): stand-in for CamEncode backbone weights (not provided).
        'cam_proj_w': w(ks[0], (3, cam_c), 3.0),
        'cam_proj_b': jnp.zeros((cam_c,), jnp.float32),
        # ViewTransformation (exact): per-view Linear->ReLU->Linear->ReLU.
        'vt_w1': w(ks[1], (n_views, fv_dim, bv_dim), fv_dim).astype(jnp.bfloat16),
        'vt_b1': jnp.zeros((n_views, 1, bv_dim), jnp.float32),
        'vt_w2': w(ks[2], (n_views, bv_dim, bv_dim), bv_dim).astype(jnp.bfloat16),
        'vt_b2': jnp.zeros((n_views, 1, bv_dim), jnp.float32),
        # TODO(synk): stand-in heads for BevEncode (not provided), fused.
        'head_w_t': head_w_t,
        'head_b': head_b,
        'resize_kt': resize_kt,
    }
    meta = dict(final_H=final_H, final_W=final_W, fv_size=fv_size,
                bv_size=bv_size, cam_c=cam_c, n_views=n_views,
                num_channels=num_ch, embedded_dim=embedded_dim,
                direction_dim_p1=direction_dim + 1, cout_pad=cout_pad)
    return params, meta


def get_Ks_RTs_and_post_RTs(intrins, rots, trans, post_rots, post_trans):
    # Exact reproduction of HDMapNet.get_Ks_RTs_and_post_RTs (plain JAX glue).
    B, N = intrins.shape[:2]
    eye = jnp.broadcast_to(jnp.eye(4, dtype=jnp.float32), (B, N, 4, 4))
    Ks = eye
    Rs = eye.at[:, :, :3, :3].set(jnp.swapaxes(rots, -1, -2))
    Ts = eye.at[:, :, :3, 3].set(-trans)
    RTs = Rs @ Ts
    return Ks, RTs, None


def get_cam_feats(params, meta, img):
    # TODO(synk): CamEncode (EfficientNet-B0 backbone) not provided in the
    # reference; stand-in = 16x average-pool downsample + 1x1 projection to
    # camC.  K=3 is far below MXU / kernel-launch cost, so it is left to XLA
    # where it fuses with the pooling (per performance review).
    B, N, C, H, W = img.shape
    ds = 16
    fh, fw = H // ds, W // ds
    x = img.reshape(B * N, C, fh, ds, fw, ds).mean(axis=(3, 5))  # (B*N,3,fh,fw)
    feat = jnp.einsum('nrhw,rc->nchw', x, params['cam_proj_w'])
    feat = feat + params['cam_proj_b'][None, :, None, None]
    return feat.reshape(B, N, meta['cam_c'], fh, fw)


def view_transformation(params, meta, feat):
    # Exact ViewTransformation: per-view MLP over the flattened feature-view
    # spatial dim.  Returns (N, B*C, bv_dim) rows; everything downstream keeps
    # this (rows, features) layout so no more NCHW<->rows transposes occur.
    B, N, C, fh, fw = feat.shape
    x = jnp.transpose(feat.reshape(B, N, C, fh * fw), (1, 0, 2, 3))
    x = x.reshape(N, B * C, fh * fw).astype(jnp.bfloat16)
    return view_fusion_pallas(x, params['vt_w1'], params['vt_b1'],
                              params['vt_w2'], params['vt_b2'])


def hdmapnet_forward(params, meta, img, trans, rots, intrins, post_trans,
                     post_rots, lidar_data, lidar_mask, car_trans,
                     yaw_pitch_roll):
    B = img.shape[0]
    cam_c = meta['cam_c']
    final_H, final_W = meta['final_H'], meta['final_W']

    feat = get_cam_feats(params, meta, img)             # (B, N, camC, fh, fw)
    y = view_transformation(params, meta, feat)         # (N, B*camC, bv_dim)

    Ks, RTs, post_RTs = get_Ks_RTs_and_post_RTs(intrins, rots, trans,
                                                post_rots, post_trans)
    # TODO(synk): IPM (homography warp using Ks/RTs, car_trans, yaw_pitch_roll)
    # is not provided in the reference; stand-in = mean over camera views.
    del Ks, RTs, post_RTs, car_trans, yaw_pitch_roll, lidar_data, lidar_mask
    fused = jnp.mean(y, axis=0).astype(jnp.bfloat16)    # (B*camC, bv_dim)

    # IPM-grid bilinear resize (-> final/2) + nn.Upsample(scale_factor=2,
    # mode='bilinear', align_corners=True), composed into one Pallas matmul.
    topdown = bev_resize_pallas(fused, params['resize_kt'])   # (B*camC, H*W)
    topdown = topdown.reshape(B, cam_c, final_H * final_W)    # free reshape

    # TODO(synk): BevEncode (ResNet-18 trunk) not provided; stand-in = fused
    # 1x1 heads (semantic | embedding | direction) as one Pallas matmul.
    out = heads_pallas(topdown, params['head_w_t'], params['head_b'])
    out = out.reshape(B, meta['cout_pad'], final_H, final_W)  # already NCHW
    nc = meta['num_channels']
    ed = meta['embedded_dim']
    dd = meta['direction_dim_p1']
    semantic = out[:, :nc]
    embedding = out[:, nc:nc + ed]
    direction = out[:, nc + ed:nc + ed + dd]
    return semantic, embedding, direction


# --------------------------------- main -------------------------------------

if __name__ == "__main__":
    data_conf = {
        'image_size': (32, 64),          # divisible by downsample=16 -> fv (2,4)
        'xbound': [-10.0, 10.0, 0.5],    # final_W = 40
        'ybound': [-5.0, 5.0, 0.5],      # final_H = 20
        'zbound': [-10.0, 10.0, 20.0],
        'num_channels': 4,
    }
    key = jax.random.PRNGKey(0)
    pkey, dkey = jax.random.split(key)
    params, meta = init_params(pkey, data_conf)

    B, N = 2, 6
    ks = jax.random.split(dkey, 6)
    img = jax.random.normal(ks[0], (B, N, 3, 32, 64), jnp.float32)
    trans = jax.random.normal(ks[1], (B, N, 3), jnp.float32)
    rots = (jnp.broadcast_to(jnp.eye(3, dtype=jnp.float32), (B, N, 3, 3))
            + 0.01 * jax.random.normal(ks[2], (B, N, 3, 3), jnp.float32))
    intrins = jnp.broadcast_to(jnp.eye(3, dtype=jnp.float32), (B, N, 3, 3))
    post_trans = jnp.zeros((B, N, 3), jnp.float32)
    post_rots = jnp.broadcast_to(jnp.eye(3, dtype=jnp.float32), (B, N, 3, 3))
    lidar_data = jnp.zeros((B, 1000, 5), jnp.float32)
    lidar_mask = jnp.zeros((B, 1000), jnp.float32)
    car_trans = jax.random.normal(ks[3], (B, 3), jnp.float32)
    yaw_pitch_roll = 0.1 * jax.random.normal(ks[4], (B, 3), jnp.float32)

    fwd = jax.jit(lambda p, *args: hdmapnet_forward(p, meta, *args))
    out = fwd(params, img, trans, rots, intrins, post_trans, post_rots,
              lidar_data, lidar_mask, car_trans, yaw_pitch_roll)
    semantic, embedding, direction = jax.block_until_ready(out)

    assert semantic.shape == (B, data_conf['num_channels'], 20, 40)
    assert embedding.shape == (B, 16, 20, 40)
    assert direction.shape == (B, 37, 20, 40)
    print("KERNEL_OK")
</pallas_src>

<mosaic_0001>
module attributes {stable_mosaic.version = 11 : i64} {
  func.func @_view_fusion_kernel(%arg0: memref<6x128x8xbf16, #tpu.memory_space<vmem>>, %arg1: memref<6x8x32xbf16, #tpu.memory_space<vmem>>, %arg2: memref<6x1x32xf32, #tpu.memory_space<vmem>>, %arg3: memref<6x32x32xbf16, #tpu.memory_space<vmem>>, %arg4: memref<6x1x32xf32, #tpu.memory_space<vmem>>, %arg5: memref<6x128x32xf32, #tpu.memory_space<vmem>>) attributes {dimension_semantics = [], scalar_prefetch = 0 : i64, scratch_operands = 0 : i64, tpu.core_type = #tpu.core_type<tc>} {
    %c0 = arith.constant 0 : index
    %c0_0 = arith.constant 0 : index
    %c0_1 = arith.constant 0 : index
    %0 = vector.load %arg0[%c0, %c0_0, %c0_1] : memref<6x128x8xbf16, #tpu.memory_space<vmem>>, vector<1x128x8xbf16>
    %1 = vector.shape_cast %0 : vector<1x128x8xbf16> to vector<128x8xbf16>
    %c0_2 = arith.constant 0 : index
    %c0_3 = arith.constant 0 : index
    %c0_4 = arith.constant 0 : index
    %2 = vector.load %arg1[%c0_2, %c0_3, %c0_4] : memref<6x8x32xbf16, #tpu.memory_space<vmem>>, vector<1x8x32xbf16>
    %3 = vector.shape_cast %2 : vector<1x8x32xbf16> to vector<8x32xbf16>
    %cst = arith.constant dense<0.000000e+00> : vector<128x32xf32>
    %4 = tpu.matmul %1, %3, %cst {dimension_numbers = #tpu.dot_dimension_numbers<[1], [0], [0], [1], [0, 0, 1, 1], [], []>} : vector<128x8xbf16>, vector<8x32xbf16>, vector<128x32xf32> -> vector<128x32xf32>
    %c0_5 = arith.constant 0 : index
    %c0_6 = arith.constant 0 : index
    %c0_7 = arith.constant 0 : index
    %5 = vector.load %arg2[%c0_5, %c0_6, %c0_7] : memref<6x1x32xf32, #tpu.memory_space<vmem>>, vector<1x1x32xf32>
    %6 = vector.shape_cast %5 : vector<1x1x32xf32> to vector<1x32xf32>
    %7 = vector.broadcast %6 : vector<1x32xf32> to vector<128x32xf32>
    %8 = arith.addf %4, %7 : vector<128x32xf32>
    %cst_8 = arith.constant 0.000000e+00 : f32
    %9 = vector.broadcast %cst_8 : f32 to vector<128x32xf32>
    %10 = arith.maximumf %8, %9 : vector<128x32xf32>
    %11 = arith.truncf %10 : vector<128x32xf32> to vector<128x32xbf16>
    %c0_9 = arith.constant 0 : index
    %c0_10 = arith.constant 0 : index
    %c0_11 = arith.constant 0 : index
    %12 = vector.load %arg3[%c0_9, %c0_10, %c0_11] : memref<6x32x32xbf16, #tpu.memory_space<vmem>>, vector<1x32x32xbf16>
    %13 = vector.shape_cast %12 : vector<1x32x32xbf16> to vector<32x32xbf16>
    %cst_12 = arith.constant dense<0.000000e+00> : vector<128x32xf32>
    %14 = tpu.matmul %11, %13, %cst_12 {dimension_numbers = #tpu.dot_dimension_numbers<[1], [0], [0], [1], [0, 0, 1, 1], [], []>} : vector<128x32xbf16>, vector<32x32xbf16>, vector<128x32xf32> -> vector<128x32xf32>
    %c0_13 = arith.constant 0 : index
    %c0_14 = arith.constant 0 : index
    %c0_15 = arith.constant 0 : index
    %15 = vector.load %arg4[%c0_13, %c0_14, %c0_15] : memref<6x1x32xf32, #tpu.memory_space<vmem>>, vector<1x1x32xf32>
    %16 = vector.shape_cast %15 : vector<1x1x32xf32> to vector<1x32xf32>
    %17 = vector.broadcast %16 : vector<1x32xf32> to vector<128x32xf32>
    %18 = arith.addf %14, %17 : vector<128x32xf32>
    %cst_16 = arith.constant 0.000000e+00 : f32
    %19 = vector.broadcast %cst_16 : f32 to vector<128x32xf32>
    %20 = arith.maximumf %18, %19 : vector<128x32xf32>
    %c0_17 = arith.constant 0 : index
    %c0_18 = arith.constant 0 : index
    %c0_19 = arith.constant 0 : index
    %21 = vector.load %arg5[%c0_17, %c0_18, %c0_19] : memref<6x128x32xf32, #tpu.memory_space<vmem>>, vector<1x128x32xf32>
    %22 = vector.shape_cast %21 : vector<1x128x32xf32> to vector<128x32xf32>
    %23 = vector.shape_cast %20 : vector<128x32xf32> to vector<1x128x32xf32>
    tpu.vector_store %arg5[%c0_17, %c0_18, %c0_19], %23 {strides = array<i32>} : memref<6x128x32xf32, #tpu.memory_space<vmem>>, vector<1x128x32xf32>,
    %c1 = arith.constant 1 : index
    %c0_20 = arith.constant 0 : index
    %c0_21 = arith.constant 0 : index
    %24 = vector.load %arg0[%c1, %c0_20, %c0_21] : memref<6x128x8xbf16, #tpu.memory_space<vmem>>, vector<1x128x8xbf16>
    %25 = vector.shape_cast %24 : vector<1x128x8xbf16> to vector<128x8xbf16>
    %c1_22 = arith.constant 1 : index
    %c0_23 = arith.constant 0 : index
    %c0_24 = arith.constant 0 : index
    %26 = vector.load %arg1[%c1_22, %c0_23, %c0_24] : memref<6x8x32xbf16, #tpu.memory_space<vmem>>, vector<1x8x32xbf16>
    %27 = vector.shape_cast %26 : vector<1x8x32xbf16> to vector<8x32xbf16>
    %cst_25 = arith.constant dense<0.000000e+00> : vector<128x32xf32>
    %28 = tpu.matmul %25, %27, %cst_25 {dimension_numbers = #tpu.dot_dimension_numbers<[1], [0], [0], [1], [0, 0, 1, 1], [], []>} : vector<128x8xbf16>, vector<8x32xbf16>, vector<128x32xf32> -> vector<128x32xf32>
    %c1_26 = arith.constant 1 : index
    %c0_27 = arith.constant 0 : index
    %c0_28 = arith.constant 0 : index
    %29 = vector.load %arg2[%c1_26, %c0_27, %c0_28] : memref<6x1x32xf32, #tpu.memory_space<vmem>>, vector<1x1x32xf32>
    %30 = vector.shape_cast %29 : vector<1x1x32xf32> to vector<1x32xf32>
    %31 = vector.broadcast %30 : vector<1x32xf32> to vector<128x32xf32>
    %32 = arith.addf %28, %31 : vector<128x32xf32>
    %cst_29 = arith.constant 0.000000e+00 : f32
    %33 = vector.broadcast %cst_29 : f32 to vector<128x32xf32>
    %34 = arith.maximumf %32, %33 : vector<128x32xf32>
    %35 = arith.truncf %34 : vector<128x32xf32> to vector<128x32xbf16>
    %c1_30 = arith.constant 1 : index
    %c0_31 = arith.constant 0 : index
    %c0_32 = arith.constant 0 : index
    %36 = vector.load %arg3[%c1_30, %c0_31, %c0_32] : memref<6x32x32xbf16, #tpu.memory_space<vmem>>, vector<1x32x32xbf16>
    %37 = vector.shape_cast %36 : vector<1x32x32xbf16> to vector<32x32xbf16>
    %cst_33 = arith.constant dense<0.000000e+00> : vector<128x32xf32>
    %38 = tpu.matmul %35, %37, %cst_33 {dimension_numbers = #tpu.dot_dimension_numbers<[1], [0], [0], [1], [0, 0, 1, 1], [], []>} : vector<128x32xbf16>, vector<32x32xbf16>, vector<128x32xf32> -> vector<128x32xf32>
    %c1_34 = arith.constant 1 : index
    %c0_35 = arith.constant 0 : index
    %c0_36 = arith.constant 0 : index
    %39 = vector.load %arg4[%c1_34, %c0_35, %c0_36] : memref<6x1x32xf32, #tpu.memory_space<vmem>>, vector<1x1x32xf32>
    %40 = vector.shape_cast %39 : vector<1x1x32xf32> to vector<1x32xf32>
    %41 = vector.broadcast %40 : vector<1x32xf32> to vector<128x32xf32>
    %42 = arith.addf %38, %41 : vector<128x32xf32>
    %cst_37 = arith.constant 0.000000e+00 : f32
    %43 = vector.broadcast %cst_37 : f32 to vector<128x32xf32>
    %44 = arith.maximumf %42, %43 : vector<128x32xf32>
    %c1_38 = arith.constant 1 : index
    %c0_39 = arith.constant 0 : index
    %c0_40 = arith.constant 0 : index
    %45 = vector.load %arg5[%c1_38, %c0_39, %c0_40] : memref<6x128x32xf32, #tpu.memory_space<vmem>>, vector<1x128x32xf32>
    %46 = vector.shape_cast %45 : vector<1x128x32xf32> to vector<128x32xf32>
    %47 = vector.shape_cast %44 : vector<128x32xf32> to vector<1x128x32xf32>
    tpu.vector_store %arg5[%c1_38, %c0_39, %c0_40], %47 {strides = array<i32>} : memref<6x128x32xf32, #tpu.memory_space<vmem>>, vector<1x128x32xf32>,
    %c2 = arith.constant 2 : index
    %c0_41 = arith.constant 0 : index
    %c0_42 = arith.constant 0 : index
    %48 = vector.load %arg0[%c2, %c0_41, %c0_42] : memref<6x128x8xbf16, #tpu.memory_space<vmem>>, vector<1x128x8xbf16>
    %49 = vector.shape_cast %48 : vector<1x128x8xbf16> to vector<128x8xbf16>
    %c2_43 = arith.constant 2 : index
    %c0_44 = arith.constant 0 : index
    %c0_45 = arith.constant 0 : index
    %50 = vector.load %arg1[%c2_43, %c0_44, %c0_45] : memref<6x8x32xbf16, #tpu.memory_space<vmem>>, vector<1x8x32xbf16>
    %51 = vector.shape_cast %50 : vector<1x8x32xbf16> to vector<8x32xbf16>
    %cst_46 = arith.constant dense<0.000000e+00> : vector<128x32xf32>
    %52 = tpu.matmul %49, %51, %cst_46 {dimension_numbers = #tpu.dot_dimension_numbers<[1], [0], [0], [1], [0, 0, 1, 1], [], []>} : vector<128x8xbf16>, vector<8x32xbf16>, vector<128x32xf32> -> vector<128x32xf32>
    %c2_47 = arith.constant 2 : index
    %c0_48 = arith.constant 0 : index
    %c0_49 = arith.constant 0 : index
    %53 = vector.load %arg2[%c2_47, %c0_48, %c0_49] : memref<6x1x32xf32, #tpu.memory_space<vmem>>, vector<1x1x32xf32>
    %54 = vector.shape_cast %53 : vector<1x1x32xf32> to vector<1x32xf32>
    %55 = vector.broadcast %54 : vector<1x32xf32> to vector<128x32xf32>
    %56 = arith.addf %52, %55 : vector<128x32xf32>
    %cst_50 = arith.constant 0.000000e+00 : f32
    %57 = vector.broadcast %cst_50 : f32 to vector<128x32xf32>
    %58 = arith.maximumf %56, %57 : vector<128x32xf32>
    %59 = arith.truncf %58 : vector<128x32xf32> to vector<128x32xbf16>
    %c2_51 = arith.constant 2 : index
    %c0_52 = arith.constant 0 : index
    %c0_53 = arith.constant 0 : index
    %60 = vector.load %arg3[%c2_51, %c0_52, %c0_53] : memref<6x32x32xbf16, #tpu.memory_space<vmem>>, vector<1x32x32xbf16>
    %61 = vector.shape_cast %60 : vector<1x32x32xbf16> to vector<32x32xbf16>
    %cst_54 = arith.constant dense<0.000000e+00> : vector<128x32xf32>
    %62 = tpu.matmul %59, %61, %cst_54 {dimension_numbers = #tpu.dot_dimension_numbers<[1], [0], [0], [1], [0, 0, 1, 1], [], []>} : vector<128x32xbf16>, vector<32x32xbf16>, vector<128x32xf32> -> vector<128x32xf32>
    %c2_55 = arith.constant 2 : index
    %c0_56 = arith.constant 0 : index
    %c0_57 = arith.constant 0 : index
    %63 = vector.load %arg4[%c2_55, %c0_56, %c0_57] : memref<6x1x32xf32, #tpu.memory_space<vmem>>, vector<1x1x32xf32>
    %64 = vector.shape_cast %63 : vector<1x1x32xf32> to vector<1x32xf32>
    %65 = vector.broadcast %64 : vector<1x32xf32> to vector<128x32xf32>
    %66 = arith.addf %62, %65 : vector<128x32xf32>
    %cst_58 = arith.constant 0.000000e+00 : f32
    %67 = vector.broadcast %cst_58 : f32 to vector<128x32xf32>
    %68 = arith.maximumf %66, %67 : vector<128x32xf32>
    %c2_59 = arith.constant 2 : index
    %c0_60 = arith.constant 0 : index
    %c0_61 = arith.constant 0 : index
    %69 = vector.load %arg5[%c2_59, %c0_60, %c0_61] : memref<6x128x32xf32, #tpu.memory_space<vmem>>, vector<1x128x32xf32>
    %70 = vector.shape_cast %69 : vector<1x128x32xf32> to vector<128x32xf32>
    %71 = vector.shape_cast %68 : vector<128x32xf32> to vector<1x128x32xf32>
    tpu.vector_store %arg5[%c2_59, %c0_60, %c0_61], %71 {strides = array<i32>} : memref<6x128x32xf32, #tpu.memory_space<vmem>>, vector<1x128x32xf32>,
    %c3 = arith.constant 3 : index
    %c0_62 = arith.constant 0 : index
    %c0_63 = arith.constant 0 : index
    %72 = vector.load %arg0[%c3, %c0_62, %c0_63] : memref<6x128x8xbf16, #tpu.memory_space<vmem>>, vector<1x128x8xbf16>
    %73 = vector.shape_cast %72 : vector<1x128x8xbf16> to vector<128x8xbf16>
    %c3_64 = arith.constant 3 : index
    %c0_65 = arith.constant 0 : index
    %c0_66 = arith.constant 0 : index
    %74 = vector.load %arg1[%c3_64, %c0_65, %c0_66] : memref<6x8x32xbf16, #tpu.memory_space<vmem>>, vector<1x8x32xbf16>
    %75 = vector.shape_cast %74 : vector<1x8x32xbf16> to vector<8x32xbf16>
    %cst_67 = arith.constant dense<0.000000e+00> : vector<128x32xf32>
    %76 = tpu.matmul %73, %75, %cst_67 {dimension_numbers = #tpu.dot_dimension_numbers<[1], [0], [0], [1], [0, 0, 1, 1], [], []>} : vector<128x8xbf16>, vector<8x32xbf16>, vector<128x32xf32> -> vector<128x32xf32>
    %c3_68 = arith.constant 3 : index
    %c0_69 = arith.constant 0 : index
    %c0_70 = arith.constant 0 : index
    %77 = vector.load %arg2[%c3_68, %c0_69, %c0_70] : memref<6x1x32xf32, #tpu.memory_space<vmem>>, vector<1x1x32xf32>
    %78 = vector.shape_cast %77 : vector<1x1x32xf32> to vector<1x32xf32>
    %79 = vector.broadcast %78 : vector<1x32xf32> to vector<128x32xf32>
    %80 = arith.addf %76, %79 : vector<128x32xf32>
    %cst_71 = arith.constant 0.000000e+00 : f32
    %81 = vector.broadcast %cst_71 : f32 to vector<128x32xf32>
    %82 = arith.maximumf %80, %81 : vector<128x32xf32>
    %83 = arith.truncf %82 : vector<128x32xf32> to vector<128x32xbf16>
    %c3_72 = arith.constant 3 : index
    %c0_73 = arith.constant 0 : index
    %c0_74 = arith.constant 0 : index
    %84 = vector.load %arg3[%c3_72, %c0_73, %c0_74] : memref<6x32x32xbf16, #tpu.memory_space<vmem>>, vector<1x32x32xbf16>
    %85 = vector.shape_cast %84 : vector<1x32x32xbf16> to vector<32x32xbf16>
    %cst_75 = arith.constant dense<0.000000e+00> : vector<128x32xf32>
    %86 = tpu.matmul %83, %85, %cst_75 {dimension_numbers = #tpu.dot_dimension_numbers<[1], [0], [0], [1], [0, 0, 1, 1], [], []>} : vector<128x32xbf16>, vector<32x32xbf16>, vector<128x32xf32> -> vector<128x32xf32>
    %c3_76 = arith.constant 3 : index
    %c0_77 = arith.constant 0 : index
    %c0_78 = arith.constant 0 : index
    %87 = vector.load %arg4[%c3_76, %c0_77, %c0_78] : memref<6x1x32xf32, #tpu.memory_space<vmem>>, vector<1x1x32xf32>
    %88 = vector.shape_cast %87 : vector<1x1x32xf32> to vector<1x32xf32>
    %89 = vector.broadcast %88 : vector<1x32xf32> to vector<128x32xf32>
    %90 = arith.addf %86, %89 : vector<128x32xf32>
    %cst_79 = arith.constant 0.000000e+00 : f32
    %91 = vector.broadcast %cst_79 : f32 to vector<128x32xf32>
    %92 = arith.maximumf %90, %91 : vector<128x32xf32>
    %c3_80 = arith.constant 3 : index
    %c0_81 = arith.constant 0 : index
    %c0_82 = arith.constant 0 : index
    %93 = vector.load %arg5[%c3_80, %c0_81, %c0_82] : memref<6x128x32xf32, #tpu.memory_space<vmem>>, vector<1x128x32xf32>
    %94 = vector.shape_cast %93 : vector<1x128x32xf32> to vector<128x32xf32>
    %95 = vector.shape_cast %92 : vector<128x32xf32> to vector<1x128x32xf32>
    tpu.vector_store %arg5[%c3_80, %c0_81, %c0_82], %95 {strides = array<i32>} : memref<6x128x32xf32, #tpu.memory_space<vmem>>, vector<1x128x32xf32>,
    %c4 = arith.constant 4 : index
    %c0_83 = arith.constant 0 : index
    %c0_84 = arith.constant 0 : index
    %96 = vector.load %arg0[%c4, %c0_83, %c0_84] : memref<6x128x8xbf16, #tpu.memory_space<vmem>>, vector<1x128x8xbf16>
    %97 = vector.shape_cast %96 : vector<1x128x8xbf16> to vector<128x8xbf16>
    %c4_85 = arith.constant 4 : index
    %c0_86 = arith.constant 0 : index
    %c0_87 = arith.constant 0 : index
    %98 = vector.load %arg1[%c4_85, %c0_86, %c0_87] : memref<6x8x32xbf16, #tpu.memory_space<vmem>>, vector<1x8x32xbf16>
    %99 = vector.shape_cast %98 : vector<1x8x32xbf16> to vector<8x32xbf16>
    %cst_88 = arith.constant dense<0.000000e+00> : vector<128x32xf32>
    %100 = tpu.matmul %97, %99, %cst_88 {dimension_numbers = #tpu.dot_dimension_numbers<[1], [0], [0], [1], [0, 0, 1, 1], [], []>} : vector<128x8xbf16>, vector<8x32xbf16>, vector<128x32xf32> -> vector<128x32xf32>
    %c4_89 = arith.constant 4 : index
    %c0_90 = arith.constant 0 : index
    %c0_91 = arith.constant 0 : index
    %101 = vector.load %arg2[%c4_89, %c0_90, %c0_91] : memref<6x1x32xf32, #tpu.memory_space<vmem>>, vector<1x1x32xf32>
    %102 = vector.shape_cast %101 : vector<1x1x32xf32> to vector<1x32xf32>
    %103 = vector.broadcast %102 : vector<1x32xf32> to vector<128x32xf32>
    %104 = arith.addf %100, %103 : vector<128x32xf32>
    %cst_92 = arith.constant 0.000000e+00 : f32
    %105 = vector.broadcast %cst_92 : f32 to vector<128x32xf32>
    %106 = arith.maximumf %104, %105 : vector<128x32xf32>
    %107 = arith.truncf %106 : vector<128x32xf32> to vector<128x32xbf16>
    %c4_93 = arith.constant 4 : index
    %c0_94 = arith.constant 0 : index
    %c0_95 = arith.constant 0 : index
    %108 = vector.load %arg3[%c4_93, %c0_94, %c0_95] : memref<6x32x32xbf16, #tpu.memory_space<vmem>>, vector<1x32x32xbf16>
    %109 = vector.shape_cast %108 : vector<1x32x32xbf16> to vector<32x32xbf16>
    %cst_96 = arith.constant dense<0.000000e+00> : vector<128x32xf32>
    %110 = tpu.matmul %107, %109, %cst_96 {dimension_numbers = #tpu.dot_dimension_numbers<[1], [0], [0], [1], [0, 0, 1, 1], [], []>} : vector<128x32xbf16>, vector<32x32xbf16>, vector<128x32xf32> -> vector<128x32xf32>
    %c4_97 = arith.constant 4 : index
    %c0_98 = arith.constant 0 : index
    %c0_99 = arith.constant 0 : index
    %111 = vector.load %arg4[%c4_97, %c0_98, %c0_99] : memref<6x1x32xf32, #tpu.memory_space<vmem>>, vector<1x1x32xf32>
    %112 = vector.shape_cast %111 : vector<1x1x32xf32> to vector<1x32xf32>
    %113 = vector.broadcast %112 : vector<1x32xf32> to vector<128x32xf32>
    %114 = arith.addf %110, %113 : vector<128x32xf32>
    %cst_100 = arith.constant 0.000000e+00 : f32
    %115 = vector.broadcast %cst_100 : f32 to vector<128x32xf32>
    %116 = arith.maximumf %114, %115 : vector<128x32xf32>
    %c4_101 = arith.constant 4 : index
    %c0_102 = arith.constant 0 : index
    %c0_103 = arith.constant 0 : index
    %117 = vector.load %arg5[%c4_101, %c0_102, %c0_103] : memref<6x128x32xf32, #tpu.memory_space<vmem>>, vector<1x128x32xf32>
    %118 = vector.shape_cast %117 : vector<1x128x32xf32> to vector<128x32xf32>
    %119 = vector.shape_cast %116 : vector<128x32xf32> to vector<1x128x32xf32>
    tpu.vector_store %arg5[%c4_101, %c0_102, %c0_103], %119 {strides = array<i32>} : memref<6x128x32xf32, #tpu.memory_space<vmem>>, vector<1x128x32xf32>,
    %c5 = arith.constant 5 : index
    %c0_104 = arith.constant 0 : index
    %c0_105 = arith.constant 0 : index
    %120 = vector.load %arg0[%c5, %c0_104, %c0_105] : memref<6x128x8xbf16, #tpu.memory_space<vmem>>, vector<1x128x8xbf16>
    %121 = vector.shape_cast %120 : vector<1x128x8xbf16> to vector<128x8xbf16>
    %c5_106 = arith.constant 5 : index
    %c0_107 = arith.constant 0 : index
    %c0_108 = arith.constant 0 : index
    %122 = vector.load %arg1[%c5_106, %c0_107, %c0_108] : memref<6x8x32xbf16, #tpu.memory_space<vmem>>, vector<1x8x32xbf16>
    %123 = vector.shape_cast %122 : vector<1x8x32xbf16> to vector<8x32xbf16>
    %cst_109 = arith.constant dense<0.000000e+00> : vector<128x32xf32>
    %124 = tpu.matmul %121, %123, %cst_109 {dimension_numbers = #tpu.dot_dimension_numbers<[1], [0], [0], [1], [0, 0, 1, 1], [], []>} : vector<128x8xbf16>, vector<8x32xbf16>, vector<128x32xf32> -> vector<128x32xf32>
    %c5_110 = arith.constant 5 : index
    %c0_111 = arith.constant 0 : index
    %c0_112 = arith.constant 0 : index
    %125 = vector.load %arg2[%c5_110, %c0_111, %c0_112] : memref<6x1x32xf32, #tpu.memory_space<vmem>>, vector<1x1x32xf32>
    %126 = vector.shape_cast %125 : vector<1x1x32xf32> to vector<1x32xf32>
    %127 = vector.broadcast %126 : vector<1x32xf32> to vector<128x32xf32>
    %128 = arith.addf %124, %127 : vector<128x32xf32>
    %cst_113 = arith.constant 0.000000e+00 : f32
    %129 = vector.broadcast %cst_113 : f32 to vector<128x32xf32>
    %130 = arith.maximumf %128, %129 : vector<128x32xf32>
    %131 = arith.truncf %130 : vector<128x32xf32> to vector<128x32xbf16>
    %c5_114 = arith.constant 5 : index
    %c0_115 = arith.constant 0 : index
    %c0_116 = arith.constant 0 : index
    %132 = vector.load %arg3[%c5_114, %c0_115, %c0_116] : memref<6x32x32xbf16, #tpu.memory_space<vmem>>, vector<1x32x32xbf16>
    %133 = vector.shape_cast %132 : vector<1x32x32xbf16> to vector<32x32xbf16>
    %cst_117 = arith.constant dense<0.000000e+00> : vector<128x32xf32>
    %134 = tpu.matmul %131, %133, %cst_117 {dimension_numbers = #tpu.dot_dimension_numbers<[1], [0], [0], [1], [0, 0, 1, 1], [], []>} : vector<128x32xbf16>, vector<32x32xbf16>, vector<128x32xf32> -> vector<128x32xf32>
    %c5_118 = arith.constant 5 : index
    %c0_119 = arith.constant 0 : index
    %c0_120 = arith.constant 0 : index
    %135 = vector.load %arg4[%c5_118, %c0_119, %c0_120] : memref<6x1x32xf32, #tpu.memory_space<vmem>>, vector<1x1x32xf32>
    %136 = vector.shape_cast %135 : vector<1x1x32xf32> to vector<1x32xf32>
    %137 = vector.broadcast %136 : vector<1x32xf32> to vector<128x32xf32>
    %138 = arith.addf %134, %137 : vector<128x32xf32>
    %cst_121 = arith.constant 0.000000e+00 : f32
    %139 = vector.broadcast %cst_121 : f32 to vector<128x32xf32>
    %140 = arith.maximumf %138, %139 : vector<128x32xf32>
    %c5_122 = arith.constant 5 : index
    %c0_123 = arith.constant 0 : index
    %c0_124 = arith.constant 0 : index
    %141 = vector.load %arg5[%c5_122, %c0_123, %c0_124] : memref<6x128x32xf32, #tpu.memory_space<vmem>>, vector<1x128x32xf32>
    %142 = vector.shape_cast %141 : vector<1x128x32xf32> to vector<128x32xf32>
    %143 = vector.shape_cast %140 : vector<128x32xf32> to vector<1x128x32xf32>
    tpu.vector_store %arg5[%c5_122, %c0_123, %c0_124], %143 {strides = array<i32>} : memref<6x128x32xf32, #tpu.memory_space<vmem>>, vector<1x128x32xf32>,
    return
  }
}

module attributes {stable_mosaic.version = 11 : i64} {
  func.func @_bev_resize_kernel(%arg0: i32, %arg1: memref<128x32xbf16, #tpu.memory_space<vmem>>, %arg2: memref<32x800xbf16, #tpu.memory_space<vmem>>, %arg3: memref<128x800xbf16, #tpu.memory_space<vmem>>) attributes {dimension_semantics = [#tpu.dimension_semantics<parallel>], iteration_bounds = array<i64: 1>, scalar_prefetch = 0 : i64, scratch_operands = 0 : i64, tpu.core_type = #tpu.core_type<tc>, window_params = [{transform_indices = @transform_0, window_bounds = array<i64: 128, 32>}, {pipeline_mode = #tpu.pipeline_mode<synchronous>, transform_indices = @transform_1, window_bounds = array<i64: 32, 800>}, {transform_indices = @transform_2, window_bounds = array<i64: 128, 800>}]} {
    %c0 = arith.constant 0 : index
    %c0_0 = arith.constant 0 : index
    %0 = vector.load %arg1[%c0, %c0_0] : memref<128x32xbf16, #tpu.memory_space<vmem>>, vector<128x32xbf16>
    %c0_1 = arith.constant 0 : index
    %c0_2 = arith.constant 0 : index
    %1 = vector.load %arg2[%c0_1, %c0_2] : memref<32x800xbf16, #tpu.memory_space<vmem>>, vector<32x800xbf16>
    %cst = arith.constant dense<0.000000e+00> : vector<128x800xf32>
    %2 = tpu.matmul %0, %1, %cst {dimension_numbers = #tpu.dot_dimension_numbers<[1], [0], [0], [1], [0, 0, 1, 1], [], []>} : vector<128x32xbf16>, vector<32x800xbf16>, vector<128x800xf32> -> vector<128x800xf32>
    %3 = arith.truncf %2 : vector<128x800xf32> to vector<128x800xbf16>
    %c0_3 = arith.constant 0 : index
    %c0_4 = arith.constant 0 : index
    %4 = vector.load %arg3[%c0_3, %c0_4] : memref<128x800xbf16, #tpu.memory_space<vmem>>, vector<128x800xbf16>
    tpu.vector_store %arg3[%c0_3, %c0_4], %3 {strides = array<i32>} : memref<128x800xbf16, #tpu.memory_space<vmem>>, vector<128x800xbf16>,
    return
  }
  func.func @transform_0(%arg0: i32) -> (i32, i32) {
    %c0_i32 = arith.constant 0 : i32
    %c0_i32_0 = arith.constant 0 : i32
    return %arg0, %c0_i32 : i32, i32
  }
  func.func @transform_1(%arg0: i32) -> (i32, i32) {
    %c0_i32 = arith.constant 0 : i32
    %c0_i32_0 = arith.constant 0 : i32
    %c0_i32_1 = arith.constant 0 : i32
    return %c0_i32, %c0_i32_0 : i32, i32
  }
  func.func @transform_2(%arg0: i32) -> (i32, i32) {
    %c0_i32 = arith.constant 0 : i32
    %c0_i32_0 = arith.constant 0 : i32
    return %arg0, %c0_i32 : i32, i32
  }
}

module attributes {stable_mosaic.version = 11 : i64} {
  func.func @_heads_kernel(%arg0: i32, %arg1: i32, %arg2: memref<1x64x800xbf16, #tpu.memory_space<vmem>>, %arg3: memref<64x64xbf16, #tpu.memory_space<vmem>>, %arg4: memref<64x1xf32, #tpu.memory_space<vmem>>, %arg5: memref<1x64x800xf32, #tpu.memory_space<vmem>>) attributes {dimension_semantics = [#tpu.dimension_semantics<parallel>, #tpu.dimension_semantics<parallel>], iteration_bounds = array<i64: 2, 1>, scalar_prefetch = 0 : i64, scratch_operands = 0 : i64, tpu.core_type = #tpu.core_type<tc>, window_params = [{transform_indices = @transform_0, window_bounds = array<i64: 1, 64, 800>}, {pipeline_mode = #tpu.pipeline_mode<synchronous>, transform_indices = @transform_1, window_bounds = array<i64: 64, 64>}, {pipeline_mode = #tpu.pipeline_mode<synchronous>, transform_indices = @transform_2, window_bounds = array<i64: 64, 1>}, {transform_indices = @transform_3, window_bounds = array<i64: 1, 64, 800>}]} {
    %c0 = arith.constant 0 : index
    %c0_0 = arith.constant 0 : index
    %0 = vector.load %arg3[%c0, %c0_0] : memref<64x64xbf16, #tpu.memory_space<vmem>>, vector<64x64xbf16>
    %c0_1 = arith.constant 0 : index
    %c0_2 = arith.constant 0 : index
    %c0_3 = arith.constant 0 : index
    %1 = vector.load %arg2[%c0_1, %c0_2, %c0_3] : memref<1x64x800xbf16, #tpu.memory_space<vmem>>, vector<1x64x800xbf16>
    %2 = vector.shape_cast %1 : vector<1x64x800xbf16> to vector<64x800xbf16>
    %cst = arith.constant dense<0.000000e+00> : vector<64x800xf32>
    %3 = tpu.matmul %0, %2, %cst {dimension_numbers = #tpu.dot_dimension_numbers<[1], [0], [0], [1], [0, 0, 1, 1], [], []>} : vector<64x64xbf16>, vector<64x800xbf16>, vector<64x800xf32> -> vector<64x800xf32>
    %c0_4 = arith.constant 0 : index
    %c0_5 = arith.constant 0 : index
    %4 = vector.load %arg4[%c0_4, %c0_5] : memref<64x1xf32, #tpu.memory_space<vmem>>, vector<64x1xf32>
    %5 = vector.broadcast %4 : vector<64x1xf32> to vector<64x800xf32>
    %6 = arith.addf %3, %5 : vector<64x800xf32>
    %c0_6 = arith.constant 0 : index
    %c0_7 = arith.constant 0 : index
    %c0_8 = arith.constant 0 : index
    %7 = vector.load %arg5[%c0_6, %c0_7, %c0_8] : memref<1x64x800xf32, #tpu.memory_space<vmem>>, vector<1x64x800xf32>
    %8 = vector.shape_cast %7 : vector<1x64x800xf32> to vector<64x800xf32>
    %9 = vector.shape_cast %6 : vector<64x800xf32> to vector<1x64x800xf32>
    tpu.vector_store %arg5[%c0_6, %c0_7, %c0_8], %9 {strides = array<i32>} : memref<1x64x800xf32, #tpu.memory_space<vmem>>, vector<1x64x800xf32>,
    return
  }
  func.func @transform_0(%arg0: i32, %arg1: i32) -> (i32, i32, i32) {
    %c0_i32 = arith.constant 0 : i32
    %c0_i32_0 = arith.constant 0 : i32
    return %arg0, %c0_i32, %arg1 : i32, i32, i32
  }
  func.func @transform_1(%arg0: i32, %arg1: i32) -> (i32, i32) {
    %c0_i32 = arith.constant 0 : i32
    %c0_i32_0 = arith.constant 0 : i32
    %c0_i32_1 = arith.constant 0 : i32
    return %c0_i32, %c0_i32_0 : i32, i32
  }
  func.func @transform_2(%arg0: i32, %arg1: i32) -> (i32, i32) {
    %c0_i32 = arith.constant 0 : i32
    %c0_i32_0 = arith.constant 0 : i32
    %c0_i32_1 = arith.constant 0 : i32
    return %c0_i32, %c0_i32_0 : i32, i32
  }
  func.func @transform_3(%arg0: i32, %arg1: i32) -> (i32, i32, i32) {
    %c0_i32 = arith.constant 0 : i32
    %c0_i32_0 = arith.constant 0 : i32
    return %arg0, %c0_i32, %arg1 : i32, i32, i32
  }
}

</mosaic_0001>

<bundles_post_ra>
// kernel: _lambda_.4
= control target key start
LH: loop header
LB: loop body
LE: loop exit
PB: predicated region body
PF: predicated region fallthrough
CT: control target
= control target key end

     0   :  { %vm156_vm0 = vcmask 261120   ;;  %vm591_vm1 = vcmask 257024   ;;  %s1300_s1 = inlined_call_operand.vmem [shape: bf16[32,800], index: 1, kind: input, shape index: {}]   ;;  %s1301_s0 = inlined_call_operand.vmem [shape: bf16[128,32], index: 0, kind: input, shape index: {}]   ;;  %s1302_s2 = inlined_call_operand.vmem [shape: bf16[128,800], index: 2, kind: output, shape index: {}]  }
   0x1   :  { %v719_v0 = vld [vmem:[%s1300_s1 + $0x38] sm:$0xf]  ;;  %v819_v1 = vld [vmem:[%s1300_s1 + $0x50] sm:$0xf0]  ;;  %v816_v2 = vld [vmem:[%s1300_s1 + $0x3c] sm:$0xf] }
   0x2   :  { %v720_v3 = vor.u32 %v819_v1, %v719_v0  ;;  %v721_v4 = vld [vmem:[%s1300_s1 + $0x54] sm:$0xf0]  ;;  %v727_v5 = vld [vmem:[%s1300_s1 + $0x40] sm:$0xf]  ;;  %v820_v6 = vld [vmem:[%s1300_s1 + $0x58] sm:$0xf0] }
   0x3   :  { %v724_v7 = vor.u32 %v816_v2, %v721_v4  ;;  %v728_v8 = vor.u32 %v820_v6, %v727_v5  ;;  %v691_v9 = vld [vmem:[%s1300_s1] sm:$0xf]  ;;  %v812_v10 = vld [vmem:[%s1300_s1 + $0x18] sm:$0xf0]  ;;  %v809_v11 = vld [vmem:[%s1300_s1 + $0x4] sm:$0xf] }
   0x4   :  { %187 = vmatpush.bf16.msra.mxu0 %v720_v3  ;;  %823 = vmatpush.bf16.msra.mxu3 %v720_v3  ;;  %v692_v12 = vor.u32 %v812_v10, %v691_v9  ;;  %v693_v13 = vld [vmem:[%s1300_s1 + $0x1c] sm:$0xf0]  ;;  %v699_v14 = vld [vmem:[%s1300_s1 + $0x8] sm:$0xf]  ;;  %v813_v15 = vld [vmem:[%s1300_s1 + $0x20] sm:$0xf0] }
   0x5   :  { %236 = vmatpush.bf16.msra.mxu1 %v724_v7  ;;  %285 = vmatpush.bf16.msra.mxu2 %v728_v8  ;;  %v696_v16 = vor.u32 %v809_v11, %v693_v13  ;;  %v700_v17 = vor.u32 %v813_v15, %v699_v14  ;;  %v883_v18 = vld [vmem:[%s1301_s0] sm:$0xff]  ;;  %v743_v19 = vld [vmem:[%s1300_s1 + $0x50] sm:$0xf]  ;;  %v822_v20 = vld [vmem:[%s1300_s1 + $0x68] sm:$0xf0] }
   0x6   :  { %v735_v21 = vld [vmem:[%s1300_s1 + $0x48] sm:$0xf]  ;;  %v821_v22 = vld [vmem:[%s1300_s1 + $0x60] sm:$0xf0]  ;;  %v900_v23 = vld [vmem:[%s1301_s0 + $0x30] sm:$0xff]  ;;  %v744_v24 = vor.u32 %v822_v20, %v743_v19 }
   0x7   :  { %v818_v25 = vld [vmem:[%s1300_s1 + $0x4c] sm:$0xf]  ;;  %v737_v26 = vld [vmem:[%s1300_s1 + $0x64] sm:$0xf0]  ;;  %v736_v27 = vor.u32 %v821_v22, %v735_v21  ;;  %v922_v30 = vld [vmem:[%s1301_s0 + $0x38] sm:$0xff] }
   0x8   :  { %188 = vmatpush.bf16.msra.mxu0 %v692_v12  ;;  %824 = vmatpush.bf16.msra.mxu3 %v692_v12  ;;  %v740_v28 = vor.u32 %v818_v25, %v737_v26  ;;  %v802_v29 = vld [vmem:[%s1301_s0 + $0x8] sm:$0xff]  ;;  %v715_v31 = vld [vmem:[%s1300_s1 + $0x18] sm:$0xf]  ;;  %v815_v32 = vld [vmem:[%s1300_s1 + $0x30] sm:$0xf0] }
   0x9   :  { %237 = vmatpush.bf16.msra.mxu1 %v696_v16  ;;  %286 = vmatpush.bf16.msra.mxu2 %v700_v17  ;;  %v707_v33 = vld [vmem:[%s1300_s1 + $0x10] sm:$0xf]  ;;  %v716_v34 = vor.u32 %v815_v32, %v715_v31  ;;  %v814_v35 = vld [vmem:[%s1300_s1 + $0x28] sm:$0xf0]  ;;  %v811_v36 = vld [vmem:[%s1300_s1 + $0x14] sm:$0xf] }
   0xa   :  { %v709_v37 = vld [vmem:[%s1300_s1 + $0x2c] sm:$0xf0]  ;;  %v708_v38 = vor.u32 %v814_v35, %v707_v33  ;;  %v817_v41 = vld [vmem:[%s1300_s1 + $0x44] sm:$0xf]  ;;  %v729_v42 = vld [vmem:[%s1300_s1 + $0x5c] sm:$0xf0] }
   0xb   :  { %745 = vmatmul.msk.bf16.vlgmr.msra.gmra.mxu0 %vm156_vm0, %v883_v18  ;;  %751 = vmatmul.msk.bf16.vlgmr.msra.gmra.mxu3 %vm156_vm0, %v900_v23  ;;  %v712_v39 = vor.u32 %v811_v36, %v709_v37  ;;  %v803_v40 = vld [vmem:[%s1301_s0 + $0x10] sm:$0xff]  ;;  %v732_v43 = vor.u32 %v817_v41, %v729_v42  ;;  %v804_v44 = vld [vmem:[%s1301_s0 + $0x18] sm:$0xff]  ;;  %v810_v45 = vld [vmem:[%s1300_s1 + $0xc] sm:$0xf] }
   0xc   :  { %825 = vmatpush.bf16.msrb.mxu3 %v724_v7  ;;  %753 = vmatmul.msk.bf16.vlgmr.msra.gmra.mxu1 %vm156_vm0, %v883_v18  ;;  %v701_v46 = vld [vmem:[%s1300_s1 + $0x24] sm:$0xf0]  ;;  %v805_v48 = vld [vmem:[%s1301_s0 + $0x20] sm:$0xff] }
   0xd   :  { %481 = vmatpush.bf16.msrb.mxu2 %v744_v24  ;;  %383 = vmatpush.bf16.msrb.mxu0 %v736_v27  ;;  %v704_v47 = vor.u32 %v810_v45, %v701_v46  ;;  %v986_v49 = vld [vmem:[%s1301_s0 + $0x28] sm:$0xff] }
   0xe   :  { %761 = vmatmul.msk.bf16.vlgmr.msra.gmra.mxu2 %vm156_vm0, %v883_v18  ;;  %432 = vmatpush.bf16.msrb.mxu1 %v740_v28 }
  0x10   :  { %826 = vmatpush.bf16.msrb.mxu3 %v696_v16 }
  0x11   :  { %482 = vmatpush.bf16.msrb.mxu2 %v716_v34  ;;  %384 = vmatpush.bf16.msrb.mxu0 %v708_v38 }
  0x12   :  { %433 = vmatpush.bf16.msrb.mxu1 %v712_v39 }
  0x14   :  { %827 = vmatpush.bf16.msra.mxu3 %v728_v8 }
  0x18   :  { %828 = vmatpush.bf16.msra.mxu3 %v700_v17 }
  0x1b   :  { %746 = vmatmul.msk.bf16.gmra.mxu0 %vm156_vm0, %v802_v29  ;;  %752 = vmatmul.msk.bf16.gmra.mxu3 %vm156_vm0, %v922_v30 }
  0x1c   :  { %754 = vmatmul.msk.bf16.gmra.mxu1 %vm156_vm0, %v802_v29 }
  0x1e   :  { %762 = vmatmul.msk.bf16.gmra.mxu2 %vm156_vm0, %v802_v29 }
  0x2b   :  { %747 = vmatmul.msk.bf16.gmra.mxu0 %vm156_vm0, %v803_v40  ;;  %759 = vmatmul.msk.bf16.vlgmr.msrb.gmra.mxu3 %vm156_vm0, %v900_v23 }
  0x2c   :  { %755 = vmatmul.msk.bf16.gmra.mxu1 %vm156_vm0, %v803_v40  ;;  %334 = vmatpush.bf16.msrb.mxu3 %v732_v43 }
  0x2e   :  { %763 = vmatmul.msk.bf16.gmra.mxu2 %vm156_vm0, %v803_v40 }
  0x30   :  { %335 = vmatpush.bf16.msrb.mxu3 %v704_v47 }
  0x3b   :  { %748 = vmatmul.msk.bf16.gmra.mxu0 %vm156_vm0, %v804_v44  ;;  %760 = vmatmul.msk.bf16.gmra.mxu3 %vm156_vm0, %v922_v30 }
  0x3c   :  { %756 = vmatmul.msk.bf16.gmra.mxu1 %vm156_vm0, %v804_v44 }
  0x3e   :  { %764 = vmatmul.msk.bf16.gmra.mxu2 %vm156_vm0, %v804_v44 }
  0x4b   :  { %749 = vmatmul.msk.bf16.gmra.mxu0 %vm156_vm0, %v805_v48  ;;  %767 = vmatmul.msk.bf16.vlgmr.msra.gmra.mxu3 %vm156_vm0, %v900_v23 }
  0x4c   :  { %757 = vmatmul.msk.bf16.gmra.mxu1 %vm156_vm0, %v805_v48 }
  0x4e   :  { %765 = vmatmul.msk.bf16.gmra.mxu2 %vm156_vm0, %v805_v48 }
  0x5b   :  { %750 = vmatmul.msk.bf16.gmra.mxu0 %vm156_vm0, %v986_v49  ;;  %768 = vmatmul.msk.bf16.gmra.mxu3 %vm156_vm0, %v922_v30 }
  0x5c   :  { %758 = vmatmul.msk.bf16.gmra.mxu1 %vm156_vm0, %v986_v49 }
  0x5e   :  { %766 = vmatmul.msk.bf16.gmra.mxu2 %vm156_vm0, %v986_v49 }
  0x6b   :  { %769 = vmatmul.msk.bf16.vlgmr.msrb.gmra.mxu3 %vm156_vm0, %v883_v18  ;;  %777 = vmatmul.msk.bf16.vlgmr.msrb.gmra.mxu0 %vm156_vm0, %v883_v18 }
  0x6c   :  { %785 = vmatmul.msk.bf16.vlgmr.msrb.gmra.mxu1 %vm156_vm0, %v883_v18 }
  0x6e   :  { %793 = vmatmul.msk.bf16.vlgmr.msrb.gmra.mxu2 %vm156_vm0, %v883_v18 }
  0x7b   :  { %770 = vmatmul.msk.bf16.gmra.mxu3 %vm156_vm0, %v802_v29  ;;  %778 = vmatmul.msk.bf16.gmra.mxu0 %vm156_vm0, %v802_v29 }
  0x7c   :  { %786 = vmatmul.msk.bf16.gmra.mxu1 %vm156_vm0, %v802_v29 }
  0x7e   :  { %794 = vmatmul.msk.bf16.gmra.mxu2 %vm156_vm0, %v802_v29 }
  0x88   :  { %v190_v50 = vpop.f32.mrf.mxu0 }
  0x89   :  { %v239_v51 = vpop.f32.mrf.mxu1 }
  0x8a   :  { %v524_v52 = vpack.c.bf16 %v239_v51, %v190_v50 }
  0x8b   :  { %771 = vmatmul.msk.bf16.gmra.mxu3 %vm156_vm0, %v803_v40  ;;  %779 = vmatmul.msk.bf16.gmra.mxu0 %vm156_vm0, %v803_v40 }
  0x8c   :  { %588 = vst [vmem:[%s1302_s2] sm:$0xff] %v524_v52  ;;  %787 = vmatmul.msk.bf16.gmra.mxu1 %vm156_vm0, %v803_v40 }
  0x8e   :  { %795 = vmatmul.msk.bf16.gmra.mxu2 %vm156_vm0, %v803_v40  ;;  %v220_v53 = vpop.f32.mrf.mxu3 }
  0x90   :  { %v192_v55 = vpop.f32.mrf.mxu0 }
  0x91   :  { %v1015_v54 = vpop.f32.mrf.mxu2  ;;  %v241_v56 = vpop.f32.mrf.mxu1 }
  0x92   :  { %v528_v57 = vpack.c.bf16 %v241_v56, %v192_v55 }
  0x94   :  { %593 = vst [vmem:[%s1302_s2 + $0x1c] sm:$0xff] %v528_v57 }
  0x96   :  { %v222_v58 = vpop.f32.mrf.mxu3 }
  0x98   :  { %v195_v60 = vpop.f32.mrf.mxu0 }
  0x99   :  { %v1020_v59 = vpop.f32.mrf.mxu2  ;;  %v244_v61 = vpop.f32.mrf.mxu1 }
  0x9a   :  { %v532_v62 = vpack.c.bf16 %v244_v61, %v195_v60 }
  0x9b   :  { %772 = vmatmul.msk.bf16.gmra.mxu3 %vm156_vm0, %v804_v44  ;;  %780 = vmatmul.msk.bf16.gmra.mxu0 %vm156_vm0, %v804_v44 }
  0x9c   :  { %597 = vst [vmem:[%s1302_s2 + $0x38] sm:$0xff] %v532_v62  ;;  %788 = vmatmul.msk.bf16.gmra.mxu1 %vm156_vm0, %v804_v44 }
  0x9e   :  { %796 = vmatmul.msk.bf16.gmra.mxu2 %vm156_vm0, %v804_v44  ;;  %v225_v63 = vpop.f32.mrf.mxu3 }
  0xa0   :  { %v197_v1 = vpop.f32.mrf.mxu0 }
  0xa1   :  { %v1029_v0 = vpop.f32.mrf.mxu2  ;;  %v246_v2 = vpop.f32.mrf.mxu1 }
  0xa2   :  { %v536_v3 = vpack.c.bf16 %v246_v2, %v197_v1 }
  0xa4   :  { %601 = vst [vmem:[%s1302_s2 + $0x54] sm:$0xff] %v536_v3 }
  0xa6   :  { %v227_v4 = vpop.f32.mrf.mxu3 }
  0xa8   :  { %v200_v6 = vpop.f32.mrf.mxu0 }
  0xa9   :  { %v1034_v5 = vpop.f32.mrf.mxu2  ;;  %v249_v7 = vpop.f32.mrf.mxu1 }
  0xaa   :  { %v540_v8 = vpack.c.bf16 %v249_v7, %v200_v6 }
  0xab   :  { %773 = vmatmul.msk.bf16.gmra.mxu3 %vm156_vm0, %v805_v48  ;;  %781 = vmatmul.msk.bf16.gmra.mxu0 %vm156_vm0, %v805_v48 }
  0xac   :  { %605 = vst [vmem:[%s1302_s2 + $0x70] sm:$0xff] %v540_v8  ;;  %789 = vmatmul.msk.bf16.gmra.mxu1 %vm156_vm0, %v805_v48 }
  0xae   :  { %797 = vmatmul.msk.bf16.gmra.mxu2 %vm156_vm0, %v805_v48  ;;  %v269_v9 = vpop.f32.mrf.mxu3 }
  0xaf   :  { %v572_v10 = vpack.c.bf16 %v269_v9, %v220_v53 }
  0xb0   :  { %v202_v12 = vpop.f32.mrf.mxu0 }
  0xb1   :  { %v1043_v11 = vpop.f32.mrf.mxu2  ;;  %637 = vst [vmem:[%s1302_s2 + $0x150] sm:$0xff] %v572_v10  ;;  %v251_v13 = vpop.f32.mrf.mxu1 }
  0xb2   :  { %v544_v14 = vpack.c.bf16 %v251_v13, %v202_v12 }
  0xb4   :  { %609 = vst [vmem:[%s1302_s2 + $0x8c] sm:$0xff] %v544_v14 }
  0xb6   :  { %v271_v15 = vpop.f32.mrf.mxu3 }
  0xb7   :  { %v576_v16 = vpack.c.bf16 %v271_v15, %v222_v58 }
  0xb8   :  { %v205_v18 = vpop.f32.mrf.mxu0 }
  0xb9   :  { %v1051_v17 = vpop.f32.mrf.mxu2  ;;  %641 = vst [vmem:[%s1302_s2 + $0x16c] sm:$0xff] %v576_v16  ;;  %v254_v19 = vpop.f32.mrf.mxu1 }
  0xba   :  { %v548_v20 = vpack.c.bf16 %v254_v19, %v205_v18 }
  0xbb   :  { %774 = vmatmul.msk.bf16.gmra.mxu3 %vm156_vm0, %v986_v49  ;;  %782 = vmatmul.msk.bf16.gmra.mxu0 %vm156_vm0, %v986_v49 }
  0xbc   :  { %613 = vst [vmem:[%s1302_s2 + $0xa8] sm:$0xff] %v548_v20  ;;  %790 = vmatmul.msk.bf16.gmra.mxu1 %vm156_vm0, %v986_v49 }
  0xbe   :  { %798 = vmatmul.msk.bf16.gmra.mxu2 %vm156_vm0, %v986_v49  ;;  %v274_v21 = vpop.f32.mrf.mxu3 }
  0xbf   :  { %v580_v22 = vpack.c.bf16 %v274_v21, %v225_v63 }
  0xc0   :  { %v207_v25 = vpop.f32.mrf.mxu0 }
  0xc1   :  { %v1067_v24 = vpop.f32.mrf.mxu2  ;;  %645 = vst [vmem:[%s1302_s2 + $0x188] sm:$0xff] %v580_v22  ;;  %v256_v26 = vpop.f32.mrf.mxu1 }
  0xc2   :  { %v552_v27 = vpack.c.bf16 %v256_v26, %v207_v25 }
  0xc4   :  { %617 = vst [vmem:[%s1302_s2 + $0xc4] sm:$0xff] %v552_v27 }
  0xc6   :  { %v276_v28 = vpop.f32.mrf.mxu3 }
  0xc7   :  { %v584_v29 = vpack.c.bf16 %v276_v28, %v227_v4 }
  0xc8   :  { %v210_v32 = vpop.f32.mrf.mxu0 }
  0xc9   :  { %v1075_v31 = vpop.f32.mrf.mxu2  ;;  %649 = vst [vmem:[%s1302_s2 + $0x1a4] sm:$0xff] %v584_v29  ;;  %v259_v33 = vpop.f32.mrf.mxu1 }
  0xca   :  { %v556_v34 = vpack.c.bf16 %v259_v33, %v210_v32 }
  0xcb   :  { %775 = vmatmul.msk.bf16.gmra.mxu3 %vm156_vm0, %v900_v23  ;;  %783 = vmatmul.msk.bf16.gmra.mxu0 %vm156_vm0, %v900_v23 }
  0xcc   :  { %621 = vst [vmem:[%s1302_s2 + $0xe0] sm:$0xff] %v556_v34  ;;  %791 = vmatmul.msk.bf16.gmra.mxu1 %vm156_vm0, %v900_v23 }
  0xce   :  { %799 = vmatmul.msk.bf16.gmra.mxu2 %vm156_vm0, %v900_v23  ;;  %v1091_v35 = vpop.f32.mrf.mxu3 }
  0xd0   :  { %v212_v37 = vpop.f32.mrf.mxu0 }
  0xd1   :  { %v1093_v36 = vpop.f32.mrf.mxu2  ;;  %v261_v38 = vpop.f32.mrf.mxu1 }
  0xd2   :  { %v560_v39 = vpack.c.bf16 %v261_v38, %v212_v37 }
  0xd4   :  { %625 = vst [vmem:[%s1302_s2 + $0xfc] sm:$0xff] %v560_v39 }
  0xd6   :  { %v1098_v40 = vpop.f32.mrf.mxu3 }
  0xd8   :  { %v215_v42 = vpop.f32.mrf.mxu0 }
  0xd9   :  { %v1100_v41 = vpop.f32.mrf.mxu2  ;;  %v264_v43 = vpop.f32.mrf.mxu1 }
  0xda   :  { %v564_v44 = vpack.c.bf16 %v264_v43, %v215_v42 }
  0xdb   :  { %776 = vmatmul.msk.bf16.gmra.mxu3 %vm156_vm0, %v922_v30  ;;  %784 = vmatmul.msk.bf16.gmra.mxu0 %vm156_vm0, %v922_v30 }
  0xdc   :  { %629 = vst [vmem:[%s1302_s2 + $0x118] sm:$0xff] %v564_v44  ;;  %792 = vmatmul.msk.bf16.gmra.mxu1 %vm156_vm0, %v922_v30 }
  0xde   :  { %800 = vmatmul.msk.bf16.gmra.mxu2 %vm156_vm0, %v922_v30  ;;  %v1113_v23 = vpop.f32.mrf.mxu3 }
  0xe0   :  { %v217_v46 = vpop.f32.mrf.mxu0 }
  0xe1   :  { %v1115_v45 = vpop.f32.mrf.mxu2  ;;  %v266_v47 = vpop.f32.mrf.mxu1 }
  0xe2   :  { %v568_v48 = vpack.c.bf16 %v266_v47, %v217_v46 }
  0xe4   :  { %633 = vst [vmem:[%s1302_s2 + $0x134] sm:$0xff] %v568_v48 }
  0xe6   :  { %v1120_v49 = vpop.f32.mrf.mxu3 }
  0xe8   :  { %v386_v51 = vpop.f32.mrf.mxu0 }
  0xe9   :  { %v1122_v50 = vpop.f32.mrf.mxu2  ;;  %v435_v52 = vpop.f32.mrf.mxu1 }
  0xea   :  { %v526_v53 = vpack.c.bf16 %v435_v52, %v386_v51 }
  0xec   :  { %590 = vst [vmem:[%s1302_s2 + $0x10] sm:$0xff] %v526_v53 }
  0xee   :  { %v337_v30 = vpop.f32.mrf.mxu3 }
  0xef   :  { %v525_v55 = vpack.c.bf16 %v337_v30, %v1015_v54 }
  0xf0   :  { %v388_v58 = vpop.f32.mrf.mxu0 }
  0xf1   :  { %v484_v56 = vpop.f32.mrf.mxu2  ;;  %589 = vst [vmem:[%s1302_s2 + $0x8] sm:$0xff] %v525_v55  ;;  %v437_v60 = vpop.f32.mrf.mxu1 }
  0xf2   :  { %v527_v57 = vpack.c.bf16 %v484_v56, %v484_v56  ;;  %v530_v61 = vpack.c.bf16 %v437_v60, %v388_v58 }
  0xf4   :  { %592 = vst.msk [vmem:[%s1302_s2 + $0x18] sm:$0xf] %vm591_vm1, %v527_v57 }
  0xf5   :  { %595 = vst [vmem:[%s1302_s2 + $0x2c] sm:$0xff] %v530_v61 }
  0xf6   :  { %v339_v54 = vpop.f32.mrf.mxu3 }
  0xf7   :  { %v529_v62 = vpack.c.bf16 %v339_v54, %v1020_v59 }
  0xf8   :  { %v391_v2 = vpop.f32.mrf.mxu0 }
  0xf9   :  { %v486_v63 = vpop.f32.mrf.mxu2  ;;  %594 = vst [vmem:[%s1302_s2 + $0x24] sm:$0xff] %v529_v62  ;;  %v440_v3 = vpop.f32.mrf.mxu1 }
  0xfa   :  { %v531_v1 = vpack.c.bf16 %v486_v63, %v486_v63  ;;  %v534_v4 = vpack.c.bf16 %v440_v3, %v391_v2 }
  0xfc   :  { %596 = vst.msk [vmem:[%s1302_s2 + $0x34] sm:$0xf] %vm591_vm1, %v531_v1 }
  0xfd   :  { %599 = vst [vmem:[%s1302_s2 + $0x48] sm:$0xff] %v534_v4 }
  0xfe   :  { %v342_v6 = vpop.f32.mrf.mxu3 }
  0xff   :  { %v533_v59 = vpack.c.bf16 %v342_v6, %v1029_v0 }
 0x100   :  { %v393_v9 = vpop.f32.mrf.mxu0 }
 0x101   :  { %v489_v7 = vpop.f32.mrf.mxu2  ;;  %598 = vst [vmem:[%s1302_s2 + $0x40] sm:$0xff] %v533_v59  ;;  %v442_v10 = vpop.f32.mrf.mxu1 }
 0x102   :  { %v535_v8 = vpack.c.bf16 %v489_v7, %v489_v7  ;;  %v538_v12 = vpack.c.bf16 %v442_v10, %v393_v9 }
 0x104   :  { %600 = vst.msk [vmem:[%s1302_s2 + $0x50] sm:$0xf] %vm591_vm1, %v535_v8 }
 0x105   :  { %603 = vst [vmem:[%s1302_s2 + $0x64] sm:$0xff] %v538_v12 }
 0x106   :  { %v344_v13 = vpop.f32.mrf.mxu3 }
 0x107   :  { %v537_v0 = vpack.c.bf16 %v344_v13, %v1034_v5 }
 0x108   :  { %v396_v16 = vpop.f32.mrf.mxu0 }
 0x109   :  { %v491_v14 = vpop.f32.mrf.mxu2  ;;  %602 = vst [vmem:[%s1302_s2 + $0x5c] sm:$0xff] %v537_v0  ;;  %v445_v18 = vpop.f32.mrf.mxu1 }
 0x10a   :  { %v539_v15 = vpack.c.bf16 %v491_v14, %v491_v14  ;;  %v542_v19 = vpack.c.bf16 %v445_v18, %v396_v16 }
 0x10c   :  { %604 = vst.msk [vmem:[%s1302_s2 + $0x6c] sm:$0xf] %vm591_vm1, %v539_v15 }
 0x10d   :  { %607 = vst [vmem:[%s1302_s2 + $0x80] sm:$0xff] %v542_v19 }
 0x10e   :  { %v347_v20 = vpop.f32.mrf.mxu3 }
 0x10f   :  { %v541_v5 = vpack.c.bf16 %v347_v20, %v1043_v11 }
 0x110   :  { %v398_v25 = vpop.f32.mrf.mxu0 }
 0x111   :  { %v494_v21 = vpop.f32.mrf.mxu2  ;;  %606 = vst [vmem:[%s1302_s2 + $0x78] sm:$0xff] %v541_v5  ;;  %v447_v26 = vpop.f32.mrf.mxu1 }
 0x112   :  { %v543_v22 = vpack.c.bf16 %v494_v21, %v494_v21  ;;  %v546_v27 = vpack.c.bf16 %v447_v26, %v398_v25 }
 0x114   :  { %608 = vst.msk [vmem:[%s1302_s2 + $0x88] sm:$0xf] %vm591_vm1, %v543_v22 }
 0x115   :  { %611 = vst [vmem:[%s1302_s2 + $0x9c] sm:$0xff] %v546_v27 }
 0x116   :  { %v349_v28 = vpop.f32.mrf.mxu3 }
 0x117   :  { %v545_v11 = vpack.c.bf16 %v349_v28, %v1051_v17 }
 0x118   :  { %v401_v33 = vpop.f32.mrf.mxu0 }
 0x119   :  { %v496_v29 = vpop.f32.mrf.mxu2  ;;  %610 = vst [vmem:[%s1302_s2 + $0x94] sm:$0xff] %v545_v11  ;;  %v450_v34 = vpop.f32.mrf.mxu1 }
 0x11a   :  { %v547_v32 = vpack.c.bf16 %v496_v29, %v496_v29  ;;  %v550_v37 = vpack.c.bf16 %v450_v34, %v401_v33 }
 0x11c   :  { %612 = vst.msk [vmem:[%s1302_s2 + $0xa4] sm:$0xf] %vm591_vm1, %v547_v32 }
 0x11d   :  { %615 = vst [vmem:[%s1302_s2 + $0xb8] sm:$0xff] %v550_v37 }
 0x11e   :  { %v352_v38 = vpop.f32.mrf.mxu3 }
 0x11f   :  { %v549_v17 = vpack.c.bf16 %v352_v38, %v1067_v24 }
 0x120   :  { %v403_v43 = vpop.f32.mrf.mxu0 }
 0x121   :  { %v499_v39 = vpop.f32.mrf.mxu2  ;;  %614 = vst [vmem:[%s1302_s2 + $0xb0] sm:$0xff] %v549_v17  ;;  %v452_v44 = vpop.f32.mrf.mxu1 }
 0x122   :  { %v551_v42 = vpack.c.bf16 %v499_v39, %v499_v39  ;;  %v554_v46 = vpack.c.bf16 %v452_v44, %v403_v43 }
 0x124   :  { %616 = vst.msk [vmem:[%s1302_s2 + $0xc0] sm:$0xf] %vm591_vm1, %v551_v42 }
 0x125   :  { %619 = vst [vmem:[%s1302_s2 + $0xd4] sm:$0xff] %v554_v46 }
 0x126   :  { %v354_v47 = vpop.f32.mrf.mxu3 }
 0x127   :  { %v553_v24 = vpack.c.bf16 %v354_v47, %v1075_v31 }
 0x128   :  { %v406_v52 = vpop.f32.mrf.mxu0 }
 0x129   :  { %v501_v48 = vpop.f32.mrf.mxu2  ;;  %618 = vst [vmem:[%s1302_s2 + $0xcc] sm:$0xff] %v553_v24  ;;  %v455_v53 = vpop.f32.mrf.mxu1 }
 0x12a   :  { %v555_v51 = vpack.c.bf16 %v501_v48, %v501_v48  ;;  %v558_v30 = vpack.c.bf16 %v455_v53, %v406_v52 }
 0x12c   :  { %620 = vst.msk [vmem:[%s1302_s2 + $0xdc] sm:$0xf] %vm591_vm1, %v555_v51 }
 0x12d   :  { %623 = vst [vmem:[%s1302_s2 + $0xf0] sm:$0xff] %v558_v30 }
 0x12e   :  { %v357_v55 = vpop.f32.mrf.mxu3 }
 0x12f   :  { %v557_v31 = vpack.c.bf16 %v357_v55, %v1093_v36 }
 0x130   :  { %v408_v58 = vpop.f32.mrf.mxu0 }
 0x131   :  { %v504_v56 = vpop.f32.mrf.mxu2  ;;  %622 = vst [vmem:[%s1302_s2 + $0xe8] sm:$0xff] %v557_v31  ;;  %v457_v60 = vpop.f32.mrf.mxu1 }
 0x132   :  { %v559_v57 = vpack.c.bf16 %v504_v56, %v504_v56  ;;  %v562_v61 = vpack.c.bf16 %v457_v60, %v408_v58 }
 0x134   :  { %624 = vst.msk [vmem:[%s1302_s2 + $0xf8] sm:$0xf] %vm591_vm1, %v559_v57 }
 0x135   :  { %627 = vst [vmem:[%s1302_s2 + $0x10c] sm:$0xff] %v562_v61 }
 0x136   :  { %v359_v54 = vpop.f32.mrf.mxu3 }
 0x137   :  { %v561_v36 = vpack.c.bf16 %v359_v54, %v1100_v41 }
 0x138   :  { %v411_v1 = vpop.f32.mrf.mxu0 }
 0x139   :  { %v506_v62 = vpop.f32.mrf.mxu2  ;;  %626 = vst [vmem:[%s1302_s2 + $0x104] sm:$0xff] %v561_v36  ;;  %v460_v2 = vpop.f32.mrf.mxu1 }
 0x13a   :  { %v563_v63 = vpack.c.bf16 %v506_v62, %v506_v62  ;;  %v566_v3 = vpack.c.bf16 %v460_v2, %v411_v1 }
 0x13c   :  { %628 = vst.msk [vmem:[%s1302_s2 + $0x114] sm:$0xf] %vm591_vm1, %v563_v63 }
 0x13d   :  { %631 = vst [vmem:[%s1302_s2 + $0x128] sm:$0xff] %v566_v3 }
 0x13e   :  { %v362_v4 = vpop.f32.mrf.mxu3 }
 0x13f   :  { %v565_v41 = vpack.c.bf16 %v362_v4, %v1115_v45 }
 0x140   :  { %v413_v7 = vpop.f32.mrf.mxu0 }
 0x141   :  { %v509_v6 = vpop.f32.mrf.mxu2  ;;  %630 = vst [vmem:[%s1302_s2 + $0x120] sm:$0xff] %v565_v41  ;;  %v462_v8 = vpop.f32.mrf.mxu1 }
 0x142   :  { %v567_v59 = vpack.c.bf16 %v509_v6, %v509_v6  ;;  %v570_v9 = vpack.c.bf16 %v462_v8, %v413_v7 }
 0x144   :  { %632 = vst.msk [vmem:[%s1302_s2 + $0x130] sm:$0xf] %vm591_vm1, %v567_v59 }
 0x145   :  { %635 = vst [vmem:[%s1302_s2 + $0x144] sm:$0xff] %v570_v9 }
 0x146   :  { %v364_v10 = vpop.f32.mrf.mxu3 }
 0x147   :  { %v569_v45 = vpack.c.bf16 %v364_v10, %v1122_v50 }
 0x148   :  { %v416_v0 = vpop.f32.mrf.mxu0 }
 0x149   :  { %v511_v12 = vpop.f32.mrf.mxu2  ;;  %634 = vst [vmem:[%s1302_s2 + $0x13c] sm:$0xff] %v569_v45  ;;  %v465_v14 = vpop.f32.mrf.mxu1 }
 0x14a   :  { %v571_v13 = vpack.c.bf16 %v511_v12, %v511_v12  ;;  %v574_v15 = vpack.c.bf16 %v465_v14, %v416_v0 }
 0x14c   :  { %636 = vst.msk [vmem:[%s1302_s2 + $0x14c] sm:$0xf] %vm591_vm1, %v571_v13 }
 0x14d   :  { %639 = vst [vmem:[%s1302_s2 + $0x160] sm:$0xff] %v574_v15 }
 0x14e   :  { %v367_v16 = vpop.f32.mrf.mxu3 }
 0x14f   :  { %v573_v50 = vpack.c.bf16 %v367_v16, %v1091_v35 }
 0x150   :  { %v418_v20 = vpop.f32.mrf.mxu0 }
 0x151   :  { %v514_v18 = vpop.f32.mrf.mxu2  ;;  %638 = vst [vmem:[%s1302_s2 + $0x158] sm:$0xff] %v573_v50  ;;  %v467_v5 = vpop.f32.mrf.mxu1 }
 0x152   :  { %v575_v19 = vpack.c.bf16 %v514_v18, %v514_v18  ;;  %v578_v21 = vpack.c.bf16 %v467_v5, %v418_v20 }
 0x154   :  { %640 = vst.msk [vmem:[%s1302_s2 + $0x168] sm:$0xf] %vm591_vm1, %v575_v19 }
 0x155   :  { %643 = vst [vmem:[%s1302_s2 + $0x17c] sm:$0xff] %v578_v21 }
 0x156   :  { %v369_v22 = vpop.f32.mrf.mxu3 }
 0x157   :  { %v577_v35 = vpack.c.bf16 %v369_v22, %v1098_v40 }
 0x158   :  { %v421_v27 = vpop.f32.mrf.mxu0 }
 0x159   :  { %v516_v25 = vpop.f32.mrf.mxu2  ;;  %642 = vst [vmem:[%s1302_s2 + $0x174] sm:$0xff] %v577_v35  ;;  %v470_v28 = vpop.f32.mrf.mxu1 }
 0x15a   :  { %v579_v26 = vpack.c.bf16 %v516_v25, %v516_v25  ;;  %v582_v11 = vpack.c.bf16 %v470_v28, %v421_v27 }
 0x15c   :  { %644 = vst.msk [vmem:[%s1302_s2 + $0x184] sm:$0xf] %vm591_vm1, %v579_v26 }
 0x15d   :  { %647 = vst [vmem:[%s1302_s2 + $0x198] sm:$0xff] %v582_v11 }
 0x15e   :  { %v372_v29 = vpop.f32.mrf.mxu3 }
 0x15f   :  { %v581_v40 = vpack.c.bf16 %v372_v29, %v1113_v23 }
 0x160   :  { %v423_v34 = vpop.f32.mrf.mxu0 }
 0x161   :  { %v519_v32 = vpop.f32.mrf.mxu2  ;;  %646 = vst [vmem:[%s1302_s2 + $0x190] sm:$0xff] %v581_v40  ;;  %v472_v37 = vpop.f32.mrf.mxu1 }
 0x162   :  { %v583_v33 = vpack.c.bf16 %v519_v32, %v519_v32  ;;  %v586_v38 = vpack.c.bf16 %v472_v37, %v423_v34 }
 0x164   :  { %648 = vst.msk [vmem:[%s1302_s2 + $0x1a0] sm:$0xf] %vm591_vm1, %v583_v33 }
 0x165   :  { %651 = vst [vmem:[%s1302_s2 + $0x1b4] sm:$0xff] %v586_v38 }
 0x166   :  { %v374_v17 = vpop.f32.mrf.mxu3 }
 0x167   :  { %v585_v23 = vpack.c.bf16 %v374_v17, %v1120_v49 }
 0x169   :  { %v521_v39 = vpop.f32.mrf.mxu2  ;;  %650 = vst [vmem:[%s1302_s2 + $0x1ac] sm:$0xff] %v585_v23 }
 0x16a   :  { %v587_v42 = vpack.c.bf16 %v521_v39, %v521_v39 }
 0x16c   :  { %652 = vst.msk [vmem:[%s1302_s2 + $0x1bc] sm:$0xf] %vm591_vm1, %v587_v42 }

// kernel: _lambda_.3
= control target key start
LH: loop header
LB: loop body
LE: loop exit
PB: predicated region body
PF: predicated region fallthrough
CT: control target
= control target key end

     0   :  { %vm107_vm0 = vcmask 1043456   ;;  %vm82_vm1 = vcmask 64512   ;;  %vm204_vm2 = vcmask 261120   ;;  %s3343_s1 = inlined_call_operand.vmem [shape: bf16[6,8,32], index: 1, kind: input, shape index: {}]   ;;  %s3344_s0 = inlined_call_operand.vmem [shape: bf16[6,128,8], index: 0, kind: input, shape index: {}]   ;;  %s3345_s2 = inlined_call_operand.vmem [shape: f32[6,1,32], index: 2, kind: input, shape index: {}]   ;;  %s3346_s3 = inlined_call_operand.vmem [shape: bf16[6,32,32], index: 3, kind: input, shape index: {}]   ;;  %s3347_s4 = inlined_call_operand.vmem [shape: f32[6,1,32], index: 4, kind: input, shape index: {}]   ;;  %s3348_s5 = inlined_call_operand.vmem [shape: f32[6,128,32], index: 5, kind: output, shape index: {}]  }
   0x1   :  { %v37_v0 = vld [vmem:[%s3343_s1] sm:$0xf]  ;;  %v2306_v3 = vld [vmem:[%s3344_s0 + $0x8] sm:$0xff]  ;;  %v2307_v4 = vld [vmem:[%s3344_s0 + $0x10] sm:$0xff] }
   0x2   :  { %v109_v1 = vsel %vm107_vm0, %v37_v0, 0  ;;  %v2305_v2 = vld [vmem:[%s3344_s0] sm:$0xff]  ;;  %v2308_v5 = vld [vmem:[%s3344_s0 + $0x18] sm:$0xff]  ;;  %v2310_v7 = vld [vmem:[%s3344_s0 + $0x28] sm:$0xff] }
   0x3   :  { %118 = vmatpush.bf16.msra.mxu0 %v109_v1  ;;  %v2309_v6 = vld [vmem:[%s3344_s0 + $0x20] sm:$0xff]  ;;  %v2311_v11 = vld [vmem:[%s3344_s0 + $0x30] sm:$0xff]  ;;  %v2314_v12 = vld [vmem:[%s3346_s3 + $0x8] sm:$0xff] }
   0x4   :  { %v1846_v8 = vld [vmem:[%s3343_s1 + $0x4] sm:$0xf]  ;;  %v2316_v13 = vld [vmem:[%s3344_s0 + $0x48] sm:$0xff]  ;;  %235 = vmatpush.bf16.msra.mxu1 %v2314_v12  ;;  %v2312_v15 = vld [vmem:[%s3344_s0 + $0x38] sm:$0xff] }
   0x5   :  { %v399_v9 = vsel %vm107_vm0, %v1846_v8, 0  ;;  %v2315_v10 = vld [vmem:[%s3344_s0 + $0x40] sm:$0xff]  ;;  %v1941_v16 = vld [vmem:[%s3343_s1 + $0x8] sm:$0xf]  ;;  %v2036_v17 = vld [vmem:[%s3343_s1 + $0xc] sm:$0xf] }
   0x6   :  { %1806 = vmatmul.msk.bf16.vlgmr.msra.gmra.mxu0 %vm82_vm1, %v2305_v2  ;;  %408 = vmatpush.bf16.msra.mxu2 %v399_v9  ;;  %v2313_v14 = vld [vmem:[%s3346_s3] sm:$0xff]  ;;  %v691_v18 = vsel %vm107_vm0, %v1941_v16, 0  ;;  %v983_v19 = vsel %vm107_vm0, %v2036_v17, 0  ;;  %v2317_v20 = vld [vmem:[%s3344_s0 + $0x50] sm:$0xff]  ;;  %v2318_v24 = vld [vmem:[%s3344_s0 + $0x58] sm:$0xff] }
   0x7   :  { %700 = vmatpush.bf16.msrb.mxu0 %v691_v18  ;;  %v2476_v22 = vld [vmem:[%s3345_s2] ss:$0 sm:$0xff]  ;;  %v2320_v40 = vld [vmem:[%s3344_s0 + $0x68] sm:$0xff]  ;;  %v2321_v48 = vld [vmem:[%s3344_s0 + $0x70] sm:$0xff] }
   0x8   :  { %236 = vmatpush.bf16.msra.mxu1 %v2313_v14  ;;  %v2319_v32 = vld [vmem:[%s3344_s0 + $0x60] sm:$0xff]  ;;  %v2322_v56 = vld [vmem:[%s3344_s0 + $0x78] sm:$0xff] }
   0x9   :  { %1880 = vmatmul.msk.bf16.vlgmr.msra.gmra.mxu2 %vm82_vm1, %v2315_v10  ;;  %v2324_v8 = vld [vmem:[%s3346_s3 + $0x18] sm:$0xff] }
   0xa   :  { %526 = vmatpush.bf16.msra.mxu3 %v2324_v8 }
   0xc   :  { %992 = vmatpush.bf16.msrb.mxu1 %v983_v19 }
  0x16   :  { %1807 = vmatmul.msk.bf16.gmra.mxu0 %vm82_vm1, %v2306_v3 }
  0x19   :  { %1881 = vmatmul.msk.bf16.gmra.mxu2 %vm82_vm1, %v2316_v13 }
  0x26   :  { %1808 = vmatmul.msk.bf16.gmra.mxu0 %vm82_vm1, %v2307_v4 }
  0x29   :  { %1882 = vmatmul.msk.bf16.gmra.mxu2 %vm82_vm1, %v2317_v20 }
  0x36   :  { %1809 = vmatmul.msk.bf16.gmra.mxu0 %vm82_vm1, %v2308_v5  ;;  %v2518_v5 = vld [vmem:[%s3345_s2 + $0x1] ss:$0 sm:$0xff] }
  0x39   :  { %1883 = vmatmul.msk.bf16.gmra.mxu2 %vm82_vm1, %v2318_v24 }
  0x46   :  { %1810 = vmatmul.msk.bf16.gmra.mxu0 %vm82_vm1, %v2309_v6 }
  0x49   :  { %1884 = vmatmul.msk.bf16.gmra.mxu2 %vm82_vm1, %v2319_v32 }
  0x56   :  { %1811 = vmatmul.msk.bf16.gmra.mxu0 %vm82_vm1, %v2310_v7  ;;  %v2325_v7 = vld [vmem:[%s3344_s0 + $0x80] sm:$0xff] }
  0x59   :  { %1885 = vmatmul.msk.bf16.gmra.mxu2 %vm82_vm1, %v2320_v40  ;;  %v2334_v40 = vld [vmem:[%s3346_s3 + $0x28] sm:$0xff] }
  0x5a   :  { %818 = vmatpush.bf16.msrb.mxu2 %v2334_v40 }
  0x66   :  { %1812 = vmatmul.msk.bf16.gmra.mxu0 %vm82_vm1, %v2311_v11  ;;  %v2323_v11 = vld [vmem:[%s3346_s3 + $0x10] sm:$0xff] }
  0x67   :  { %527 = vmatpush.bf16.msra.mxu3 %v2323_v11 }
  0x69   :  { %1886 = vmatmul.msk.bf16.gmra.mxu2 %vm82_vm1, %v2321_v48 }
  0x76   :  { %1813 = vmatmul.msk.bf16.gmra.mxu0 %vm82_vm1, %v2312_v15 }
  0x79   :  { %1887 = vmatmul.msk.bf16.gmra.mxu2 %vm82_vm1, %v2322_v56 }
  0x83   :  { %v120_v21 = vpop.f32.mrf.mxu0 }
  0x84   :  { %v121_v23 = vadd.f32 %v2476_v22, %v120_v21 }
  0x86   :  { %v160_v27 = vmax.f32 %v121_v23, 0.0  ;;  %1975 = vmatmul.msk.bf16.vlgmr.msrb.gmra.mxu0 %vm82_vm1, %v2325_v7 }
  0x8b   :  { %v122_v25 = vpop.f32.mrf.mxu0 }
  0x8c   :  { %v123_v26 = vadd.f32 %v2476_v22, %v122_v25  ;;  %v410_v4 = vpop.f32.mrf.mxu2  ;;  %v2326_v25 = vld [vmem:[%s3344_s0 + $0x88] sm:$0xff] }
  0x8d   :  { %v411_v10 = vadd.f32 %v2518_v5, %v410_v4  ;;  %v2336_v4 = vld [vmem:[%s3344_s0 + $0xc8] sm:$0xff] }
  0x8e   :  { %v161_v28 = vmax.f32 %v123_v26, 0.0 }
  0x8f   :  { %v450_v13 = vmax.f32 %v411_v10, 0.0 }
  0x90   :  { %v176_v29 = vpack.c.bf16 %v161_v28, %v160_v27  ;;  %v2131_v28 = vld [vmem:[%s3343_s1 + $0x10] sm:$0xf] }
  0x92   :  { %1822 = vmatmul.msk.bf16.vlgmr.msra.gmra.mxu1 %vm204_vm2, %v176_v29  ;;  %v2226_v29 = vld [vmem:[%s3343_s1 + $0x14] sm:$0xf] }
  0x93   :  { %v125_v30 = vpop.f32.mrf.mxu0 }
  0x94   :  { %v126_v31 = vadd.f32 %v2476_v22, %v125_v30  ;;  %v412_v12 = vpop.f32.mrf.mxu2  ;;  %v1275_v30 = vsel %vm107_vm0, %v2131_v28, 0 }
  0x95   :  { %v413_v14 = vadd.f32 %v2518_v5, %v412_v12  ;;  %1284 = vmatpush.bf16.msra.mxu0 %v1275_v30 }
  0x96   :  { %v162_v35 = vmax.f32 %v126_v31, 0.0  ;;  %1976 = vmatmul.msk.bf16.gmra.mxu0 %vm82_vm1, %v2326_v25  ;;  %v1567_v31 = vsel %vm107_vm0, %v2226_v29, 0  ;;  %v2330_v25 = vld [vmem:[%s3344_s0 + $0xa8] sm:$0xff] }
  0x97   :  { %v451_v15 = vmax.f32 %v413_v14, 0.0  ;;  %1576 = vmatpush.bf16.msra.mxu1 %v1567_v31 }
  0x99   :  { %v466_v18 = vpack.c.bf16 %v451_v15, %v450_v13 }
  0x9b   :  { %v127_v33 = vpop.f32.mrf.mxu0  ;;  %1901 = vmatmul.msk.bf16.vlgmr.msra.gmra.mxu3 %vm204_vm2, %v466_v18 }
  0x9c   :  { %v128_v34 = vadd.f32 %v2476_v22, %v127_v33  ;;  %v415_v23 = vpop.f32.mrf.mxu2 }
  0x9d   :  { %v416_v27 = vadd.f32 %v2518_v5, %v415_v23 }
  0x9e   :  { %v163_v36 = vmax.f32 %v128_v34, 0.0 }
  0x9f   :  { %v452_v33 = vmax.f32 %v416_v27, 0.0 }
  0xa0   :  { %v177_v37 = vpack.c.bf16 %v163_v36, %v162_v35 }
  0xa2   :  { %1823 = vmatmul.msk.bf16.gmra.mxu1 %vm204_vm2, %v177_v37 }
  0xa3   :  { %v130_v38 = vpop.f32.mrf.mxu0 }
  0xa4   :  { %v131_v39 = vadd.f32 %v2476_v22, %v130_v38  ;;  %v417_v32 = vpop.f32.mrf.mxu2 }
  0xa5   :  { %v418_v34 = vadd.f32 %v2518_v5, %v417_v32 }
  0xa6   :  { %v164_v43 = vmax.f32 %v131_v39, 0.0 }
  0xa7   :  { %v453_v36 = vmax.f32 %v418_v34, 0.0 }
  0xa9   :  { %v467_v39 = vpack.c.bf16 %v453_v36, %v452_v33  ;;  %v2333_v36 = vld [vmem:[%s3346_s3 + $0x20] sm:$0xff] }
  0xaa   :  { %819 = vmatpush.bf16.msrb.mxu2 %v2333_v36 }
  0xab   :  { %v132_v41 = vpop.f32.mrf.mxu0  ;;  %1902 = vmatmul.msk.bf16.gmra.mxu3 %vm204_vm2, %v467_v39 }
  0xac   :  { %v133_v42 = vadd.f32 %v2476_v22, %v132_v41  ;;  %v2344_v41 = vld [vmem:[%s3346_s3 + $0x38] sm:$0xff] }
  0xad   :  { %1110 = vmatpush.bf16.msrb.mxu3 %v2344_v41 }
  0xae   :  { %v165_v44 = vmax.f32 %v133_v42, 0.0 }
  0xb0   :  { %v178_v45 = vpack.c.bf16 %v165_v44, %v164_v43  ;;  %v420_v44 = vpop.f32.mrf.mxu2 }
  0xb2   :  { %1824 = vmatmul.msk.bf16.gmra.mxu1 %vm204_vm2, %v178_v45 }
  0xb3   :  { %v135_v46 = vpop.f32.mrf.mxu0 }
  0xb4   :  { %v136_v47 = vadd.f32 %v2476_v22, %v135_v46  ;;  %v421_v46 = vadd.f32 %v2518_v5, %v420_v44 }
  0xb6   :  { %v166_v51 = vmax.f32 %v136_v47, 0.0  ;;  %v454_v48 = vmax.f32 %v421_v46, 0.0 }
  0xb8   :  { %v422_v47 = vpop.f32.mrf.mxu2 }
  0xbb   :  { %v137_v49 = vpop.f32.mrf.mxu0 }
  0xbc   :  { %v138_v50 = vadd.f32 %v2476_v22, %v137_v49  ;;  %v423_v49 = vadd.f32 %v2518_v5, %v422_v47 }
  0xbe   :  { %v167_v52 = vmax.f32 %v138_v50, 0.0  ;;  %v455_v50 = vmax.f32 %v423_v49, 0.0 }
  0xc0   :  { %v179_v53 = vpack.c.bf16 %v167_v52, %v166_v51  ;;  %v2570_v51 = vld [vmem:[%s3347_s4] ss:$0 sm:$0xff]  ;;  %v468_v52 = vpack.c.bf16 %v455_v50, %v454_v48 }
  0xc2   :  { %1825 = vmatmul.msk.bf16.gmra.mxu1 %vm204_vm2, %v179_v53  ;;  %v2335_v53 = vld [vmem:[%s3344_s0 + $0xc0] sm:$0xff]  ;;  %1903 = vmatmul.msk.bf16.gmra.mxu3 %vm204_vm2, %v468_v52 }
  0xc3   :  { %v140_v54 = vpop.f32.mrf.mxu0 }
  0xc4   :  { %v141_v55 = vadd.f32 %v2476_v22, %v140_v54 }
  0xc6   :  { %v168_v59 = vmax.f32 %v141_v55, 0.0  ;;  %v425_v55 = vpop.f32.mrf.mxu2 }
  0xcb   :  { %v142_v57 = vpop.f32.mrf.mxu0 }
  0xcc   :  { %v143_v58 = vadd.f32 %v2476_v22, %v142_v57  ;;  %v2328_v57 = vld [vmem:[%s3344_s0 + $0x98] sm:$0xff] }
  0xce   :  { %v169_v60 = vmax.f32 %v143_v58, 0.0 }
  0xd0   :  { %v180_v61 = vpack.c.bf16 %v169_v60, %v168_v59  ;;  %v426_v59 = vadd.f32 %v2518_v5, %v425_v55 }
  0xd2   :  { %1826 = vmatmul.msk.bf16.gmra.mxu1 %vm204_vm2, %v180_v61  ;;  %v427_v61 = vpop.f32.mrf.mxu2 }
  0xd3   :  { %v145_v62 = vpop.f32.mrf.mxu0 }
  0xd4   :  { %v146_v63 = vadd.f32 %v2476_v22, %v145_v62 }
  0xd6   :  { %v170_v2 = vmax.f32 %v146_v63, 0.0  ;;  %v456_v63 = vmax.f32 %v426_v59, 0.0 }
  0xda   :  { %v430_v7 = vpop.f32.mrf.mxu2 }
  0xdb   :  { %v147_v0 = vpop.f32.mrf.mxu0  ;;  %v431_v11 = vadd.f32 %v2518_v5, %v430_v7 }
  0xdc   :  { %v148_v1 = vadd.f32 %v2476_v22, %v147_v0  ;;  %v428_v0 = vadd.f32 %v2518_v5, %v427_v61 }
  0xdd   :  { %v458_v15 = vmax.f32 %v431_v11, 0.0 }
  0xde   :  { %v171_v3 = vmax.f32 %v148_v1, 0.0 }
  0xe0   :  { %v181_v6 = vpack.c.bf16 %v171_v3, %v170_v2  ;;  %v457_v2 = vmax.f32 %v428_v0, 0.0 }
  0xe2   :  { %1827 = vmatmul.msk.bf16.gmra.mxu1 %vm204_vm2, %v181_v6  ;;  %v469_v3 = vpack.c.bf16 %v457_v2, %v456_v63  ;;  %v432_v13 = vpop.f32.mrf.mxu2 }
  0xe3   :  { %v150_v9 = vpop.f32.mrf.mxu0 }
  0xe4   :  { %v151_v16 = vadd.f32 %v2476_v22, %v150_v9  ;;  %1904 = vmatmul.msk.bf16.gmra.mxu3 %vm204_vm2, %v469_v3  ;;  %v2329_v9 = vld [vmem:[%s3344_s0 + $0xa0] sm:$0xff] }
  0xe6   :  { %v172_v20 = vmax.f32 %v151_v16, 0.0  ;;  %v433_v16 = vadd.f32 %v2518_v5, %v432_v13 }
  0xe8   :  { %v459_v18 = vmax.f32 %v433_v16, 0.0 }
  0xea   :  { %v435_v23 = vpop.f32.mrf.mxu2 }
  0xeb   :  { %v152_v17 = vpop.f32.mrf.mxu0  ;;  %v436_v27 = vadd.f32 %v2518_v5, %v435_v23 }
  0xec   :  { %v153_v19 = vadd.f32 %v2476_v22, %v152_v17 }
  0xed   :  { %v460_v31 = vmax.f32 %v436_v27, 0.0 }
  0xee   :  { %v173_v21 = vmax.f32 %v153_v19, 0.0  ;;  %v470_v19 = vpack.c.bf16 %v459_v18, %v458_v15 }
  0xf0   :  { %v182_v24 = vpack.c.bf16 %v173_v21, %v172_v20  ;;  %v2337_v20 = vld [vmem:[%s3344_s0 + $0xd0] sm:$0xff] }
  0xf2   :  { %1828 = vmatmul.msk.bf16.gmra.mxu1 %vm204_vm2, %v182_v24  ;;  %v437_v29 = vpop.f32.mrf.mxu2 }
  0xf3   :  { %v155_v26 = vpop.f32.mrf.mxu0  ;;  %v438_v32 = vadd.f32 %v2518_v5, %v437_v29 }
  0xf4   :  { %v156_v35 = vadd.f32 %v2476_v22, %v155_v26  ;;  %1905 = vmatmul.msk.bf16.gmra.mxu3 %vm204_vm2, %v470_v19 }
  0xf5   :  { %v461_v34 = vmax.f32 %v438_v32, 0.0 }
  0xf6   :  { %v174_v42 = vmax.f32 %v156_v35, 0.0 }
  0xf7   :  { %v471_v35 = vpack.c.bf16 %v461_v34, %v460_v31 }
  0xfa   :  { %v440_v40 = vpop.f32.mrf.mxu2 }
  0xfb   :  { %v157_v37 = vpop.f32.mrf.mxu0  ;;  %v441_v44 = vadd.f32 %v2518_v5, %v440_v40 }
  0xfc   :  { %v158_v38 = vadd.f32 %v2476_v22, %v157_v37  ;;  %v2327_v22 = vld [vmem:[%s3344_s0 + $0x90] sm:$0xff] }
  0xfd   :  { %1977 = vmatmul.msk.bf16.gmra.mxu0 %vm82_vm1, %v2327_v22  ;;  %v2343_v37 = vld [vmem:[%s3346_s3 + $0x30] sm:$0xff]  ;;  %v462_v47 = vmax.f32 %v441_v44, 0.0  ;;  %v2354_v44 = vld [vmem:[%s3346_s3 + $0x48] sm:$0xff] }
  0xfe   :  { %v175_v43 = vmax.f32 %v158_v38, 0.0  ;;  %v2338_v38 = vld [vmem:[%s3344_s0 + $0xd8] sm:$0xff]  ;;  %1111 = vmatpush.bf16.msrb.mxu3 %v2343_v37  ;;  %1402 = vmatpush.bf16.msra.mxu2 %v2354_v44 }
 0x100   :  { %v183_v45 = vpack.c.bf16 %v175_v43, %v174_v42  ;;  %v2331_v42 = vld [vmem:[%s3344_s0 + $0xb0] sm:$0xff] }
 0x102   :  { %1829 = vmatmul.msk.bf16.gmra.mxu1 %vm204_vm2, %v183_v45  ;;  %v442_v22 = vpop.f32.mrf.mxu2 }
 0x103   :  { %v443_v48 = vadd.f32 %v2518_v5, %v442_v22  ;;  %v702_v7 = vpop.f32.mrf.mxu0 }
 0x104   :  { %1906 = vmatmul.msk.bf16.gmra.mxu3 %vm204_vm2, %v471_v35 }
 0x105   :  { %v463_v50 = vmax.f32 %v443_v48, 0.0  ;;  %v2347_v48 = vld [vmem:[%s3344_s0 + $0x110] sm:$0xff] }
 0x107   :  { %v472_v52 = vpack.c.bf16 %v463_v50, %v462_v47 }
 0x10a   :  { %v445_v55 = vpop.f32.mrf.mxu2 }
 0x10b   :  { %v446_v59 = vadd.f32 %v2518_v5, %v445_v55  ;;  %v704_v13 = vpop.f32.mrf.mxu0 }
 0x10d   :  { %1978 = vmatmul.msk.bf16.gmra.mxu0 %vm82_vm1, %v2328_v57  ;;  %v2332_v57 = vld [vmem:[%s3344_s0 + $0xb8] sm:$0xff]  ;;  %v464_v63 = vmax.f32 %v446_v59, 0.0 }
 0x10f   :  { %v238_v54 = vpop.f32.mrf.mxu1 }
 0x110   :  { %v239_v56 = vadd.f32 %v2570_v51, %v238_v54 }
 0x112   :  { %v278_v58 = vmax.f32 %v239_v56, 0.0  ;;  %2070 = vmatmul.msk.bf16.vlgmr.msrb.gmra.mxu1 %vm82_vm1, %v2335_v53  ;;  %v2339_v53 = vld [vmem:[%s3344_s0 + $0xe0] sm:$0xff]  ;;  %v447_v61 = vpop.f32.mrf.mxu2 }
 0x113   :  { %v448_v0 = vadd.f32 %v2518_v5, %v447_v61  ;;  %v2345_v5 = vld [vmem:[%s3344_s0 + $0x100] sm:$0xff]  ;;  %v707_v23 = vpop.f32.mrf.mxu0 }
 0x114   :  { %294 = vst.msk [vmem:[%s3348_s5] sm:$0xff] %vm204_vm2, %v278_v58  ;;  %1907 = vmatmul.msk.bf16.gmra.mxu3 %vm204_vm2, %v472_v52 }
 0x115   :  { %v465_v2 = vmax.f32 %v448_v0, 0.0 }
 0x117   :  { %v240_v60 = vpop.f32.mrf.mxu1  ;;  %v473_v3 = vpack.c.bf16 %v465_v2, %v464_v63  ;;  %v2355_v2 = vld [vmem:[%s3344_s0 + $0x140] sm:$0xff] }
 0x118   :  { %v241_v62 = vadd.f32 %v2570_v51, %v240_v60 }
 0x11a   :  { %v279_v1 = vmax.f32 %v241_v62, 0.0 }
 0x11c   :  { %295 = vst.msk [vmem:[%s3348_s5 + $0x8] sm:$0xff] %vm204_vm2, %v279_v1 }
 0x11d   :  { %1979 = vmatmul.msk.bf16.gmra.mxu0 %vm82_vm1, %v2329_v9 }
 0x11f   :  { %v243_v6 = vpop.f32.mrf.mxu1 }
 0x120   :  { %v244_v8 = vadd.f32 %v2570_v51, %v243_v6 }
 0x122   :  { %v280_v10 = vmax.f32 %v244_v8, 0.0  ;;  %2071 = vmatmul.msk.bf16.gmra.mxu1 %vm82_vm1, %v2336_v4  ;;  %v2340_v4 = vld [vmem:[%s3344_s0 + $0xe8] sm:$0xff] }
 0x124   :  { %296 = vst.msk [vmem:[%s3348_s5 + $0x10] sm:$0xff] %vm204_vm2, %v280_v10  ;;  %1908 = vmatmul.msk.bf16.gmra.mxu3 %vm204_vm2, %v473_v3  ;;  %v2700_v10 = vld [vmem:[%s3345_s2 + $0x2] ss:$0 sm:$0xff] }
 0x125   :  { %v703_v11 = vadd.f32 %v2700_v10, %v702_v7  ;;  %v705_v16 = vadd.f32 %v2700_v10, %v704_v13  ;;  %v708_v29 = vadd.f32 %v2700_v10, %v707_v23  ;;  %v2792_v7 = vld [vmem:[%s3345_s2 + $0x3] ss:$0 sm:$0xff] }
 0x127   :  { %v245_v12 = vpop.f32.mrf.mxu1  ;;  %v742_v15 = vmax.f32 %v703_v11, 0.0  ;;  %v743_v18 = vmax.f32 %v705_v16, 0.0  ;;  %v744_v35 = vmax.f32 %v708_v29, 0.0 }
 0x128   :  { %v246_v14 = vadd.f32 %v2570_v51, %v245_v12 }
 0x129   :  { %v758_v19 = vpack.c.bf16 %v743_v18, %v742_v15 }
 0x12a   :  { %v281_v17 = vmax.f32 %v246_v14, 0.0 }
 0x12b   :  { %1996 = vmatmul.msk.bf16.vlgmr.msrb.gmra.mxu2 %vm204_vm2, %v758_v19 }
 0x12c   :  { %297 = vst.msk [vmem:[%s3348_s5 + $0x18] sm:$0xff] %vm204_vm2, %v281_v17 }
 0x12d   :  { %1980 = vmatmul.msk.bf16.gmra.mxu0 %vm82_vm1, %v2330_v25  ;;  %v2346_v25 = vld [vmem:[%s3344_s0 + $0x108] sm:$0xff] }
 0x12f   :  { %v248_v21 = vpop.f32.mrf.mxu1 }
 0x130   :  { %v249_v24 = vadd.f32 %v2570_v51, %v248_v21 }
 0x132   :  { %v282_v26 = vmax.f32 %v249_v24, 0.0  ;;  %2072 = vmatmul.msk.bf16.gmra.mxu1 %vm82_vm1, %v2337_v20  ;;  %v2341_v20 = vld [vmem:[%s3344_s0 + $0xf0] sm:$0xff] }
 0x134   :  { %298 = vst.msk [vmem:[%s3348_s5 + $0x20] sm:$0xff] %vm204_vm2, %v282_v26  ;;  %v529_v26 = vpop.f32.mrf.mxu3 }
 0x137   :  { %v250_v28 = vpop.f32.mrf.mxu1 }
 0x138   :  { %v251_v30 = vadd.f32 %v2570_v51, %v250_v28  ;;  %v2721_v28 = vld [vmem:[%s3347_s4 + $0x1] ss:$0 sm:$0xff] }
 0x13a   :  { %v283_v33 = vmax.f32 %v251_v30, 0.0  ;;  %v530_v30 = vadd.f32 %v2721_v28, %v529_v26  ;;  %v2356_v26 = vld [vmem:[%s3344_s0 + $0x148] sm:$0xff] }
 0x13c   :  { %299 = vst.msk [vmem:[%s3348_s5 + $0x28] sm:$0xff] %vm204_vm2, %v283_v33  ;;  %v569_v31 = vmax.f32 %v530_v30, 0.0  ;;  %v709_v33 = vpop.f32.mrf.mxu0  ;;  %v531_v37 = vpop.f32.mrf.mxu3  ;;  %v2349_v30 = vld [vmem:[%s3344_s0 + $0x120] sm:$0xff] }
 0x13d   :  { %1981 = vmatmul.msk.bf16.gmra.mxu0 %vm82_vm1, %v2331_v42  ;;  %v710_v36 = vadd.f32 %v2700_v10, %v709_v33  ;;  %v532_v40 = vadd.f32 %v2721_v28, %v531_v37 }
 0x13e   :  { %1909 = vst.msk [vmem:[%s3348_s5 + $0x80] sm:$0xff] %vm204_vm2, %v569_v31 }
 0x13f   :  { %v253_v39 = vpop.f32.mrf.mxu1 }
 0x140   :  { %v254_v41 = vadd.f32 %v2570_v51, %v253_v39  ;;  %v745_v39 = vmax.f32 %v710_v36, 0.0 }
 0x142   :  { %v284_v43 = vmax.f32 %v254_v41, 0.0  ;;  %2073 = vmatmul.msk.bf16.gmra.mxu1 %vm82_vm1, %v2338_v38  ;;  %v570_v41 = vmax.f32 %v532_v40, 0.0  ;;  %v759_v42 = vpack.c.bf16 %v745_v39, %v744_v35 }
 0x144   :  { %300 = vst.msk [vmem:[%s3348_s5 + $0x30] sm:$0xff] %vm204_vm2, %v284_v43  ;;  %v2342_v43 = vld [vmem:[%s3344_s0 + $0xf8] sm:$0xff]  ;;  %1997 = vmatmul.msk.bf16.gmra.mxu2 %vm204_vm2, %v759_v42 }
 0x145   :  { %1910 = vst.msk [vmem:[%s3348_s5 + $0x88] sm:$0xff] %vm204_vm2, %v570_v41 }
 0x147   :  { %v255_v45 = vpop.f32.mrf.mxu1 }
 0x148   :  { %v256_v46 = vadd.f32 %v2570_v51, %v255_v45  ;;  %v2364_v45 = vld [vmem:[%s3346_s3 + $0x58] sm:$0xff] }
 0x149   :  { %1694 = vmatpush.bf16.msra.mxu3 %v2364_v45 }
 0x14a   :  { %v285_v49 = vmax.f32 %v256_v46, 0.0 }
 0x14c   :  { %301 = vst.msk [vmem:[%s3348_s5 + $0x38] sm:$0xff] %vm204_vm2, %v285_v49  ;;  %v534_v49 = vpop.f32.mrf.mxu3 }
 0x14d   :  { %1982 = vmatmul.msk.bf16.gmra.mxu0 %vm82_vm1, %v2332_v57  ;;  %v535_v52 = vadd.f32 %v2721_v28, %v534_v49 }
 0x14f   :  { %v258_v54 = vpop.f32.mrf.mxu1 }
 0x150   :  { %v259_v56 = vadd.f32 %v2570_v51, %v258_v54  ;;  %v571_v54 = vmax.f32 %v535_v52, 0.0  ;;  %v2350_v52 = vld [vmem:[%s3344_s0 + $0x128] sm:$0xff] }
 0x152   :  { %v286_v58 = vmax.f32 %v259_v56, 0.0  ;;  %2074 = vmatmul.msk.bf16.gmra.mxu1 %vm82_vm1, %v2339_v53  ;;  %1911 = vst.msk [vmem:[%s3348_s5 + $0x90] sm:$0xff] %vm204_vm2, %v571_v54 }
 0x154   :  { %302 = vst.msk [vmem:[%s3348_s5 + $0x40] sm:$0xff] %vm204_vm2, %v286_v58 }
 0x157   :  { %v260_v60 = vpop.f32.mrf.mxu1 }
 0x158   :  { %v261_v62 = vadd.f32 %v2570_v51, %v260_v60  ;;  %v536_v60 = vpop.f32.mrf.mxu3 }
 0x159   :  { %v537_v63 = vadd.f32 %v2721_v28, %v536_v60 }
 0x15a   :  { %v287_v1 = vmax.f32 %v261_v62, 0.0 }
 0x15b   :  { %v572_v0 = vmax.f32 %v537_v63, 0.0 }
 0x15c   :  { %303 = vst.msk [vmem:[%s3348_s5 + $0x48] sm:$0xff] %vm204_vm2, %v287_v1 }
 0x15d   :  { %2165 = vmatmul.msk.bf16.vlgmr.msra.gmra.mxu0 %vm82_vm1, %v2345_v5  ;;  %1912 = vst.msk [vmem:[%s3348_s5 + $0x98] sm:$0xff] %vm204_vm2, %v572_v0 }
 0x15f   :  { %v263_v6 = vpop.f32.mrf.mxu1 }
 0x160   :  { %v264_v8 = vadd.f32 %v2570_v51, %v263_v6  ;;  %v539_v6 = vpop.f32.mrf.mxu3 }
 0x162   :  { %v288_v9 = vmax.f32 %v264_v8, 0.0  ;;  %2075 = vmatmul.msk.bf16.gmra.mxu1 %vm82_vm1, %v2340_v4  ;;  %v2348_v4 = vld [vmem:[%s3344_s0 + $0x118] sm:$0xff]  ;;  %v540_v8 = vadd.f32 %v2721_v28, %v539_v6 }
 0x164   :  { %304 = vst.msk [vmem:[%s3348_s5 + $0x50] sm:$0xff] %vm204_vm2, %v288_v9  ;;  %v573_v9 = vmax.f32 %v540_v8, 0.0  ;;  %v2358_v8 = vld [vmem:[%s3344_s0 + $0x158] sm:$0xff] }
 0x166   :  { %1913 = vst.msk [vmem:[%s3348_s5 + $0xa0] sm:$0xff] %vm204_vm2, %v573_v9  ;;  %v2363_v9 = vld [vmem:[%s3346_s3 + $0x50] sm:$0xff] }
 0x167   :  { %v265_v12 = vpop.f32.mrf.mxu1  ;;  %1695 = vmatpush.bf16.msra.mxu3 %v2363_v9 }
 0x168   :  { %v266_v14 = vadd.f32 %v2570_v51, %v265_v12 }
 0x16a   :  { %v289_v17 = vmax.f32 %v266_v14, 0.0 }
 0x16c   :  { %305 = vst.msk [vmem:[%s3348_s5 + $0x58] sm:$0xff] %vm204_vm2, %v289_v17  ;;  %v541_v17 = vpop.f32.mrf.mxu3 }
 0x16d   :  { %2166 = vmatmul.msk.bf16.gmra.mxu0 %vm82_vm1, %v2346_v25 }
 0x16f   :  { %v268_v21 = vpop.f32.mrf.mxu1 }
 0x170   :  { %v269_v24 = vadd.f32 %v2570_v51, %v268_v21  ;;  %v542_v21 = vadd.f32 %v2721_v28, %v541_v17 }
 0x172   :  { %v290_v27 = vmax.f32 %v269_v24, 0.0  ;;  %2076 = vmatmul.msk.bf16.gmra.mxu1 %vm82_vm1, %v2341_v20  ;;  %v574_v24 = vmax.f32 %v542_v21, 0.0 }
 0x174   :  { %306 = vst.msk [vmem:[%s3348_s5 + $0x60] sm:$0xff] %vm204_vm2, %v290_v27  ;;  %v544_v31 = vpop.f32.mrf.mxu3 }
 0x175   :  { %1914 = vst.msk [vmem:[%s3348_s5 + $0xa8] sm:$0xff] %vm204_vm2, %v574_v24 }
 0x177   :  { %v270_v32 = vpop.f32.mrf.mxu1 }
 0x178   :  { %v271_v34 = vadd.f32 %v2570_v51, %v270_v32  ;;  %v545_v32 = vadd.f32 %v2721_v28, %v544_v31 }
 0x17a   :  { %v291_v38 = vmax.f32 %v271_v34, 0.0  ;;  %v712_v46 = vpop.f32.mrf.mxu0  ;;  %v575_v34 = vmax.f32 %v545_v32, 0.0 }
 0x17b   :  { %v713_v53 = vadd.f32 %v2700_v10, %v712_v46 }
 0x17c   :  { %307 = vst.msk [vmem:[%s3348_s5 + $0x68] sm:$0xff] %vm204_vm2, %v291_v38  ;;  %v546_v41 = vpop.f32.mrf.mxu3 }
 0x17d   :  { %2167 = vmatmul.msk.bf16.gmra.mxu0 %vm82_vm1, %v2347_v48  ;;  %v746_v58 = vmax.f32 %v713_v53, 0.0  ;;  %1915 = vst.msk [vmem:[%s3348_s5 + $0xb0] sm:$0xff] %vm204_vm2, %v575_v34  ;;  %v547_v45 = vadd.f32 %v2721_v28, %v546_v41  ;;  %v2357_v48 = vld [vmem:[%s3344_s0 + $0x150] sm:$0xff]  ;;  %v2359_v34 = vld [vmem:[%s3344_s0 + $0x160] sm:$0xff] }
 0x17f   :  { %v273_v22 = vpop.f32.mrf.mxu1 }
 0x180   :  { %v274_v47 = vadd.f32 %v2570_v51, %v273_v22 }
 0x182   :  { %v292_v50 = vmax.f32 %v274_v47, 0.0  ;;  %2077 = vmatmul.msk.bf16.gmra.mxu1 %vm82_vm1, %v2342_v43  ;;  %v714_v56 = vpop.f32.mrf.mxu0  ;;  %v576_v47 = vmax.f32 %v547_v45, 0.0 }
 0x183   :  { %v715_v59 = vadd.f32 %v2700_v10, %v714_v56 }
 0x184   :  { %308 = vst.msk [vmem:[%s3348_s5 + $0x70] sm:$0xff] %vm204_vm2, %v292_v50  ;;  %v549_v53 = vpop.f32.mrf.mxu3 }
 0x185   :  { %v747_v62 = vmax.f32 %v715_v59, 0.0  ;;  %1916 = vst.msk [vmem:[%s3348_s5 + $0xb8] sm:$0xff] %vm204_vm2, %v576_v47  ;;  %v550_v54 = vadd.f32 %v2721_v28, %v549_v53 }
 0x187   :  { %v275_v55 = vpop.f32.mrf.mxu1  ;;  %v760_v1 = vpack.c.bf16 %v747_v62, %v746_v58  ;;  %v577_v56 = vmax.f32 %v550_v54, 0.0 }
 0x188   :  { %v276_v57 = vadd.f32 %v2570_v51, %v275_v55 }
 0x189   :  { %1998 = vmatmul.msk.bf16.gmra.mxu2 %vm204_vm2, %v760_v1  ;;  %1917 = vst.msk [vmem:[%s3348_s5 + $0xc0] sm:$0xff] %vm204_vm2, %v577_v56  ;;  %v2360_v56 = vld [vmem:[%s3344_s0 + $0x168] sm:$0xff] }
 0x18a   :  { %v293_v61 = vmax.f32 %v276_v57, 0.0  ;;  %v717_v3 = vpop.f32.mrf.mxu0 }
 0x18b   :  { %v718_v5 = vadd.f32 %v2700_v10, %v717_v3 }
 0x18c   :  { %309 = vst.msk [vmem:[%s3348_s5 + $0x78] sm:$0xff] %vm204_vm2, %v293_v61  ;;  %v551_v63 = vpop.f32.mrf.mxu3 }
 0x18d   :  { %2168 = vmatmul.msk.bf16.gmra.mxu0 %vm82_vm1, %v2348_v4  ;;  %v748_v15 = vmax.f32 %v718_v5, 0.0  ;;  %v2353_v5 = vld [vmem:[%s3346_s3 + $0x40] sm:$0xff] }
 0x18e   :  { %1403 = vmatpush.bf16.msra.mxu2 %v2353_v5 }
 0x18f   :  { %v994_v51 = vpop.f32.mrf.mxu1 }
 0x190   :  { %v995_v11 = vadd.f32 %v2792_v7, %v994_v51  ;;  %v552_v51 = vadd.f32 %v2721_v28, %v551_v63 }
 0x192   :  { %2260 = vmatmul.msk.bf16.vlgmr.msra.gmra.mxu1 %vm82_vm1, %v2355_v2  ;;  %v719_v13 = vpop.f32.mrf.mxu0  ;;  %v1034_v18 = vmax.f32 %v995_v11, 0.0  ;;  %v578_v6 = vmax.f32 %v552_v51, 0.0 }
 0x193   :  { %v720_v16 = vadd.f32 %v2700_v10, %v719_v13  ;;  %v2351_v13 = vld [vmem:[%s3344_s0 + $0x130] sm:$0xff] }
 0x194   :  { %1918 = vst.msk [vmem:[%s3348_s5 + $0xc8] sm:$0xff] %vm204_vm2, %v578_v6 }
 0x195   :  { %v749_v20 = vmax.f32 %v720_v16, 0.0 }
 0x197   :  { %v996_v12 = vpop.f32.mrf.mxu1  ;;  %v761_v25 = vpack.c.bf16 %v749_v20, %v748_v15 }
 0x198   :  { %v997_v14 = vadd.f32 %v2792_v7, %v996_v12 }
 0x199   :  { %1999 = vmatmul.msk.bf16.gmra.mxu2 %vm204_vm2, %v761_v25 }
 0x19a   :  { %v1035_v19 = vmax.f32 %v997_v14, 0.0  ;;  %v722_v29 = vpop.f32.mrf.mxu0  ;;  %v554_v14 = vpop.f32.mrf.mxu3 }
 0x19b   :  { %v723_v33 = vadd.f32 %v2700_v10, %v722_v29  ;;  %v555_v15 = vadd.f32 %v2721_v28, %v554_v14  ;;  %v2361_v14 = vld [vmem:[%s3344_s0 + $0x170] sm:$0xff] }
 0x19c   :  { %v1050_v23 = vpack.c.bf16 %v1035_v19, %v1034_v18 }
 0x19d   :  { %2169 = vmatmul.msk.bf16.gmra.mxu0 %vm82_vm1, %v2349_v30  ;;  %v750_v39 = vmax.f32 %v723_v33, 0.0  ;;  %v579_v17 = vmax.f32 %v555_v15, 0.0 }
 0x19e   :  { %2091 = vmatmul.msk.bf16.vlgmr.msrb.gmra.mxu3 %vm204_vm2, %v1050_v23 }
 0x19f   :  { %v999_v27 = vpop.f32.mrf.mxu1  ;;  %1919 = vst.msk [vmem:[%s3348_s5 + $0xd0] sm:$0xff] %vm204_vm2, %v579_v17 }
 0x1a0   :  { %v1000_v35 = vadd.f32 %v2792_v7, %v999_v27 }
 0x1a2   :  { %2261 = vmatmul.msk.bf16.gmra.mxu1 %vm82_vm1, %v2356_v26  ;;  %v724_v37 = vpop.f32.mrf.mxu0  ;;  %v1036_v42 = vmax.f32 %v1000_v35, 0.0  ;;  %v556_v25 = vpop.f32.mrf.mxu3 }
 0x1a3   :  { %v725_v40 = vadd.f32 %v2700_v10, %v724_v37  ;;  %v557_v30 = vadd.f32 %v2721_v28, %v556_v25  ;;  %v2352_v37 = vld [vmem:[%s3344_s0 + $0x138] sm:$0xff] }
 0x1a5   :  { %v751_v44 = vmax.f32 %v725_v40, 0.0  ;;  %v580_v33 = vmax.f32 %v557_v30, 0.0 }
 0x1a7   :  { %v1001_v36 = vpop.f32.mrf.mxu1  ;;  %v762_v46 = vpack.c.bf16 %v751_v44, %v750_v39  ;;  %1920 = vst.msk [vmem:[%s3348_s5 + $0xd8] sm:$0xff] %vm204_vm2, %v580_v33 }
 0x1a8   :  { %v1002_v38 = vadd.f32 %v2792_v7, %v1001_v36 }
 0x1a9   :  { %2000 = vmatmul.msk.bf16.gmra.mxu2 %vm204_vm2, %v762_v46 }
 0x1aa   :  { %v1037_v43 = vmax.f32 %v1002_v38, 0.0  ;;  %v727_v50 = vpop.f32.mrf.mxu0  ;;  %v559_v38 = vpop.f32.mrf.mxu3 }
 0x1ab   :  { %v728_v55 = vadd.f32 %v2700_v10, %v727_v50  ;;  %v560_v39 = vadd.f32 %v2721_v28, %v559_v38 }
 0x1ac   :  { %v1051_v22 = vpack.c.bf16 %v1037_v43, %v1036_v42 }
 0x1ad   :  { %2170 = vmatmul.msk.bf16.gmra.mxu0 %vm82_vm1, %v2350_v52  ;;  %v752_v61 = vmax.f32 %v728_v55, 0.0  ;;  %v581_v41 = vmax.f32 %v560_v39, 0.0 }
 0x1ae   :  { %2092 = vmatmul.msk.bf16.gmra.mxu3 %vm204_vm2, %v1051_v22  ;;  %v821_v17 = vpop.f32.mrf.mxu2 }
 0x1af   :  { %v1004_v49 = vpop.f32.mrf.mxu1  ;;  %1921 = vst.msk [vmem:[%s3348_s5 + $0xe0] sm:$0xff] %vm204_vm2, %v581_v41 }
 0x1b0   :  { %v1005_v57 = vadd.f32 %v2792_v7, %v1004_v49 }
 0x1b2   :  { %2262 = vmatmul.msk.bf16.gmra.mxu1 %vm82_vm1, %v2357_v48  ;;  %v729_v59 = vpop.f32.mrf.mxu0  ;;  %v1038_v0 = vmax.f32 %v1005_v57, 0.0  ;;  %v561_v47 = vpop.f32.mrf.mxu3 }
 0x1b3   :  { %v730_v62 = vadd.f32 %v2700_v10, %v729_v59  ;;  %v562_v52 = vadd.f32 %v2721_v28, %v561_v47  ;;  %v2921_v59 = vld [vmem:[%s3345_s2 + $0x4] ss:$0 sm:$0xff] }
 0x1b5   :  { %v753_v2 = vmax.f32 %v730_v62, 0.0  ;;  %v582_v55 = vmax.f32 %v562_v52, 0.0 }
 0x1b7   :  { %v1006_v58 = vpop.f32.mrf.mxu1  ;;  %v763_v4 = vpack.c.bf16 %v753_v2, %v752_v61  ;;  %1922 = vst.msk [vmem:[%s3348_s5 + $0xe8] sm:$0xff] %vm204_vm2, %v582_v55 }
 0x1b8   :  { %v1007_v60 = vadd.f32 %v2792_v7, %v1006_v58 }
 0x1b9   :  { %2001 = vmatmul.msk.bf16.gmra.mxu2 %vm204_vm2, %v763_v4 }
 0x1ba   :  { %v1039_v1 = vmax.f32 %v1007_v60, 0.0  ;;  %v732_v12 = vpop.f32.mrf.mxu0  ;;  %v564_v58 = vpop.f32.mrf.mxu3 }
 0x1bb   :  { %v733_v16 = vadd.f32 %v2700_v10, %v732_v12  ;;  %v565_v60 = vadd.f32 %v2721_v28, %v564_v58 }
 0x1bc   :  { %v1052_v3 = vpack.c.bf16 %v1039_v1, %v1038_v0 }
 0x1bd   :  { %2171 = vmatmul.msk.bf16.gmra.mxu0 %vm82_vm1, %v2351_v13  ;;  %v754_v23 = vmax.f32 %v733_v16, 0.0  ;;  %v583_v62 = vmax.f32 %v565_v60, 0.0  ;;  %v2987_v60 = vld [vmem:[%s3345_s2 + $0x5] ss:$0 sm:$0xff] }
 0x1be   :  { %2093 = vmatmul.msk.bf16.gmra.mxu3 %vm204_vm2, %v1052_v3 }
 0x1bf   :  { %v1009_v11 = vpop.f32.mrf.mxu1  ;;  %1923 = vst.msk [vmem:[%s3348_s5 + $0xf0] sm:$0xff] %vm204_vm2, %v583_v62 }
 0x1c0   :  { %v1010_v18 = vadd.f32 %v2792_v7, %v1009_v11 }
 0x1c2   :  { %2263 = vmatmul.msk.bf16.gmra.mxu1 %vm82_vm1, %v2358_v8  ;;  %v734_v20 = vpop.f32.mrf.mxu0  ;;  %v1040_v26 = vmax.f32 %v1010_v18, 0.0  ;;  %v566_v4 = vpop.f32.mrf.mxu3 }
 0x1c3   :  { %v735_v24 = vadd.f32 %v2700_v10, %v734_v20  ;;  %v567_v9 = vadd.f32 %v2721_v28, %v566_v4  ;;  %v2946_v28 = vld [vmem:[%s3347_s4 + $0x2] ss:$0 sm:$0xff] }
 0x1c5   :  { %v755_v29 = vmax.f32 %v735_v24, 0.0  ;;  %v584_v13 = vmax.f32 %v567_v9, 0.0 }
 0x1c7   :  { %v1011_v19 = vpop.f32.mrf.mxu1  ;;  %v764_v32 = vpack.c.bf16 %v755_v29, %v754_v23  ;;  %1924 = vst.msk [vmem:[%s3348_s5 + $0xf8] sm:$0xff] %vm204_vm2, %v584_v13  ;;  %v823_v29 = vpop.f32.mrf.mxu2 }
 0x1c8   :  { %v1012_v21 = vadd.f32 %v2792_v7, %v1011_v19  ;;  %v822_v19 = vadd.f32 %v2946_v28, %v821_v17  ;;  %v824_v33 = vadd.f32 %v2946_v28, %v823_v29 }
 0x1c9   :  { %2002 = vmatmul.msk.bf16.gmra.mxu2 %vm204_vm2, %v764_v32 }
 0x1ca   :  { %v1041_v27 = vmax.f32 %v1012_v21, 0.0  ;;  %v737_v36 = vpop.f32.mrf.mxu0  ;;  %v861_v21 = vmax.f32 %v822_v19, 0.0 }
 0x1cb   :  { %v738_v40 = vadd.f32 %v2700_v10, %v737_v36  ;;  %v862_v36 = vmax.f32 %v824_v33, 0.0 }
 0x1cc   :  { %v1053_v31 = vpack.c.bf16 %v1041_v27, %v1040_v26  ;;  %2004 = vst.msk [vmem:[%s3348_s5 + $0x100] sm:$0xff] %vm204_vm2, %v861_v21 }
 0x1cd   :  { %2172 = vmatmul.msk.bf16.gmra.mxu0 %vm82_vm1, %v2352_v37  ;;  %v756_v22 = vmax.f32 %v738_v40, 0.0  ;;  %v2362_v37 = vld [vmem:[%s3344_s0 + $0x178] sm:$0xff]  ;;  %2005 = vst.msk [vmem:[%s3348_s5 + $0x108] sm:$0xff] %vm204_vm2, %v862_v36 }
 0x1ce   :  { %2094 = vmatmul.msk.bf16.gmra.mxu3 %vm204_vm2, %v1053_v31 }
 0x1cf   :  { %v1014_v35 = vpop.f32.mrf.mxu1  ;;  %v826_v40 = vpop.f32.mrf.mxu2 }
 0x1d0   :  { %v1015_v42 = vadd.f32 %v2792_v7, %v1014_v35  ;;  %v827_v41 = vadd.f32 %v2946_v28, %v826_v40 }
 0x1d2   :  { %2264 = vmatmul.msk.bf16.gmra.mxu1 %vm82_vm1, %v2359_v34  ;;  %v739_v44 = vpop.f32.mrf.mxu0  ;;  %v1042_v48 = vmax.f32 %v1015_v42, 0.0 }
 0x1d3   :  { %v740_v46 = vadd.f32 %v2700_v10, %v739_v44 }
 0x1d5   :  { %v757_v50 = vmax.f32 %v740_v46, 0.0 }
 0x1d7   :  { %v1016_v43 = vpop.f32.mrf.mxu1  ;;  %v765_v54 = vpack.c.bf16 %v757_v50, %v756_v22 }
 0x1d8   :  { %v1017_v45 = vadd.f32 %v2792_v7, %v1016_v43  ;;  %v863_v43 = vmax.f32 %v827_v41, 0.0 }
 0x1d9   :  { %2003 = vmatmul.msk.bf16.gmra.mxu2 %vm204_vm2, %v765_v54 }
 0x1da   :  { %v1043_v49 = vmax.f32 %v1017_v45, 0.0  ;;  %v1286_v57 = vpop.f32.mrf.mxu0  ;;  %2006 = vst.msk [vmem:[%s3348_s5 + $0x110] sm:$0xff] %vm204_vm2, %v863_v43 }
 0x1db   :  { %v1287_v61 = vadd.f32 %v2921_v59, %v1286_v57 }
 0x1dc   :  { %v1054_v53 = vpack.c.bf16 %v1043_v49, %v1042_v48  ;;  %v828_v49 = vpop.f32.mrf.mxu2 }
 0x1dd   :  { %v1326_v51 = vmax.f32 %v1287_v61, 0.0  ;;  %v829_v54 = vadd.f32 %v2946_v28, %v828_v49 }
 0x1de   :  { %2095 = vmatmul.msk.bf16.gmra.mxu3 %vm204_vm2, %v1054_v53 }
 0x1df   :  { %v1019_v10 = vpop.f32.mrf.mxu1 }
 0x1e0   :  { %v1020_v63 = vadd.f32 %v2792_v7, %v1019_v10  ;;  %v864_v10 = vmax.f32 %v829_v54, 0.0 }
 0x1e2   :  { %2265 = vmatmul.msk.bf16.gmra.mxu1 %vm82_vm1, %v2360_v56  ;;  %v1288_v1 = vpop.f32.mrf.mxu0  ;;  %v1044_v6 = vmax.f32 %v1020_v63, 0.0  ;;  %2007 = vst.msk [vmem:[%s3348_s5 + $0x118] sm:$0xff] %vm204_vm2, %v864_v10 }
 0x1e3   :  { %v1289_v3 = vadd.f32 %v2921_v59, %v1288_v1 }
 0x1e5   :  { %v1327_v5 = vmax.f32 %v1289_v3, 0.0 }
 0x1e7   :  { %v1021_v0 = vpop.f32.mrf.mxu1  ;;  %v1342_v12 = vpack.c.bf16 %v1327_v5, %v1326_v51 }
 0x1e8   :  { %v1022_v2 = vadd.f32 %v2792_v7, %v1021_v0 }
 0x1e9   :  { %2186 = vmatmul.msk.bf16.vlgmr.msra.gmra.mxu2 %vm204_vm2, %v1342_v12 }
 0x1ea   :  { %v1045_v8 = vmax.f32 %v1022_v2, 0.0  ;;  %v1291_v16 = vpop.f32.mrf.mxu0 }
 0x1eb   :  { %v1292_v18 = vadd.f32 %v2921_v59, %v1291_v16 }
 0x1ec   :  { %v1055_v11 = vpack.c.bf16 %v1045_v8, %v1044_v6 }
 0x1ed   :  { %v1328_v26 = vmax.f32 %v1292_v18, 0.0 }
 0x1ee   :  { %2096 = vmatmul.msk.bf16.gmra.mxu3 %vm204_vm2, %v1055_v11 }
 0x1ef   :  { %v1024_v15 = vpop.f32.mrf.mxu1 }
 0x1f0   :  { %v1025_v20 = vadd.f32 %v2792_v7, %v1024_v15  ;;  %v3003_v15 = vld [vmem:[%s3347_s4 + $0x3] ss:$0 sm:$0xff] }
 0x1f2   :  { %2266 = vmatmul.msk.bf16.gmra.mxu1 %vm82_vm1, %v2361_v14  ;;  %v1293_v24 = vpop.f32.mrf.mxu0  ;;  %v1046_v30 = vmax.f32 %v1025_v20, 0.0 }
 0x1f3   :  { %v1294_v27 = vadd.f32 %v2921_v59, %v1293_v24 }
 0x1f5   :  { %v1329_v32 = vmax.f32 %v1294_v27, 0.0 }
 0x1f7   :  { %v1026_v23 = vpop.f32.mrf.mxu1  ;;  %v1343_v35 = vpack.c.bf16 %v1329_v32, %v1328_v26 }
 0x1f8   :  { %v1027_v25 = vadd.f32 %v2792_v7, %v1026_v23 }
 0x1f9   :  { %2187 = vmatmul.msk.bf16.gmra.mxu2 %vm204_vm2, %v1343_v35 }
 0x1fa   :  { %v1047_v31 = vmax.f32 %v1027_v25, 0.0  ;;  %v1296_v39 = vpop.f32.mrf.mxu0 }
 0x1fb   :  { %v1297_v42 = vadd.f32 %v2921_v59, %v1296_v39 }
 0x1fc   :  { %v1056_v34 = vpack.c.bf16 %v1047_v31, %v1046_v30 }
 0x1fd   :  { %v1330_v47 = vmax.f32 %v1297_v42, 0.0 }
 0x1fe   :  { %2097 = vmatmul.msk.bf16.gmra.mxu3 %vm204_vm2, %v1056_v34 }
 0x1ff   :  { %v1029_v38 = vpop.f32.mrf.mxu1 }
 0x200   :  { %v1030_v44 = vadd.f32 %v2792_v7, %v1029_v38 }
 0x202   :  { %2267 = vmatmul.msk.bf16.gmra.mxu1 %vm82_vm1, %v2362_v37  ;;  %v1298_v22 = vpop.f32.mrf.mxu0  ;;  %v1048_v50 = vmax.f32 %v1030_v44, 0.0 }
 0x203   :  { %v1299_v48 = vadd.f32 %v2921_v59, %v1298_v22 }
 0x205   :  { %v1331_v53 = vmax.f32 %v1299_v48, 0.0 }
 0x207   :  { %v1031_v45 = vpop.f32.mrf.mxu1  ;;  %v1344_v56 = vpack.c.bf16 %v1331_v53, %v1330_v47 }
 0x208   :  { %v1032_v46 = vadd.f32 %v2792_v7, %v1031_v45 }
 0x209   :  { %2188 = vmatmul.msk.bf16.gmra.mxu2 %vm204_vm2, %v1344_v56 }
 0x20a   :  { %v1049_v52 = vmax.f32 %v1032_v46, 0.0  ;;  %v1301_v57 = vpop.f32.mrf.mxu0 }
 0x20b   :  { %v1302_v62 = vadd.f32 %v2921_v59, %v1301_v57 }
 0x20c   :  { %v1057_v55 = vpack.c.bf16 %v1049_v52, %v1048_v50  ;;  %v831_v58 = vpop.f32.mrf.mxu2 }
 0x20d   :  { %v832_v61 = vadd.f32 %v2946_v28, %v831_v58  ;;  %v1332_v3 = vmax.f32 %v1302_v62, 0.0 }
 0x20e   :  { %2098 = vmatmul.msk.bf16.gmra.mxu3 %vm204_vm2, %v1057_v55 }
 0x20f   :  { %v1578_v7 = vpop.f32.mrf.mxu1  ;;  %v865_v63 = vmax.f32 %v832_v61, 0.0 }
 0x210   :  { %v1579_v0 = vadd.f32 %v2987_v60, %v1578_v7 }
 0x211   :  { %2008 = vst.msk [vmem:[%s3348_s5 + $0x120] sm:$0xff] %vm204_vm2, %v865_v63 }
 0x212   :  { %v1303_v2 = vpop.f32.mrf.mxu0  ;;  %v1618_v8 = vmax.f32 %v1579_v0, 0.0 }
 0x213   :  { %v1304_v4 = vadd.f32 %v2921_v59, %v1303_v2 }
 0x214   :  { %v833_v6 = vpop.f32.mrf.mxu2 }
 0x215   :  { %v1333_v9 = vmax.f32 %v1304_v4, 0.0  ;;  %v834_v11 = vadd.f32 %v2946_v28, %v833_v6 }
 0x217   :  { %v1580_v1 = vpop.f32.mrf.mxu1  ;;  %v1345_v13 = vpack.c.bf16 %v1333_v9, %v1332_v3  ;;  %v866_v14 = vmax.f32 %v834_v11, 0.0 }
 0x218   :  { %v1581_v51 = vadd.f32 %v2987_v60, %v1580_v1 }
 0x219   :  { %2009 = vst.msk [vmem:[%s3348_s5 + $0x128] sm:$0xff] %vm204_vm2, %v866_v14  ;;  %2189 = vmatmul.msk.bf16.gmra.mxu2 %vm204_vm2, %v1345_v13 }
 0x21a   :  { %v1619_v5 = vmax.f32 %v1581_v51, 0.0  ;;  %v1306_v17 = vpop.f32.mrf.mxu0 }
 0x21b   :  { %v1307_v24 = vadd.f32 %v2921_v59, %v1306_v17 }
 0x21c   :  { %v1634_v12 = vpack.c.bf16 %v1619_v5, %v1618_v8  ;;  %v836_v19 = vpop.f32.mrf.mxu2 }
 0x21d   :  { %v837_v21 = vadd.f32 %v2946_v28, %v836_v19  ;;  %v1334_v31 = vmax.f32 %v1307_v24, 0.0 }
 0x21e   :  { %2281 = vmatmul.msk.bf16.vlgmr.msra.gmra.mxu3 %vm204_vm2, %v1634_v12 }
 0x21f   :  { %v1583_v16 = vpop.f32.mrf.mxu1  ;;  %v867_v25 = vmax.f32 %v837_v21, 0.0 }
 0x220   :  { %v1584_v26 = vadd.f32 %v2987_v60, %v1583_v16 }
 0x221   :  { %v1113_v18 = vpop.f32.mrf.mxu3  ;;  %2010 = vst.msk [vmem:[%s3348_s5 + $0x130] sm:$0xff] %vm204_vm2, %v867_v25 }
 0x222   :  { %v1114_v20 = vadd.f32 %v3003_v15, %v1113_v18  ;;  %v1308_v29 = vpop.f32.mrf.mxu0  ;;  %v1620_v33 = vmax.f32 %v1584_v26, 0.0 }
 0x223   :  { %v1309_v32 = vadd.f32 %v2921_v59, %v1308_v29 }
 0x224   :  { %v1153_v23 = vmax.f32 %v1114_v20, 0.0  ;;  %v838_v35 = vpop.f32.mrf.mxu2 }
 0x225   :  { %v1335_v38 = vmax.f32 %v1309_v32, 0.0  ;;  %v839_v39 = vadd.f32 %v2946_v28, %v838_v35 }
 0x226   :  { %2099 = vst.msk [vmem:[%s3348_s5 + $0x180] sm:$0xff] %vm204_vm2, %v1153_v23 }
 0x227   :  { %v1585_v27 = vpop.f32.mrf.mxu1  ;;  %v1346_v42 = vpack.c.bf16 %v1335_v38, %v1334_v31  ;;  %v868_v43 = vmax.f32 %v839_v39, 0.0 }
 0x228   :  { %v1586_v30 = vadd.f32 %v2987_v60, %v1585_v27 }
 0x229   :  { %v1115_v34 = vpop.f32.mrf.mxu3  ;;  %2190 = vmatmul.msk.bf16.gmra.mxu2 %vm204_vm2, %v1346_v42  ;;  %2011 = vst.msk [vmem:[%s3348_s5 + $0x138] sm:$0xff] %vm204_vm2, %v868_v43 }
 0x22a   :  { %v1621_v36 = vmax.f32 %v1586_v30, 0.0  ;;  %v1116_v37 = vadd.f32 %v3003_v15, %v1115_v34  ;;  %v1311_v45 = vpop.f32.mrf.mxu0 }
 0x22b   :  { %v1312_v50 = vadd.f32 %v2921_v59, %v1311_v45 }
 0x22c   :  { %v1635_v40 = vpack.c.bf16 %v1621_v36, %v1620_v33  ;;  %v1154_v41 = vmax.f32 %v1116_v37, 0.0  ;;  %v841_v46 = vpop.f32.mrf.mxu2 }
 0x22d   :  { %v842_v48 = vadd.f32 %v2946_v28, %v841_v46  ;;  %v1336_v10 = vmax.f32 %v1312_v50, 0.0 }
 0x22e   :  { %2100 = vst.msk [vmem:[%s3348_s5 + $0x188] sm:$0xff] %vm204_vm2, %v1154_v41  ;;  %2282 = vmatmul.msk.bf16.gmra.mxu3 %vm204_vm2, %v1635_v40 }
 0x22f   :  { %v1588_v44 = vpop.f32.mrf.mxu1  ;;  %v869_v52 = vmax.f32 %v842_v48, 0.0 }
 0x230   :  { %v1589_v53 = vadd.f32 %v2987_v60, %v1588_v44 }
 0x231   :  { %v1118_v22 = vpop.f32.mrf.mxu3  ;;  %2012 = vst.msk [vmem:[%s3348_s5 + $0x140] sm:$0xff] %vm204_vm2, %v869_v52 }
 0x232   :  { %v1119_v47 = vadd.f32 %v3003_v15, %v1118_v22  ;;  %v1313_v55 = vpop.f32.mrf.mxu0  ;;  %v1622_v57 = vmax.f32 %v1589_v53, 0.0 }
 0x233   :  { %v1314_v7 = vadd.f32 %v2921_v59, %v1313_v55 }
 0x234   :  { %v1155_v49 = vmax.f32 %v1119_v47, 0.0  ;;  %v843_v61 = vpop.f32.mrf.mxu2 }
 0x235   :  { %v1337_v0 = vmax.f32 %v1314_v7, 0.0  ;;  %v844_v1 = vadd.f32 %v2946_v28, %v843_v61 }
 0x236   :  { %2101 = vst.msk [vmem:[%s3348_s5 + $0x190] sm:$0xff] %vm204_vm2, %v1155_v49 }
 0x237   :  { %v1590_v54 = vpop.f32.mrf.mxu1  ;;  %v1347_v3 = vpack.c.bf16 %v1337_v0, %v1336_v10  ;;  %v870_v4 = vmax.f32 %v844_v1, 0.0 }
 0x238   :  { %v1591_v56 = vadd.f32 %v2987_v60, %v1590_v54 }
 0x239   :  { %v1120_v58 = vpop.f32.mrf.mxu3  ;;  %2191 = vmatmul.msk.bf16.gmra.mxu2 %vm204_vm2, %v1347_v3  ;;  %2013 = vst.msk [vmem:[%s3348_s5 + $0x148] sm:$0xff] %vm204_vm2, %v870_v4 }
 0x23a   :  { %v1623_v62 = vmax.f32 %v1591_v56, 0.0  ;;  %v1121_v63 = vadd.f32 %v3003_v15, %v1120_v58  ;;  %v1316_v8 = vpop.f32.mrf.mxu0 }
 0x23b   :  { %v1317_v14 = vadd.f32 %v2921_v59, %v1316_v8 }
 0x23c   :  { %v1636_v2 = vpack.c.bf16 %v1623_v62, %v1622_v57  ;;  %v1156_v51 = vmax.f32 %v1121_v63, 0.0  ;;  %v846_v9 = vpop.f32.mrf.mxu2 }
 0x23d   :  { %v847_v12 = vadd.f32 %v2946_v28, %v846_v9  ;;  %v1338_v21 = vmax.f32 %v1317_v14, 0.0 }
 0x23e   :  { %2102 = vst.msk [vmem:[%s3348_s5 + $0x198] sm:$0xff] %vm204_vm2, %v1156_v51  ;;  %2283 = vmatmul.msk.bf16.gmra.mxu3 %vm204_vm2, %v1636_v2 }
 0x23f   :  { %v1593_v6 = vpop.f32.mrf.mxu1  ;;  %v871_v16 = vmax.f32 %v847_v12, 0.0 }
 0x240   :  { %v1594_v17 = vadd.f32 %v2987_v60, %v1593_v6 }
 0x241   :  { %v1123_v5 = vpop.f32.mrf.mxu3  ;;  %2014 = vst.msk [vmem:[%s3348_s5 + $0x150] sm:$0xff] %vm204_vm2, %v871_v16 }
 0x242   :  { %v1124_v11 = vadd.f32 %v3003_v15, %v1123_v5  ;;  %v1318_v19 = vpop.f32.mrf.mxu0  ;;  %v1624_v24 = vmax.f32 %v1594_v17, 0.0 }
 0x243   :  { %v1319_v23 = vadd.f32 %v2921_v59, %v1318_v19 }
 0x244   :  { %v1157_v13 = vmax.f32 %v1124_v11, 0.0  ;;  %v848_v26 = vpop.f32.mrf.mxu2 }
 0x245   :  { %v1339_v30 = vmax.f32 %v1319_v23, 0.0  ;;  %v849_v31 = vadd.f32 %v2946_v28, %v848_v26 }
 0x246   :  { %2103 = vst.msk [vmem:[%s3348_s5 + $0x1a0] sm:$0xff] %vm204_vm2, %v1157_v13 }
 0x247   :  { %v1595_v18 = vpop.f32.mrf.mxu1  ;;  %v1348_v34 = vpack.c.bf16 %v1339_v30, %v1338_v21  ;;  %v872_v35 = vmax.f32 %v849_v31, 0.0 }
 0x248   :  { %v1596_v20 = vadd.f32 %v2987_v60, %v1595_v18 }
 0x249   :  { %v1125_v25 = vpop.f32.mrf.mxu3  ;;  %2192 = vmatmul.msk.bf16.gmra.mxu2 %vm204_vm2, %v1348_v34  ;;  %2015 = vst.msk [vmem:[%s3348_s5 + $0x158] sm:$0xff] %vm204_vm2, %v872_v35 }
 0x24a   :  { %v1625_v27 = vmax.f32 %v1596_v20, 0.0  ;;  %v1126_v29 = vadd.f32 %v3003_v15, %v1125_v25  ;;  %v1321_v37 = vpop.f32.mrf.mxu0 }
 0x24b   :  { %v1322_v43 = vadd.f32 %v2921_v59, %v1321_v37 }
 0x24c   :  { %v1637_v32 = vpack.c.bf16 %v1625_v27, %v1624_v24  ;;  %v1158_v33 = vmax.f32 %v1126_v29, 0.0  ;;  %v851_v39 = vpop.f32.mrf.mxu2  ;;  %v3146_v24 = vld [vmem:[%s3347_s4 + $0x4] ss:$0 sm:$0xff] }
 0x24d   :  { %v852_v41 = vadd.f32 %v2946_v28, %v851_v39  ;;  %v1340_v48 = vmax.f32 %v1322_v43, 0.0 }
 0x24e   :  { %2104 = vst.msk [vmem:[%s3348_s5 + $0x1a8] sm:$0xff] %vm204_vm2, %v1158_v33  ;;  %2284 = vmatmul.msk.bf16.gmra.mxu3 %vm204_vm2, %v1637_v32 }
 0x24f   :  { %v1598_v36 = vpop.f32.mrf.mxu1  ;;  %v873_v44 = vmax.f32 %v852_v41, 0.0 }
 0x250   :  { %v1599_v45 = vadd.f32 %v2987_v60, %v1598_v36 }
 0x251   :  { %v1128_v38 = vpop.f32.mrf.mxu3  ;;  %2016 = vst.msk [vmem:[%s3348_s5 + $0x160] sm:$0xff] %vm204_vm2, %v873_v44 }
 0x252   :  { %v1129_v40 = vadd.f32 %v3003_v15, %v1128_v38  ;;  %v1323_v46 = vpop.f32.mrf.mxu0  ;;  %v1626_v50 = vmax.f32 %v1599_v45, 0.0 }
 0x253   :  { %v1324_v49 = vadd.f32 %v2921_v59, %v1323_v46 }
 0x254   :  { %v1159_v42 = vmax.f32 %v1129_v40, 0.0  ;;  %v853_v53 = vpop.f32.mrf.mxu2 }
 0x255   :  { %v1341_v56 = vmax.f32 %v1324_v49, 0.0  ;;  %v854_v10 = vadd.f32 %v2946_v28, %v853_v53 }
 0x256   :  { %2105 = vst.msk [vmem:[%s3348_s5 + $0x1b0] sm:$0xff] %vm204_vm2, %v1159_v42 }
 0x257   :  { %v1600_v22 = vpop.f32.mrf.mxu1  ;;  %v1349_v58 = vpack.c.bf16 %v1341_v56, %v1340_v48  ;;  %v874_v61 = vmax.f32 %v854_v10, 0.0 }
 0x258   :  { %v1601_v47 = vadd.f32 %v2987_v60, %v1600_v22 }
 0x259   :  { %v1130_v52 = vpop.f32.mrf.mxu3  ;;  %2193 = vmatmul.msk.bf16.gmra.mxu2 %vm204_vm2, %v1349_v58  ;;  %2017 = vst.msk [vmem:[%s3348_s5 + $0x168] sm:$0xff] %vm204_vm2, %v874_v61 }
 0x25a   :  { %v1627_v54 = vmax.f32 %v1601_v47, 0.0  ;;  %v1131_v55 = vadd.f32 %v3003_v15, %v1130_v52 }
 0x25c   :  { %v1638_v7 = vpack.c.bf16 %v1627_v54, %v1626_v50  ;;  %v1160_v57 = vmax.f32 %v1131_v55, 0.0  ;;  %v856_v63 = vpop.f32.mrf.mxu2 }
 0x25d   :  { %v857_v1 = vadd.f32 %v2946_v28, %v856_v63 }
 0x25e   :  { %2106 = vst.msk [vmem:[%s3348_s5 + $0x1b8] sm:$0xff] %vm204_vm2, %v1160_v57  ;;  %2285 = vmatmul.msk.bf16.gmra.mxu3 %vm204_vm2, %v1638_v7 }
 0x25f   :  { %v1603_v59 = vpop.f32.mrf.mxu1  ;;  %v875_v51 = vmax.f32 %v857_v1, 0.0 }
 0x260   :  { %v1604_v3 = vadd.f32 %v2987_v60, %v1603_v59 }
 0x261   :  { %v1133_v62 = vpop.f32.mrf.mxu3  ;;  %2018 = vst.msk [vmem:[%s3348_s5 + $0x170] sm:$0xff] %vm204_vm2, %v875_v51 }
 0x262   :  { %v1134_v0 = vadd.f32 %v3003_v15, %v1133_v62  ;;  %v1628_v9 = vmax.f32 %v1604_v3, 0.0  ;;  %v3207_v3 = vld [vmem:[%s3347_s4 + $0x5] ss:$0 sm:$0xff] }
 0x264   :  { %v1161_v2 = vmax.f32 %v1134_v0, 0.0  ;;  %v858_v5 = vpop.f32.mrf.mxu2 }
 0x265   :  { %v859_v13 = vadd.f32 %v2946_v28, %v858_v5 }
 0x266   :  { %2107 = vst.msk [vmem:[%s3348_s5 + $0x1c0] sm:$0xff] %vm204_vm2, %v1161_v2 }
 0x267   :  { %v1605_v4 = vpop.f32.mrf.mxu1  ;;  %v876_v17 = vmax.f32 %v859_v13, 0.0 }
 0x268   :  { %v1606_v6 = vadd.f32 %v2987_v60, %v1605_v4 }
 0x269   :  { %v1135_v8 = vpop.f32.mrf.mxu3  ;;  %2019 = vst.msk [vmem:[%s3348_s5 + $0x178] sm:$0xff] %vm204_vm2, %v876_v17 }
 0x26a   :  { %v1629_v11 = vmax.f32 %v1606_v6, 0.0  ;;  %v1136_v12 = vadd.f32 %v3003_v15, %v1135_v8 }
 0x26c   :  { %v1639_v14 = vpack.c.bf16 %v1629_v11, %v1628_v9  ;;  %v1162_v16 = vmax.f32 %v1136_v12, 0.0  ;;  %v1405_v20 = vpop.f32.mrf.mxu2 }
 0x26d   :  { %v1406_v27 = vadd.f32 %v3146_v24, %v1405_v20 }
 0x26e   :  { %2108 = vst.msk [vmem:[%s3348_s5 + $0x1c8] sm:$0xff] %vm204_vm2, %v1162_v16  ;;  %2286 = vmatmul.msk.bf16.gmra.mxu3 %vm204_vm2, %v1639_v14 }
 0x26f   :  { %v1608_v18 = vpop.f32.mrf.mxu1  ;;  %v1445_v34 = vmax.f32 %v1406_v27, 0.0 }
 0x270   :  { %v1609_v23 = vadd.f32 %v2987_v60, %v1608_v18 }
 0x271   :  { %v1138_v19 = vpop.f32.mrf.mxu3  ;;  %2194 = vst.msk [vmem:[%s3348_s5 + $0x200] sm:$0xff] %vm204_vm2, %v1445_v34 }
 0x272   :  { %v1139_v28 = vadd.f32 %v3003_v15, %v1138_v19  ;;  %v1630_v29 = vmax.f32 %v1609_v23, 0.0 }
 0x274   :  { %v1163_v21 = vmax.f32 %v1139_v28, 0.0  ;;  %v1407_v31 = vpop.f32.mrf.mxu2 }
 0x275   :  { %v1408_v35 = vadd.f32 %v3146_v24, %v1407_v31 }
 0x276   :  { %2109 = vst.msk [vmem:[%s3348_s5 + $0x1d0] sm:$0xff] %vm204_vm2, %v1163_v21 }
 0x277   :  { %v1610_v25 = vpop.f32.mrf.mxu1  ;;  %v1446_v38 = vmax.f32 %v1408_v35, 0.0 }
 0x278   :  { %v1611_v26 = vadd.f32 %v2987_v60, %v1610_v25 }
 0x279   :  { %v1140_v30 = vpop.f32.mrf.mxu3  ;;  %2195 = vst.msk [vmem:[%s3348_s5 + $0x208] sm:$0xff] %vm204_vm2, %v1446_v38 }
 0x27a   :  { %v1631_v32 = vmax.f32 %v1611_v26, 0.0  ;;  %v1141_v33 = vadd.f32 %v3003_v15, %v1140_v30 }
 0x27c   :  { %v1640_v36 = vpack.c.bf16 %v1631_v32, %v1630_v29  ;;  %v1164_v37 = vmax.f32 %v1141_v33, 0.0  ;;  %v1410_v41 = vpop.f32.mrf.mxu2 }
 0x27d   :  { %v1411_v43 = vadd.f32 %v3146_v24, %v1410_v41 }
 0x27e   :  { %2110 = vst.msk [vmem:[%s3348_s5 + $0x1d8] sm:$0xff] %vm204_vm2, %v1164_v37  ;;  %2287 = vmatmul.msk.bf16.gmra.mxu3 %vm204_vm2, %v1640_v36 }
 0x27f   :  { %v1613_v39 = vpop.f32.mrf.mxu1  ;;  %v1447_v45 = vmax.f32 %v1411_v43, 0.0 }
 0x280   :  { %v1614_v22 = vadd.f32 %v2987_v60, %v1613_v39 }
 0x281   :  { %v1143_v40 = vpop.f32.mrf.mxu3  ;;  %2196 = vst.msk [vmem:[%s3348_s5 + $0x210] sm:$0xff] %vm204_vm2, %v1447_v45 }
 0x282   :  { %v1144_v42 = vadd.f32 %v3003_v15, %v1143_v40  ;;  %v1632_v50 = vmax.f32 %v1614_v22, 0.0 }
 0x284   :  { %v1165_v44 = vmax.f32 %v1144_v42, 0.0  ;;  %v1412_v49 = vpop.f32.mrf.mxu2 }
 0x285   :  { %v1413_v54 = vadd.f32 %v3146_v24, %v1412_v49 }
 0x286   :  { %2111 = vst.msk [vmem:[%s3348_s5 + $0x1e0] sm:$0xff] %vm204_vm2, %v1165_v44 }
 0x287   :  { %v1615_v46 = vpop.f32.mrf.mxu1  ;;  %v1448_v10 = vmax.f32 %v1413_v54, 0.0 }
 0x288   :  { %v1616_v47 = vadd.f32 %v2987_v60, %v1615_v46 }
 0x289   :  { %v1145_v48 = vpop.f32.mrf.mxu3  ;;  %2197 = vst.msk [vmem:[%s3348_s5 + $0x218] sm:$0xff] %vm204_vm2, %v1448_v10 }
 0x28a   :  { %v1633_v52 = vmax.f32 %v1616_v47, 0.0  ;;  %v1146_v53 = vadd.f32 %v3003_v15, %v1145_v48 }
 0x28c   :  { %v1641_v55 = vpack.c.bf16 %v1633_v52, %v1632_v50  ;;  %v1166_v56 = vmax.f32 %v1146_v53, 0.0  ;;  %v1415_v7 = vpop.f32.mrf.mxu2 }
 0x28d   :  { %v1416_v58 = vadd.f32 %v3146_v24, %v1415_v7 }
 0x28e   :  { %2112 = vst.msk [vmem:[%s3348_s5 + $0x1e8] sm:$0xff] %vm204_vm2, %v1166_v56  ;;  %2288 = vmatmul.msk.bf16.gmra.mxu3 %vm204_vm2, %v1641_v55 }
 0x28f   :  { %v1449_v59 = vmax.f32 %v1416_v58, 0.0 }
 0x291   :  { %v1148_v60 = vpop.f32.mrf.mxu3  ;;  %2198 = vst.msk [vmem:[%s3348_s5 + $0x220] sm:$0xff] %vm204_vm2, %v1449_v59 }
 0x292   :  { %v1149_v57 = vadd.f32 %v3003_v15, %v1148_v60 }
 0x294   :  { %v1167_v61 = vmax.f32 %v1149_v57, 0.0  ;;  %v1417_v63 = vpop.f32.mrf.mxu2 }
 0x295   :  { %v1418_v1 = vadd.f32 %v3146_v24, %v1417_v63 }
 0x296   :  { %2113 = vst.msk [vmem:[%s3348_s5 + $0x1f0] sm:$0xff] %vm204_vm2, %v1167_v61 }
 0x297   :  { %v1450_v51 = vmax.f32 %v1418_v1, 0.0 }
 0x299   :  { %v1150_v62 = vpop.f32.mrf.mxu3  ;;  %2199 = vst.msk [vmem:[%s3348_s5 + $0x228] sm:$0xff] %vm204_vm2, %v1450_v51 }
 0x29a   :  { %v1151_v0 = vadd.f32 %v3003_v15, %v1150_v62 }
 0x29c   :  { %v1168_v2 = vmax.f32 %v1151_v0, 0.0  ;;  %v1420_v4 = vpop.f32.mrf.mxu2 }
 0x29d   :  { %v1421_v8 = vadd.f32 %v3146_v24, %v1420_v4 }
 0x29e   :  { %2114 = vst.msk [vmem:[%s3348_s5 + $0x1f8] sm:$0xff] %vm204_vm2, %v1168_v2 }
 0x29f   :  { %v1451_v9 = vmax.f32 %v1421_v8, 0.0 }
 0x2a1   :  { %v1697_v15 = vpop.f32.mrf.mxu3  ;;  %2200 = vst.msk [vmem:[%s3348_s5 + $0x230] sm:$0xff] %vm204_vm2, %v1451_v9 }
 0x2a2   :  { %v1698_v6 = vadd.f32 %v3207_v3, %v1697_v15 }
 0x2a4   :  { %v1737_v5 = vmax.f32 %v1698_v6, 0.0  ;;  %v1422_v12 = vpop.f32.mrf.mxu2 }
 0x2a5   :  { %v1423_v14 = vadd.f32 %v3146_v24, %v1422_v12 }
 0x2a6   :  { %2289 = vst.msk [vmem:[%s3348_s5 + $0x280] sm:$0xff] %vm204_vm2, %v1737_v5 }
 0x2a7   :  { %v1452_v17 = vmax.f32 %v1423_v14, 0.0 }
 0x2a9   :  { %v1699_v11 = vpop.f32.mrf.mxu3  ;;  %2201 = vst.msk [vmem:[%s3348_s5 + $0x238] sm:$0xff] %vm204_vm2, %v1452_v17 }
 0x2aa   :  { %v1700_v13 = vadd.f32 %v3207_v3, %v1699_v11 }
 0x2ac   :  { %v1738_v16 = vmax.f32 %v1700_v13, 0.0  ;;  %v1425_v19 = vpop.f32.mrf.mxu2 }
 0x2ad   :  { %v1426_v28 = vadd.f32 %v3146_v24, %v1425_v19 }
 0x2ae   :  { %2290 = vst.msk [vmem:[%s3348_s5 + $0x288] sm:$0xff] %vm204_vm2, %v1738_v16 }
 0x2af   :  { %v1453_v23 = vmax.f32 %v1426_v28, 0.0 }
 0x2b1   :  { %v1702_v18 = vpop.f32.mrf.mxu3  ;;  %2202 = vst.msk [vmem:[%s3348_s5 + $0x240] sm:$0xff] %vm204_vm2, %v1453_v23 }
 0x2b2   :  { %v1703_v20 = vadd.f32 %v3207_v3, %v1702_v18 }
 0x2b4   :  { %v1739_v21 = vmax.f32 %v1703_v20, 0.0  ;;  %v1427_v26 = vpop.f32.mrf.mxu2 }
 0x2b5   :  { %v1428_v29 = vadd.f32 %v3146_v24, %v1427_v26 }
 0x2b6   :  { %2291 = vst.msk [vmem:[%s3348_s5 + $0x290] sm:$0xff] %vm204_vm2, %v1739_v21 }
 0x2b7   :  { %v1454_v31 = vmax.f32 %v1428_v29, 0.0 }
 0x2b9   :  { %v1704_v25 = vpop.f32.mrf.mxu3  ;;  %2203 = vst.msk [vmem:[%s3348_s5 + $0x248] sm:$0xff] %vm204_vm2, %v1454_v31 }
 0x2ba   :  { %v1705_v27 = vadd.f32 %v3207_v3, %v1704_v25 }
 0x2bc   :  { %v1740_v30 = vmax.f32 %v1705_v27, 0.0  ;;  %v1430_v33 = vpop.f32.mrf.mxu2 }
 0x2bd   :  { %v1431_v35 = vadd.f32 %v3146_v24, %v1430_v33 }
 0x2be   :  { %2292 = vst.msk [vmem:[%s3348_s5 + $0x298] sm:$0xff] %vm204_vm2, %v1740_v30 }
 0x2bf   :  { %v1455_v37 = vmax.f32 %v1431_v35, 0.0 }
 0x2c1   :  { %v1707_v32 = vpop.f32.mrf.mxu3  ;;  %2204 = vst.msk [vmem:[%s3348_s5 + $0x250] sm:$0xff] %vm204_vm2, %v1455_v37 }
 0x2c2   :  { %v1708_v34 = vadd.f32 %v3207_v3, %v1707_v32 }
 0x2c4   :  { %v1741_v36 = vmax.f32 %v1708_v34, 0.0  ;;  %v1432_v39 = vpop.f32.mrf.mxu2 }
 0x2c5   :  { %v1433_v41 = vadd.f32 %v3146_v24, %v1432_v39 }
 0x2c6   :  { %2293 = vst.msk [vmem:[%s3348_s5 + $0x2a0] sm:$0xff] %vm204_vm2, %v1741_v36 }
 0x2c7   :  { %v1456_v43 = vmax.f32 %v1433_v41, 0.0 }
 0x2c9   :  { %v1709_v38 = vpop.f32.mrf.mxu3  ;;  %2205 = vst.msk [vmem:[%s3348_s5 + $0x258] sm:$0xff] %vm204_vm2, %v1456_v43 }
 0x2ca   :  { %v1710_v40 = vadd.f32 %v3207_v3, %v1709_v38 }
 0x2cc   :  { %v1742_v42 = vmax.f32 %v1710_v40, 0.0  ;;  %v1435_v45 = vpop.f32.mrf.mxu2 }
 0x2cd   :  { %v1436_v46 = vadd.f32 %v3146_v24, %v1435_v45 }
 0x2ce   :  { %2294 = vst.msk [vmem:[%s3348_s5 + $0x2a8] sm:$0xff] %vm204_vm2, %v1742_v42 }
 0x2cf   :  { %v1457_v48 = vmax.f32 %v1436_v46, 0.0 }
 0x2d1   :  { %v1712_v44 = vpop.f32.mrf.mxu3  ;;  %2206 = vst.msk [vmem:[%s3348_s5 + $0x260] sm:$0xff] %vm204_vm2, %v1457_v48 }
 0x2d2   :  { %v1713_v22 = vadd.f32 %v3207_v3, %v1712_v44 }
 0x2d4   :  { %v1743_v47 = vmax.f32 %v1713_v22, 0.0  ;;  %v1437_v50 = vpop.f32.mrf.mxu2 }
 0x2d5   :  { %v1438_v53 = vadd.f32 %v3146_v24, %v1437_v50 }
 0x2d6   :  { %2295 = vst.msk [vmem:[%s3348_s5 + $0x2b0] sm:$0xff] %vm204_vm2, %v1743_v47 }
 0x2d7   :  { %v1458_v55 = vmax.f32 %v1438_v53, 0.0 }
 0x2d9   :  { %v1714_v49 = vpop.f32.mrf.mxu3  ;;  %2207 = vst.msk [vmem:[%s3348_s5 + $0x268] sm:$0xff] %vm204_vm2, %v1458_v55 }
 0x2da   :  { %v1715_v52 = vadd.f32 %v3207_v3, %v1714_v49 }
 0x2dc   :  { %v1744_v54 = vmax.f32 %v1715_v52, 0.0  ;;  %v1440_v10 = vpop.f32.mrf.mxu2 }
 0x2dd   :  { %v1441_v7 = vadd.f32 %v3146_v24, %v1440_v10 }
 0x2de   :  { %2296 = vst.msk [vmem:[%s3348_s5 + $0x2b8] sm:$0xff] %vm204_vm2, %v1744_v54 }
 0x2df   :  { %v1459_v58 = vmax.f32 %v1441_v7, 0.0 }
 0x2e1   :  { %v1717_v56 = vpop.f32.mrf.mxu3  ;;  %2208 = vst.msk [vmem:[%s3348_s5 + $0x270] sm:$0xff] %vm204_vm2, %v1459_v58 }
 0x2e2   :  { %v1718_v60 = vadd.f32 %v3207_v3, %v1717_v56 }
 0x2e4   :  { %v1745_v57 = vmax.f32 %v1718_v60, 0.0  ;;  %v1442_v59 = vpop.f32.mrf.mxu2 }
 0x2e5   :  { %v1443_v63 = vadd.f32 %v3146_v24, %v1442_v59 }
 0x2e6   :  { %2297 = vst.msk [vmem:[%s3348_s5 + $0x2c0] sm:$0xff] %vm204_vm2, %v1745_v57 }
 0x2e7   :  { %v1460_v1 = vmax.f32 %v1443_v63, 0.0 }
 0x2e9   :  { %v1719_v61 = vpop.f32.mrf.mxu3  ;;  %2209 = vst.msk [vmem:[%s3348_s5 + $0x278] sm:$0xff] %vm204_vm2, %v1460_v1 }
 0x2ea   :  { %v1720_v62 = vadd.f32 %v3207_v3, %v1719_v61 }
 0x2ec   :  { %v1746_v0 = vmax.f32 %v1720_v62, 0.0 }
 0x2ee   :  { %2298 = vst.msk [vmem:[%s3348_s5 + $0x2c8] sm:$0xff] %vm204_vm2, %v1746_v0 }
 0x2f1   :  { %v1722_v2 = vpop.f32.mrf.mxu3 }
 0x2f2   :  { %v1723_v51 = vadd.f32 %v3207_v3, %v1722_v2 }
 0x2f4   :  { %v1747_v15 = vmax.f32 %v1723_v51, 0.0 }
 0x2f6   :  { %2299 = vst.msk [vmem:[%s3348_s5 + $0x2d0] sm:$0xff] %vm204_vm2, %v1747_v15 }
 0x2f9   :  { %v1724_v24 = vpop.f32.mrf.mxu3 }
 0x2fa   :  { %v1725_v4 = vadd.f32 %v3207_v3, %v1724_v24 }
 0x2fc   :  { %v1748_v6 = vmax.f32 %v1725_v4, 0.0 }
 0x2fe   :  { %2300 = vst.msk [vmem:[%s3348_s5 + $0x2d8] sm:$0xff] %vm204_vm2, %v1748_v6 }
 0x301   :  { %v1727_v8 = vpop.f32.mrf.mxu3 }
 0x302   :  { %v1728_v5 = vadd.f32 %v3207_v3, %v1727_v8 }
 0x304   :  { %v1749_v9 = vmax.f32 %v1728_v5, 0.0 }
 0x306   :  { %2301 = vst.msk [vmem:[%s3348_s5 + $0x2e0] sm:$0xff] %vm204_vm2, %v1749_v9 }
 0x309   :  { %v1729_v11 = vpop.f32.mrf.mxu3 }
 0x30a   :  { %v1730_v12 = vadd.f32 %v3207_v3, %v1729_v11 }
 0x30c   :  { %v1750_v13 = vmax.f32 %v1730_v12, 0.0 }
 0x30e   :  { %2302 = vst.msk [vmem:[%s3348_s5 + $0x2e8] sm:$0xff] %vm204_vm2, %v1750_v13 }
 0x311   :  { %v1732_v14 = vpop.f32.mrf.mxu3 }
 0x312   :  { %v1733_v16 = vadd.f32 %v3207_v3, %v1732_v14 }
 0x314   :  { %v1751_v17 = vmax.f32 %v1733_v16, 0.0 }
 0x316   :  { %2303 = vst.msk [vmem:[%s3348_s5 + $0x2f0] sm:$0xff] %vm204_vm2, %v1751_v17 }
 0x319   :  { %v1734_v18 = vpop.f32.mrf.mxu3 }
 0x31a   :  { %v1735_v19 = vadd.f32 %v3207_v3, %v1734_v18 }
 0x31c   :  { %v1752_v20 = vmax.f32 %v1735_v19, 0.0 }
 0x31e   :  { %2304 = vst.msk [vmem:[%s3348_s5 + $0x2f8] sm:$0xff] %vm204_vm2, %v1752_v20 }

// kernel: _lambda_.5
= control target key start
LH: loop header
LB: loop body
LE: loop exit
PB: predicated region body
PF: predicated region fallthrough
CT: control target
= control target key end

     0   :  { %s1107_s12 = smov 0   ;;  %s1109_s13 = smov 0   ;;  %s1454_s0 = inlined_call_operand.vmem [shape: bf16[2,64,800], index: 0, kind: input, shape index: {}]   ;;  %s1455_s1 = inlined_call_operand.vmem [shape: bf16[64,64], index: 1, kind: input, shape index: {}]   ;;  %s1456_s2 = inlined_call_operand.vmem [shape: f32[64,1], index: 2, kind: input, shape index: {}]   ;;  %s1457_s3 = inlined_call_operand.vmem [shape: f32[2,64,800], index: 3, kind: output, shape index: {}]  }
   0x1   :  { %s1111_s14 = smov 0  }
   0x2 LB: > { %s25_s15 = sadd.s32 1, %s1080_s13  ;;  %p827_p0 = scmp.ge.s32.totalorder %s1084_s14, 1  ;;  %s1084_s14 = sphi %s1111_s14, %s13_s14   ;;  %s1080_s13 = sphi %s1109_s13, %s1459_s13   ;;  %s1076_s12 = sphi %s1107_s12, %s1458_s12  }
   0x3   : > { %p27_p1 = scmp.ge.s32.totalorder %s25_s15, 2  ;;  %p158_p2 = scmp.lt.s32.totalorder %s1084_s14, 3 }
   0x5   : > { %s1461_s15 = smov (%p27_p1, %s25_s15), 0  ;;  %p159_p3 = pnand %p827_p0, %p158_p2 }
   0x6   : > { %p191_p4 = scmp.lt.s32.totalorder (!%p159_p3), %s1076_s12, 1 }
   0x7   : > { %162 = sbr.rel (%p159_p3) target bundleno = 276 (0x114), region = 32 }
   0xc   : > { %s1463_s12 = smov (!%p191_p4, %s1076_s12), 1  ;;  %v253_v0 = vld [vmem:[%s1456_s2 + $0x10] sm:$0xff]  ;;  %v251_v1 = vld [vmem:[%s1456_s2] sm:$0xff]  ;;  %v1086_v2 = vmov 0   ;;  %v1197_v44 = vld [vmem:[%s1455_s1 + $0x8] sm:$0xff]  ;;  %vm463_vm0 = vcmask 523264  }
   0xd   : > { %s1032_s20 = smul.u32 224, %s1463_s12  ;;  %1060 = vset.pattern.permute.xlu1 %v1086_v2  ;;  %1059 = vset.pattern.permute.xlu0 %v1086_v2  ;;  %v1192_v43 = vld [vmem:[%s1455_s1] sm:$0xff]  ;;  %v254_v45 = vld [vmem:[%s1456_s2 + $0x18] sm:$0xff]  ;;  %v252_v46 = vld [vmem:[%s1456_s2 + $0x8] sm:$0xff]  ;;  %vm685_vm1 = vcmask 261120  }
   0xe   : > { %271 = vperm.xlu1 %1060, %v253_v0   ;;  %261 = vperm.xlu0 %1059, %v251_v1   ;;  %s1033_s21 = smul.u32 448, %s1463_s12 }
   0xf   : > { %s1137_s23 = scalar_lea.vmem %s1454_s0, %s1032_s20  ;;  %1061 = vset.pattern.permute.xlu2 %v1086_v2 }
  0x10   : > { %v932_v3 = vld [vmem:[%s1137_s23 + $0xa8] sm:$0xf]  ;;  %v1016_v4 = vld [vmem:[%s1137_s23 + $0xc0] sm:$0xf0]  ;;  %v1013_v5 = vld [vmem:[%s1137_s23 + $0xac] sm:$0xf]  ;;  %s1311_s24 = scalar_lea.vmem %s1457_s3, %s1033_s21 }
  0x11   : > { %v933_v6 = vor.u32 %v1016_v4, %v932_v3  ;;  %v934_v7 = vld [vmem:[%s1137_s23 + $0xc4] sm:$0xf0]  ;;  %v940_v8 = vld [vmem:[%s1137_s23 + $0xb0] sm:$0xf]  ;;  %v1017_v9 = vld [vmem:[%s1137_s23 + $0xc8] sm:$0xf0] }
  0x12   : > { %v1145_v10 = vor.u32 %v1013_v5, %v934_v7  ;;  %v1147_v11 = vor.u32 %v1017_v9, %v940_v8  ;;  %v904_v12 = vld [vmem:[%s1137_s23 + $0x70] sm:$0xf]  ;;  %v1009_v13 = vld [vmem:[%s1137_s23 + $0x88] sm:$0xf0]  ;;  %v1006_v14 = vld [vmem:[%s1137_s23 + $0x74] sm:$0xf] }
  0x13   : > { %480 = vmatpush.bf16.msra.mxu0 %v933_v6  ;;  %1020 = vmatpush.bf16.msra.mxu3 %v933_v6  ;;  %v905_v15 = vor.u32 %v1009_v13, %v904_v12  ;;  %v906_v16 = vld [vmem:[%s1137_s23 + $0x8c] sm:$0xf0]  ;;  %v912_v17 = vld [vmem:[%s1137_s23 + $0x78] sm:$0xf]  ;;  %v1010_v18 = vld [vmem:[%s1137_s23 + $0x90] sm:$0xf0] }
  0x14   : > { %1024 = vmatpush.bf16.msra.mxu1 %v1145_v10  ;;  %1028 = vmatpush.bf16.msra.mxu2 %v1147_v11  ;;  %v1157_v19 = vor.u32 %v1006_v14, %v906_v16  ;;  %v1159_v20 = vor.u32 %v1010_v18, %v912_v17  ;;  %v876_v21 = vld [vmem:[%s1137_s23 + $0x38] sm:$0xf]  ;;  %v1002_v22 = vld [vmem:[%s1137_s23 + $0x50] sm:$0xf0]  ;;  %v999_v23 = vld [vmem:[%s1137_s23 + $0x3c] sm:$0xf] }
  0x15   : > { %v878_v24 = vld [vmem:[%s1137_s23 + $0x54] sm:$0xf0]  ;;  %v884_v25 = vld [vmem:[%s1137_s23 + $0x40] sm:$0xf]  ;;  %v1003_v26 = vld [vmem:[%s1137_s23 + $0x58] sm:$0xf0]  ;;  %v877_v27 = vor.u32 %v1002_v22, %v876_v21 }
  0x16   : > { %v848_v28 = vld [vmem:[%s1137_s23] sm:$0xf]  ;;  %v1170_v29 = vor.u32 %v999_v23, %v878_v24  ;;  %v1172_v30 = vor.u32 %v1003_v26, %v884_v25  ;;  %v995_v31 = vld [vmem:[%s1137_s23 + $0x18] sm:$0xf0]  ;;  %v992_v32 = vld [vmem:[%s1137_s23 + $0x4] sm:$0xf]  ;;  %276 = vperm.xlu1 %1060, %v254_v45   ;;  %266 = vperm.xlu0 %1059, %v252_v46  }
  0x17   : > { %481 = vmatpush.bf16.msra.mxu0 %v905_v15  ;;  %1021 = vmatpush.bf16.msra.mxu3 %v905_v15  ;;  %v850_v33 = vld [vmem:[%s1137_s23 + $0x1c] sm:$0xf0]  ;;  %v856_v34 = vld [vmem:[%s1137_s23 + $0x8] sm:$0xf]  ;;  %v996_v35 = vld [vmem:[%s1137_s23 + $0x20] sm:$0xf0]  ;;  %v849_v40 = vor.u32 %v995_v31, %v848_v28 }
  0x18   : > { %1025 = vmatpush.bf16.msra.mxu1 %v1157_v19  ;;  %1029 = vmatpush.bf16.msra.mxu2 %v1159_v20  ;;  %v1014_v36 = vld [vmem:[%s1137_s23 + $0xb4] sm:$0xf]  ;;  %v942_v37 = vld [vmem:[%s1137_s23 + $0xcc] sm:$0xf0]  ;;  %v956_v38 = vld [vmem:[%s1137_s23 + $0xc0] sm:$0xf]  ;;  %v1185_v41 = vor.u32 %v992_v32, %v850_v33  ;;  %v1187_v42 = vor.u32 %v996_v35, %v856_v34 }
  0x19   : > { %v1019_v39 = vld [vmem:[%s1137_s23 + $0xd8] sm:$0xf0]  ;;  %v945_v47 = vor.u32 %v1014_v36, %v942_v37  ;;  %v950_v50 = vld [vmem:[%s1137_s23 + $0xd4] sm:$0xf0]  ;;  %v928_v53 = vld [vmem:[%s1137_s23 + $0x88] sm:$0xf] }
  0x1a   : > { %v957_v48 = vor.u32 %v1019_v39, %v956_v38  ;;  %v1015_v49 = vld [vmem:[%s1137_s23 + $0xbc] sm:$0xf]  ;;  %v914_v52 = vld [vmem:[%s1137_s23 + $0x94] sm:$0xf0]  ;;  %v1012_v54 = vld [vmem:[%s1137_s23 + $0xa0] sm:$0xf0] }
  0x1b   : > { %482 = vmatpush.bf16.msra.mxu0 %v877_v27  ;;  %1022 = vmatpush.bf16.msra.mxu3 %v877_v27  ;;  %v1007_v51 = vld [vmem:[%s1137_s23 + $0x7c] sm:$0xf]  ;;  %v953_v55 = vor.u32 %v1015_v49, %v950_v50  ;;  %v929_v57 = vor.u32 %v1012_v54, %v928_v53  ;;  %v1008_v58 = vld [vmem:[%s1137_s23 + $0x84] sm:$0xf]  ;;  %v922_v59 = vld [vmem:[%s1137_s23 + $0x9c] sm:$0xf0] }
  0x1c   : > { %1026 = vmatpush.bf16.msra.mxu1 %v1170_v29  ;;  %1030 = vmatpush.bf16.msra.mxu2 %v1172_v30  ;;  %v917_v56 = vor.u32 %v1007_v51, %v914_v52  ;;  %v1000_v60 = vld [vmem:[%s1137_s23 + $0x44] sm:$0xf]  ;;  %v886_v61 = vld [vmem:[%s1137_s23 + $0x5c] sm:$0xf0]  ;;  %v900_v62 = vld [vmem:[%s1137_s23 + $0x50] sm:$0xf]  ;;  %v925_v0 = vor.u32 %v1008_v58, %v922_v59 }
  0x1d   : > { %v1005_v63 = vld [vmem:[%s1137_s23 + $0x68] sm:$0xf0]  ;;  %v889_v1 = vor.u32 %v1000_v60, %v886_v61  ;;  %v894_v4 = vld [vmem:[%s1137_s23 + $0x64] sm:$0xf0]  ;;  %v872_v7 = vld [vmem:[%s1137_s23 + $0x18] sm:$0xf] }
  0x1e   : > { %v901_v2 = vor.u32 %v1005_v63, %v900_v62  ;;  %v1001_v3 = vld [vmem:[%s1137_s23 + $0x4c] sm:$0xf]  ;;  %v858_v6 = vld [vmem:[%s1137_s23 + $0x24] sm:$0xf0]  ;;  %v998_v8 = vld [vmem:[%s1137_s23 + $0x30] sm:$0xf0] }
  0x1f   : > { %483 = vmatpush.bf16.msra.mxu0 %v849_v40  ;;  %1023 = vmatpush.bf16.msra.mxu3 %v849_v40  ;;  %v993_v5 = vld [vmem:[%s1137_s23 + $0xc] sm:$0xf]  ;;  %v897_v9 = vor.u32 %v1001_v3, %v894_v4  ;;  %v873_v12 = vor.u32 %v998_v8, %v872_v7  ;;  %v994_v13 = vld [vmem:[%s1137_s23 + $0x14] sm:$0xf]  ;;  %v866_v14 = vld [vmem:[%s1137_s23 + $0x2c] sm:$0xf0] }
  0x20   : > { %1027 = vmatpush.bf16.msra.mxu1 %v1185_v41  ;;  %1031 = vmatpush.bf16.msra.mxu2 %v1187_v42  ;;  %v869_v15 = vor.u32 %v994_v13, %v866_v14  ;;  %v990_v16 = vld [vmem:[%s1455_s1 + $0x10] sm:$0xff]  ;;  %v255_v18 = vld [vmem:[%s1456_s2 + $0x20] sm:$0xff]  ;;  %v1011_v24 = vld [vmem:[%s1137_s23 + $0x98] sm:$0xf0] }
  0x21   : > { %v257_v17 = vld [vmem:[%s1456_s2 + $0x30] sm:$0xff]  ;;  %281 = vperm.xlu2 %1061, %v255_v18   ;;  %v920_v23 = vld [vmem:[%s1137_s23 + $0x80] sm:$0xf]  ;;  %v256_v25 = vld [vmem:[%s1456_s2 + $0x28] sm:$0xff] }
  0x22   : > { %958 = vmatmul.msk.bf16.vlgmr.msra.gmra.mxu0 %vm463_vm0, %v1192_v43  ;;  %959 = vmatmul.msk.bf16.vlgmr.msra.gmra.mxu3 %vm463_vm0, %v1197_v44  ;;  %v1018_v21 = vld [vmem:[%s1137_s23 + $0xd0] sm:$0xf0]  ;;  %v921_v26 = vor.u32 %v1011_v24, %v920_v23  ;;  %v892_v27 = vld [vmem:[%s1137_s23 + $0x48] sm:$0xf]  ;;  %v1004_v28 = vld [vmem:[%s1137_s23 + $0x60] sm:$0xf0] }
  0x23   : > { %567 = vmatpush.bf16.msrb.mxu3 %v945_v47  ;;  %963 = vmatmul.msk.bf16.vlgmr.msra.gmra.mxu1 %vm463_vm0, %v1197_v44  ;;  %v997_v31 = vld [vmem:[%s1137_s23 + $0x28] sm:$0xf0] }
  0x24   : > { %654 = vmatpush.bf16.msrb.mxu2 %v957_v48  ;;  %509 = vmatpush.bf16.msrb.mxu0 %v1145_v10  ;;  %v861_v10 = vor.u32 %v993_v5, %v858_v6 }
  0x25   : > { %967 = vmatmul.msk.bf16.vlgmr.msra.gmra.mxu2 %vm463_vm0, %v1197_v44  ;;  %625 = vmatpush.bf16.msrb.mxu1 %v953_v55 }
  0x26   : > { %291 = vperm.xlu0 %1059, %v257_v17  }
  0x27   : > { %568 = vmatpush.bf16.msrb.mxu3 %v917_v56 }
  0x28   : > { %655 = vmatpush.bf16.msrb.mxu2 %v929_v57  ;;  %510 = vmatpush.bf16.msrb.mxu0 %v1157_v19  ;;  %v948_v19 = vld [vmem:[%s1137_s23 + $0xb8] sm:$0xf] }
  0x29   : > { %626 = vmatpush.bf16.msrb.mxu1 %v925_v0  ;;  %v949_v22 = vor.u32 %v1018_v21, %v948_v19  ;;  %286 = vperm.xlu2 %1061, %v256_v25  }
  0x2b   : > { %569 = vmatpush.bf16.msrb.mxu3 %v889_v1 }
  0x2c   : > { %656 = vmatpush.bf16.msrb.mxu2 %v901_v2  ;;  %511 = vmatpush.bf16.msrb.mxu0 %v1170_v29  ;;  %v893_v29 = vor.u32 %v1004_v28, %v892_v27 }
  0x2d   : > { %627 = vmatpush.bf16.msrb.mxu1 %v897_v9 }
  0x2f   : > { %570 = vmatpush.bf16.msrb.mxu3 %v861_v10 }
  0x30   : > { %657 = vmatpush.bf16.msrb.mxu2 %v873_v12  ;;  %512 = vmatpush.bf16.msrb.mxu0 %v1185_v41 }
  0x31   : > { %628 = vmatpush.bf16.msrb.mxu1 %v869_v15 }
  0x32   : > { %960 = vmatmul.msk.bf16.gmra.mxu3 %vm463_vm0, %v990_v16 }
  0x33   : > { %962 = vmatmul.msk.bf16.vlgmr.msrb.gmra.mxu0 %vm463_vm0, %v1192_v43  ;;  %964 = vmatmul.msk.bf16.gmra.mxu1 %vm463_vm0, %v990_v16 }
  0x34   : > { %538 = vmatpush.bf16.msra.mxu0 %v1147_v11  ;;  %v258_v11 = vld [vmem:[%s1456_s2 + $0x38] sm:$0xff] }
  0x35   : > { %968 = vmatmul.msk.bf16.gmra.mxu2 %vm463_vm0, %v990_v16  ;;  %296 = vperm.xlu1 %1060, %v258_v11  }
  0x38   : > { %539 = vmatpush.bf16.msra.mxu0 %v1159_v20  ;;  %v991_v20 = vld [vmem:[%s1455_s1 + $0x18] sm:$0xff] }
  0x3c   : > { %540 = vmatpush.bf16.msra.mxu0 %v1172_v30  ;;  %v864_v30 = vld [vmem:[%s1137_s23 + $0x10] sm:$0xf] }
  0x3d   : > { %v865_v32 = vor.u32 %v997_v31, %v864_v30 }
  0x40   : > { %541 = vmatpush.bf16.msra.mxu0 %v1187_v42 }
  0x42   : > { %961 = vmatmul.msk.bf16.gmra.mxu3 %vm463_vm0, %v991_v20 }
  0x43   : > { %965 = vmatmul.msk.bf16.gmra.mxu1 %vm463_vm0, %v991_v20  ;;  %966 = vmatmul.msk.bf16.vlgmr.msra.gmra.mxu0 %vm463_vm0, %v1192_v43 }
  0x44   : > { %596 = vmatpush.bf16.msrb.mxu0 %v949_v22 }
  0x45   : > { %969 = vmatmul.msk.bf16.gmra.mxu2 %vm463_vm0, %v991_v20 }
  0x48   : > { %597 = vmatpush.bf16.msrb.mxu0 %v921_v26 }
  0x4c   : > { %598 = vmatpush.bf16.msrb.mxu0 %v893_v29 }
  0x50   : > { %599 = vmatpush.bf16.msrb.mxu0 %v865_v32 }
  0x52   : > { %970 = vmatmul.msk.bf16.vlgmr.msrb.gmra.mxu3 %vm463_vm0, %v1192_v43 }
  0x53   : > { %974 = vmatmul.msk.bf16.vlgmr.msrb.gmra.mxu0 %vm463_vm0, %v1192_v43  ;;  %978 = vmatmul.msk.bf16.vlgmr.msrb.gmra.mxu1 %vm463_vm0, %v1192_v43 }
  0x55   : > { %982 = vmatmul.msk.bf16.vlgmr.msrb.gmra.mxu2 %vm463_vm0, %v1192_v43 }
  0x62   : > { %971 = vmatmul.msk.bf16.gmra.mxu3 %vm463_vm0, %v1197_v44 }
  0x63   : > { %975 = vmatmul.msk.bf16.gmra.mxu0 %vm463_vm0, %v1197_v44  ;;  %979 = vmatmul.msk.bf16.gmra.mxu1 %vm463_vm0, %v1197_v44 }
  0x65   : > { %983 = vmatmul.msk.bf16.gmra.mxu2 %vm463_vm0, %v1197_v44 }
  0x72   : > { %972 = vmatmul.msk.bf16.gmra.mxu3 %vm463_vm0, %v990_v16 }
  0x73   : > { %976 = vmatmul.msk.bf16.gmra.mxu0 %vm463_vm0, %v990_v16  ;;  %980 = vmatmul.msk.bf16.gmra.mxu1 %vm463_vm0, %v990_v16 }
  0x75   : > { %984 = vmatmul.msk.bf16.gmra.mxu2 %vm463_vm0, %v990_v16 }
  0x7b   : > { %v1329_v49 = vpop.permute.xlu2 %281 }
  0x80   : > { %v1303_v33 = vpop.permute.xlu0 %261  ;;  %v1306_v34 = vpop.permute.xlu1 %271 }
  0x82   : > { %973 = vmatmul.msk.bf16.gmra.mxu3 %vm463_vm0, %v991_v20 }
  0x83   : > { %977 = vmatmul.msk.bf16.gmra.mxu0 %vm463_vm0, %v991_v20  ;;  %981 = vmatmul.msk.bf16.gmra.mxu1 %vm463_vm0, %v991_v20  ;;  %v1340_v60 = vpop.permute.xlu2 %286 }
  0x85   : > { %985 = vmatmul.msk.bf16.gmra.mxu2 %vm463_vm0, %v991_v20 }
  0x88   : > { %v1317_v40 = vpop.permute.xlu0 %266  ;;  %v1320_v43 = vpop.permute.xlu1 %276 }
  0x98   : > { %v1350_v5 = vpop.permute.xlu0 %291 }
  0x9f   : > { %v485_v35 = vpop.f32.mrf.mxu0 }
  0xa0   : > { %v486_v36 = vadd.f32 %v485_v35, %v1303_v33  ;;  %v519_v37 = vpop.f32.mrf.mxu1 }
  0xa1   : > { %v520_v38 = vadd.f32 %v519_v37, %v1306_v34 }
  0xa2   : > { %679 = vst [vmem:[%s1311_s24] sm:$0xff] %v486_v36 }
  0xa3   : > { %695 = vst [vmem:[%s1311_s24 + $0x78] sm:$0xff] %v520_v38 }
  0xa5   : > { %v490_v39 = vpop.f32.mrf.mxu3 }
  0xa6   : > { %v491_v41 = vadd.f32 %v490_v39, %v1306_v34 }
  0xa7   : > { %v487_v45 = vpop.f32.mrf.mxu0  ;;  %v1360_v15 = vpop.permute.xlu1 %296 }
  0xa8   : > { %v548_v42 = vpop.f32.mrf.mxu2  ;;  %694 = vst [vmem:[%s1311_s24 + $0x70] sm:$0xff] %v491_v41  ;;  %v488_v46 = vadd.f32 %v487_v45, %v1317_v40  ;;  %v521_v47 = vpop.f32.mrf.mxu1 }
  0xa9   : > { %v549_v44 = vadd.f32 %v548_v42, %v1306_v34  ;;  %v522_v48 = vadd.f32 %v521_v47, %v1320_v43 }
  0xaa   : > { %687 = vst [vmem:[%s1311_s24 + $0x38] sm:$0xff] %v488_v46 }
  0xab   : > { %696 = vst [vmem:[%s1311_s24 + $0x80] sm:$0xff] %v549_v44 }
  0xac   : > { %702 = vst [vmem:[%s1311_s24 + $0xb0] sm:$0xff] %v522_v48 }
  0xad   : > { %v492_v50 = vpop.f32.mrf.mxu3 }
  0xae   : > { %v493_v51 = vadd.f32 %v492_v50, %v1320_v43 }
  0xb0   : > { %v550_v52 = vpop.f32.mrf.mxu2  ;;  %701 = vst [vmem:[%s1311_s24 + $0xa8] sm:$0xff] %v493_v51  ;;  %v514_v54 = vpop.f32.mrf.mxu0 }
  0xb1   : > { %v551_v53 = vadd.f32 %v550_v52, %v1320_v43  ;;  %v524_v55 = vpop.f32.mrf.mxu1  ;;  %v515_v56 = vadd.f32 %v514_v54, %v1303_v33 }
  0xb2   : > { %v525_v57 = vadd.f32 %v524_v55, %v1329_v49 }
  0xb3   : > { %703 = vst [vmem:[%s1311_s24 + $0xb8] sm:$0xff] %v551_v53 }
  0xb4   : > { %680 = vst [vmem:[%s1311_s24 + $0x8] sm:$0xff] %v515_v56 }
  0xb5   : > { %709 = vst [vmem:[%s1311_s24 + $0xe8] sm:$0xff] %v525_v57  ;;  %v495_v58 = vpop.f32.mrf.mxu3 }
  0xb6   : > { %v496_v59 = vadd.f32 %v495_v58, %v1329_v49 }
  0xb8   : > { %v553_v61 = vpop.f32.mrf.mxu2  ;;  %708 = vst [vmem:[%s1311_s24 + $0xe0] sm:$0xff] %v496_v59  ;;  %v516_v63 = vpop.f32.mrf.mxu0 }
  0xb9   : > { %v554_v62 = vadd.f32 %v553_v61, %v1329_v49  ;;  %v526_v0 = vpop.f32.mrf.mxu1  ;;  %v517_v1 = vadd.f32 %v516_v63, %v1317_v40 }
  0xba   : > { %v527_v2 = vadd.f32 %v526_v0, %v1340_v60 }
  0xbb   : > { %710 = vst [vmem:[%s1311_s24 + $0xf0] sm:$0xff] %v554_v62 }
  0xbc   : > { %688 = vst [vmem:[%s1311_s24 + $0x40] sm:$0xff] %v517_v1 }
  0xbd   : > { %716 = vst [vmem:[%s1311_s24 + $0x120] sm:$0xff] %v527_v2  ;;  %v497_v3 = vpop.f32.mrf.mxu3 }
  0xbe   : > { %v498_v4 = vadd.f32 %v497_v3, %v1340_v60 }
  0xc0   : > { %v555_v6 = vpop.f32.mrf.mxu2  ;;  %715 = vst [vmem:[%s1311_s24 + $0x118] sm:$0xff] %v498_v4  ;;  %v543_v9 = vpop.f32.mrf.mxu0 }
  0xc1   : > { %v556_v7 = vadd.f32 %v555_v6, %v1340_v60  ;;  %v529_v8 = vpop.f32.mrf.mxu1  ;;  %v544_v10 = vadd.f32 %v543_v9, %v1303_v33 }
  0xc2   : > { %v530_v12 = vadd.f32 %v529_v8, %v1350_v5 }
  0xc3   : > { %717 = vst [vmem:[%s1311_s24 + $0x128] sm:$0xff] %v556_v7 }
  0xc4   : > { %681 = vst [vmem:[%s1311_s24 + $0x10] sm:$0xff] %v544_v10 }
  0xc5   : > { %723 = vst [vmem:[%s1311_s24 + $0x158] sm:$0xff] %v530_v12  ;;  %v500_v13 = vpop.f32.mrf.mxu3 }
  0xc6   : > { %v501_v14 = vadd.f32 %v500_v13, %v1350_v5 }
  0xc8   : > { %v558_v16 = vpop.f32.mrf.mxu2  ;;  %722 = vst [vmem:[%s1311_s24 + $0x150] sm:$0xff] %v501_v14  ;;  %v545_v11 = vpop.f32.mrf.mxu0 }
  0xc9   : > { %v559_v17 = vadd.f32 %v558_v16, %v1350_v5  ;;  %v531_v18 = vpop.f32.mrf.mxu1  ;;  %v546_v21 = vadd.f32 %v545_v11, %v1317_v40 }
  0xca   : > { %v532_v19 = vadd.f32 %v531_v18, %v1360_v15 }
  0xcb   : > { %724 = vst [vmem:[%s1311_s24 + $0x160] sm:$0xff] %v559_v17 }
  0xcc   : > { %730 = vst [vmem:[%s1311_s24 + $0x190] sm:$0xff] %v532_v19 }
  0xcd   : > { %689 = vst [vmem:[%s1311_s24 + $0x48] sm:$0xff] %v546_v21  ;;  %v502_v22 = vpop.f32.mrf.mxu3 }
  0xce   : > { %v503_v23 = vadd.f32 %v502_v22, %v1360_v15 }
  0xd0   : > { %v560_v24 = vpop.f32.mrf.mxu2  ;;  %729 = vst [vmem:[%s1311_s24 + $0x188] sm:$0xff] %v503_v23  ;;  %v601_v20 = vpop.f32.mrf.mxu0 }
  0xd1   : > { %v561_v25 = vadd.f32 %v560_v24, %v1360_v15  ;;  %v630_v26 = vpop.f32.mrf.mxu1  ;;  %v602_v27 = vadd.f32 %v601_v20, %v1303_v33 }
  0xd2   : > { %v631_v28 = vadd.f32 %v630_v26, %v1303_v33 }
  0xd3   : > { %731 = vst [vmem:[%s1311_s24 + $0x198] sm:$0xff] %v561_v25 }
  0xd4   : > { %683 = vst [vmem:[%s1311_s24 + $0x20] sm:$0xff] %v602_v27 }
  0xd5   : > { %684 = vst [vmem:[%s1311_s24 + $0x28] sm:$0xff] %v631_v28  ;;  %v572_v29 = vpop.f32.mrf.mxu3 }
  0xd6   : > { %v573_v30 = vadd.f32 %v572_v29, %v1303_v33 }
  0xd8   : > { %v659_v31 = vpop.f32.mrf.mxu2  ;;  %682 = vst [vmem:[%s1311_s24 + $0x18] sm:$0xff] %v573_v30  ;;  %v603_v35 = vpop.f32.mrf.mxu0 }
  0xd9   : > { %v660_v32 = vadd.f32 %v659_v31, %v1303_v33  ;;  %v632_v36 = vpop.f32.mrf.mxu1  ;;  %v604_v37 = vadd.f32 %v603_v35, %v1317_v40 }
  0xda   : > { %v633_v38 = vadd.f32 %v632_v36, %v1317_v40 }
  0xdb   : > { %686 = vst.msk [vmem:[%s1311_s24 + $0x30] sm:$0xff] %vm685_vm1, %v660_v32 }
  0xdc   : > { %691 = vst [vmem:[%s1311_s24 + $0x58] sm:$0xff] %v604_v37 }
  0xdd   : > { %692 = vst [vmem:[%s1311_s24 + $0x60] sm:$0xff] %v633_v38  ;;  %v574_v39 = vpop.f32.mrf.mxu3 }
  0xde   : > { %v575_v41 = vadd.f32 %v574_v39, %v1317_v40 }
  0xe0   : > { %v661_v42 = vpop.f32.mrf.mxu2  ;;  %690 = vst [vmem:[%s1311_s24 + $0x50] sm:$0xff] %v575_v41  ;;  %v606_v44 = vpop.f32.mrf.mxu0 }
  0xe1   : > { %v662_v33 = vadd.f32 %v661_v42, %v1317_v40  ;;  %v635_v45 = vpop.f32.mrf.mxu1  ;;  %v607_v46 = vadd.f32 %v606_v44, %v1306_v34 }
  0xe2   : > { %v636_v47 = vadd.f32 %v635_v45, %v1306_v34 }
  0xe3   : > { %693 = vst.msk [vmem:[%s1311_s24 + $0x68] sm:$0xff] %vm685_vm1, %v662_v33 }
  0xe4   : > { %698 = vst [vmem:[%s1311_s24 + $0x90] sm:$0xff] %v607_v46 }
  0xe5   : > { %699 = vst [vmem:[%s1311_s24 + $0x98] sm:$0xff] %v636_v47  ;;  %v577_v48 = vpop.f32.mrf.mxu3 }
  0xe6   : > { %v578_v50 = vadd.f32 %v577_v48, %v1306_v34 }
  0xe8   : > { %v664_v51 = vpop.f32.mrf.mxu2  ;;  %697 = vst [vmem:[%s1311_s24 + $0x88] sm:$0xff] %v578_v50  ;;  %v608_v52 = vpop.f32.mrf.mxu0 }
  0xe9   : > { %v665_v40 = vadd.f32 %v664_v51, %v1306_v34  ;;  %v637_v53 = vpop.f32.mrf.mxu1  ;;  %v609_v54 = vadd.f32 %v608_v52, %v1320_v43 }
  0xea   : > { %v638_v55 = vadd.f32 %v637_v53, %v1320_v43 }
  0xeb   : > { %700 = vst.msk [vmem:[%s1311_s24 + $0xa0] sm:$0xff] %vm685_vm1, %v665_v40 }
  0xec   : > { %705 = vst [vmem:[%s1311_s24 + $0xc8] sm:$0xff] %v609_v54 }
  0xed   : > { %706 = vst [vmem:[%s1311_s24 + $0xd0] sm:$0xff] %v638_v55  ;;  %v579_v56 = vpop.f32.mrf.mxu3 }
  0xee   : > { %v580_v57 = vadd.f32 %v579_v56, %v1320_v43 }
  0xf0   : > { %v666_v58 = vpop.f32.mrf.mxu2  ;;  %704 = vst [vmem:[%s1311_s24 + $0xc0] sm:$0xff] %v580_v57  ;;  %v611_v59 = vpop.f32.mrf.mxu0 }
  0xf1   : > { %v667_v34 = vadd.f32 %v666_v58, %v1320_v43  ;;  %v640_v61 = vpop.f32.mrf.mxu1  ;;  %v612_v62 = vadd.f32 %v611_v59, %v1329_v49 }
  0xf2   : > { %v641_v63 = vadd.f32 %v640_v61, %v1329_v49 }
  0xf3   : > { %707 = vst.msk [vmem:[%s1311_s24 + $0xd8] sm:$0xff] %vm685_vm1, %v667_v34 }
  0xf4   : > { %712 = vst [vmem:[%s1311_s24 + $0x100] sm:$0xff] %v612_v62 }
  0xf5   : > { %713 = vst [vmem:[%s1311_s24 + $0x108] sm:$0xff] %v641_v63  ;;  %v582_v0 = vpop.f32.mrf.mxu3 }
  0xf6   : > { %v583_v1 = vadd.f32 %v582_v0, %v1329_v49 }
  0xf8   : > { %v669_v2 = vpop.f32.mrf.mxu2  ;;  %711 = vst [vmem:[%s1311_s24 + $0xf8] sm:$0xff] %v583_v1  ;;  %v613_v3 = vpop.f32.mrf.mxu0 }
  0xf9   : > { %v670_v43 = vadd.f32 %v669_v2, %v1329_v49  ;;  %v642_v4 = vpop.f32.mrf.mxu1  ;;  %v614_v6 = vadd.f32 %v613_v3, %v1340_v60 }
  0xfa   : > { %v643_v7 = vadd.f32 %v642_v4, %v1340_v60 }
  0xfb   : > { %714 = vst.msk [vmem:[%s1311_s24 + $0x110] sm:$0xff] %vm685_vm1, %v670_v43 }
  0xfc   : > { %719 = vst [vmem:[%s1311_s24 + $0x138] sm:$0xff] %v614_v6 }
  0xfd   : > { %720 = vst [vmem:[%s1311_s24 + $0x140] sm:$0xff] %v643_v7  ;;  %v584_v8 = vpop.f32.mrf.mxu3 }
  0xfe   : > { %v585_v9 = vadd.f32 %v584_v8, %v1340_v60 }
 0x100   : > { %v671_v10 = vpop.f32.mrf.mxu2  ;;  %718 = vst [vmem:[%s1311_s24 + $0x130] sm:$0xff] %v585_v9  ;;  %v616_v12 = vpop.f32.mrf.mxu0 }
 0x101   : > { %v672_v49 = vadd.f32 %v671_v10, %v1340_v60  ;;  %v645_v13 = vpop.f32.mrf.mxu1  ;;  %v617_v14 = vadd.f32 %v616_v12, %v1350_v5 }
 0x102   : > { %v646_v16 = vadd.f32 %v645_v13, %v1350_v5 }
 0x103   : > { %721 = vst.msk [vmem:[%s1311_s24 + $0x148] sm:$0xff] %vm685_vm1, %v672_v49 }
 0x104   : > { %726 = vst [vmem:[%s1311_s24 + $0x170] sm:$0xff] %v617_v14 }
 0x105   : > { %727 = vst [vmem:[%s1311_s24 + $0x178] sm:$0xff] %v646_v16  ;;  %v587_v17 = vpop.f32.mrf.mxu3 }
 0x106   : > { %v588_v18 = vadd.f32 %v587_v17, %v1350_v5 }
 0x108   : > { %v674_v11 = vpop.f32.mrf.mxu2  ;;  %725 = vst [vmem:[%s1311_s24 + $0x168] sm:$0xff] %v588_v18  ;;  %v618_v19 = vpop.f32.mrf.mxu0 }
 0x109   : > { %v675_v60 = vadd.f32 %v674_v11, %v1350_v5  ;;  %v647_v21 = vpop.f32.mrf.mxu1  ;;  %v619_v22 = vadd.f32 %v618_v19, %v1360_v15 }
 0x10a   : > { %v648_v23 = vadd.f32 %v647_v21, %v1360_v15 }
 0x10b   : > { %728 = vst.msk [vmem:[%s1311_s24 + $0x180] sm:$0xff] %vm685_vm1, %v675_v60 }
 0x10c   : > { %733 = vst [vmem:[%s1311_s24 + $0x1a8] sm:$0xff] %v619_v22 }
 0x10d   : > { %734 = vst [vmem:[%s1311_s24 + $0x1b0] sm:$0xff] %v648_v23  ;;  %v589_v24 = vpop.f32.mrf.mxu3 }
 0x10e   : > { %v590_v25 = vadd.f32 %v589_v24, %v1360_v15 }
 0x110   : > { %v676_v20 = vpop.f32.mrf.mxu2  ;;  %732 = vst [vmem:[%s1311_s24 + $0x1a0] sm:$0xff] %v590_v25 }
 0x111   : > { %v677_v26 = vadd.f32 %v676_v20, %v1360_v15 }
 0x113   : > { %735 = vst.msk [vmem:[%s1311_s24 + $0x1b8] sm:$0xff] %vm685_vm1, %v677_v26 }
 0x114 PF: > { %s13_s14 = sadd.s32 1, %s1084_s14   ;;  %s1458_s12 = smov %s1080_s13 }
 0x115   : > { %p10_p5 = scmp.ge.s32.totalorder %s13_s14, 4   ;;  %s1459_s13 = smov %s1461_s15 }
 0x117   :  { %12 = sbr.rel (!%p10_p5) target bundleno = 2 (0x2), region = 62 }

</bundles_post_ra>
